<compile_context>
chip_gen: v6e
topology: v6e:2x2x1
jax: 0.10.0
libtpu: 0.0.40
codegen_flags: <defaults>
</compile_context>

<pallas_src>
import jax
import jax.numpy as jnp
from jax.experimental import pallas as pl
from jax.experimental.pallas import tpu as pltpu


def _ema_chunk_kernel(x_ref, mask_ref, p_ref, q_ref, qc_ref, gp_ref, g_ref,
                      w_ref, o_ref, h_state):
    # x_ref:    (1, Dt, C)   current (batch, D-tile, time-chunk) block
    # mask_ref: (1, 1, C)    padding mask chunk (1 == pad)
    # p_ref:    (Dt, N)      p
    # q_ref:    (Dt, N)      q
    # qc_ref:   (Dt, N)      q**C                    (precomputed, resident)
    # gp_ref:   (Dt, N)      gamma * p               (precomputed, resident)
    # g_ref:    (Dt, N, C)   gamma * q**(t+1)        (precomputed, resident)
    # w_ref:    (Dt, 1)      omega
    # o_ref:    (1, Dt, C)   output block
    # h_state:  (Dt, N)      EMA hidden state carried across time chunks
    Dt, N, C = g_ref.shape
    c_idx = pl.program_id(2)

    @pl.when(c_idx == 0)
    def _():
        h_state[...] = jnp.zeros_like(h_state)

    x = x_ref[0]                                  # (Dt, C)
    # residual uses the *unmasked* x, matching the PyTorch module
    residual = x * w_ref[...]                     # (Dt, C)
    xm = x * (1.0 - mask_ref[0])                  # (Dt, C)

    p = p_ref[...]                                # (Dt, N)
    q = q_ref[...]                                # (Dt, N)
    h_prev = h_state[...]                         # (Dt, N)

    # ---- intra-chunk decayed prefix sums (log-depth scan) -----------------
    #   S[d, n, t] = sum_{s<=t within chunk} q[d,n]^(t-s) * xm[d, s]
    # Only ceil(log2(C)) steps; per step one zero-padded lane shift + one
    # mul/add on a (Dt, N, C) tile.  No (D, N, L) tensor, no exp/log in-kernel.
    S = jnp.broadcast_to(xm[:, None, :], (Dt, N, C))
    qpow = q                                      # q^(2^j), by repeated squaring
    for j in range((C - 1).bit_length()):         # static, bounded unroll
        sh = 1 << j
        shifted = jnp.concatenate(
            [jnp.zeros((Dt, N, sh), S.dtype), S[:, :, :C - sh]], axis=-1)
        S = S + qpow[:, :, None] * shifted
        qpow = qpow * qpow

    # ---- combine with the EMA state carried in from previous chunks -------
    #   h[d,n,t] = q^(t+1) * h_prev[d,n] + p[d,n] * S[d,n,t]
    #   y[d,t]   = sum_n gamma[d,n] * h[d,n,t]
    #            = sum_n [ (gamma*p)*S + (gamma*q^(t+1)) * h_prev ]
    y = jnp.sum(gp_ref[...][:, :, None] * S + g_ref[...] * h_prev[:, :, None],
                axis=1)                                           # (Dt, C)

    o_ref[0] = (y + residual).astype(o_ref.dtype)

    # carry the hidden state at the last position of this chunk
    h_state[...] = qc_ref[...] * h_prev + p * S[:, :, C - 1]


def base_moving_layer_forward(x, p, q, gamma, omega, padding_mask=None,
                              *, chunk=128, d_tile=None):
    """x: (B, D, L) float32; p/q/gamma: (D, N); omega: (D, 1);
    padding_mask: optional (B, L), 1 == pad."""
    B, D, L = x.shape
    N = p.shape[1]
    f32 = jnp.float32

    x = x.astype(f32)
    p = p.astype(f32)
    q = q.astype(f32)
    gamma = gamma.astype(f32)
    omega = omega.astype(f32)

    if padding_mask is None:
        mask = jnp.zeros((B, 1, L), f32)
    else:
        mask = padding_mask.astype(f32).reshape(B, 1, L)

    # ---- time chunking: lane-dense C-wide blocks; pad ragged L -------------
    C = int(chunk) if chunk and chunk > 0 else 128
    Lp = -(-L // C) * C
    if Lp != L:
        x = jnp.pad(x, ((0, 0), (0, 0), (0, Lp - L)))
        mask = jnp.pad(mask, ((0, 0), (0, 0), (0, Lp - L)), constant_values=1.0)
    n_chunks = Lp // C

    # ---- D tiling ----------------------------------------------------------
    if d_tile is None:
        d_tile = D
        for cand in (128, 64, 32, 16, 8):
            if D % cand == 0:
                d_tile = cand
                break
    if D % d_tile != 0 or (d_tile % 8 != 0 and d_tile != D):
        d_tile = D
    n_dtiles = D // d_tile

    # ---- hoisted EMA tables (computed ONCE, outside the grid) -------------
    # guard log(q) against q underflowing to 0 (trained/quantized params)
    logq = jnp.log(jnp.maximum(q, jnp.finfo(f32).tiny))            # (D, N)
    t = jnp.arange(1, C + 1, dtype=f32)                            # 1..C
    G = gamma[:, :, None] * jnp.exp(t[None, None, :] * logq[:, :, None])  # (D,N,C)
    gp = gamma * p                                                 # (D, N)
    qC = jnp.exp(float(C) * logq)                                  # (D, N)

    grid = (B, n_dtiles, n_chunks)

    out = pl.pallas_call(
        _ema_chunk_kernel,
        out_shape=jax.ShapeDtypeStruct((B, D, Lp), f32),
        grid_spec=pltpu.PrefetchScalarGridSpec(
            num_scalar_prefetch=0,
            grid=grid,
            in_specs=[
                pl.BlockSpec((1, d_tile, C), lambda b, d, c: (b, d, c)),   # x
                pl.BlockSpec((1, 1, C),      lambda b, d, c: (b, 0, c)),   # mask
                pl.BlockSpec((d_tile, N),    lambda b, d, c: (d, 0)),      # p
                pl.BlockSpec((d_tile, N),    lambda b, d, c: (d, 0)),      # q
                pl.BlockSpec((d_tile, N),    lambda b, d, c: (d, 0)),      # q^C
                pl.BlockSpec((d_tile, N),    lambda b, d, c: (d, 0)),      # gamma*p
                pl.BlockSpec((d_tile, N, C), lambda b, d, c: (d, 0, 0)),   # gamma*q^(t+1)
                pl.BlockSpec((d_tile, 1),    lambda b, d, c: (d, 0)),      # omega
            ],
            out_specs=pl.BlockSpec((1, d_tile, C), lambda b, d, c: (b, d, c)),
            scratch_shapes=[pltpu.VMEM((d_tile, N), jnp.float32)],
        ),
        compiler_params=pltpu.CompilerParams(
            dimension_semantics=("parallel", "parallel", "arbitrary"),
            vmem_limit_bytes=32 * 1024 * 1024),
    )(x, mask, p, q, qC, gp, G, omega)

    return out if Lp == L else out[:, :, :L]


def _reference_forward(x, p, q, gamma, omega, padding_mask=None):
    """Pure-JAX reference mirroring the PyTorch semantics (direct causal conv
    is numerically identical to fftconv)."""
    B, D, L = x.shape
    residual = x * omega[None, :, :]
    xm = x
    if padding_mask is not None:
        xm = x * (1.0 - padding_mask.astype(x.dtype)[:, None, :])
    l = jnp.arange(L, dtype=jnp.float32)
    vander = jnp.exp(l[None, None, :] * jnp.log(q)[:, :, None])     # (D, N, L)
    k = jnp.einsum('dnl,dn->dl', p[:, :, None] * vander, gamma)     # (D, L)
    idx = jnp.arange(L)[:, None] - jnp.arange(L)[None, :]           # t - s
    toep = jnp.where(idx[None] >= 0,
                     jnp.take(k, jnp.clip(idx, 0, L - 1), axis=1), 0.0)
    out = jnp.einsum('dts,bds->bdt', toep, xm)
    return out + residual


if __name__ == "__main__":
    # lane-dense shape: L multiple of 128, D tiled into two 8-aligned tiles
    B, D, N, L = 2, 64, 8, 256

    key = jax.random.PRNGKey(0)
    kx, kd, ka, kg, kw = jax.random.split(key, 5)

    x = jax.random.normal(kx, (B, D, L), dtype=jnp.float32)

    # synthetic EMA parameters (shapes as in MultiHeadEMA):
    #   p = sigmoid(delta), q = 1 - p * sigmoid(alpha)  -> q in (0, 1)
    delta = jax.random.normal(kd, (D, N), dtype=jnp.float32)
    alpha = jax.random.normal(ka, (D, N), dtype=jnp.float32)
    p = jax.nn.sigmoid(delta)
    q = 1.0 - p * jax.nn.sigmoid(alpha)
    gamma = jax.random.normal(kg, (D, N), dtype=jnp.float32) / jnp.sqrt(N)
    omega = jax.random.normal(kw, (D, 1), dtype=jnp.float32)

    # padding mask: last 17 positions of the second batch element are pads
    padding_mask = jnp.zeros((B, L), jnp.float32).at[1, L - 17:].set(1.0)

    out = base_moving_layer_forward(x, p, q, gamma, omega, padding_mask,
                                    chunk=128, d_tile=32)
    out = jax.block_until_ready(out)

    ref = _reference_forward(x, p, q, gamma, omega, padding_mask)
    assert out.shape == (B, D, L) and out.dtype == jnp.float32
    assert jnp.allclose(out, ref, atol=2e-3, rtol=2e-3), (
        float(jnp.max(jnp.abs(out - ref))))

    # ragged-length path: L not a multiple of the chunk -> padded internally
    B2, D2, L2 = 2, 16, 40
    x2 = jax.random.normal(kx, (B2, D2, L2), dtype=jnp.float32)
    out2 = jax.block_until_ready(
        base_moving_layer_forward(x2, p[:D2], q[:D2], gamma[:D2], omega[:D2]))
    ref2 = _reference_forward(x2, p[:D2], q[:D2], gamma[:D2], omega[:D2])
    assert out2.shape == (B2, D2, L2)
    assert jnp.allclose(out2, ref2, atol=2e-3, rtol=2e-3), (
        float(jnp.max(jnp.abs(out2 - ref2))))

    print("KERNEL_OK")
</pallas_src>

<mosaic_0001>
module attributes {stable_mosaic.version = 11 : i64} {
  func.func @_ema_chunk_kernel(%arg0: i32, %arg1: i32, %arg2: i32, %arg3: memref<1x32x128xf32, #tpu.memory_space<vmem>>, %arg4: memref<1x1x128xf32, #tpu.memory_space<vmem>>, %arg5: memref<32x8xf32, #tpu.memory_space<vmem>>, %arg6: memref<32x8xf32, #tpu.memory_space<vmem>>, %arg7: memref<32x8xf32, #tpu.memory_space<vmem>>, %arg8: memref<32x8xf32, #tpu.memory_space<vmem>>, %arg9: memref<32x8x128xf32, #tpu.memory_space<vmem>>, %arg10: memref<32x1xf32, #tpu.memory_space<vmem>>, %arg11: memref<1x32x128xf32, #tpu.memory_space<vmem>>, %arg12: memref<32x8xf32, #tpu.memory_space<vmem>>) attributes {dimension_semantics = [#tpu.dimension_semantics<parallel>, #tpu.dimension_semantics<parallel>, #tpu.dimension_semantics<arbitrary>], iteration_bounds = array<i64: 2, 2, 2>, scalar_prefetch = 0 : i64, scratch_operands = 1 : i64, tpu.core_type = #tpu.core_type<tc>, window_params = [{transform_indices = @transform_0, window_bounds = array<i64: 1, 32, 128>}, {transform_indices = @transform_1, window_bounds = array<i64: 1, 1, 128>}, {transform_indices = @transform_2, window_bounds = array<i64: 32, 8>}, {transform_indices = @transform_3, window_bounds = array<i64: 32, 8>}, {transform_indices = @transform_4, window_bounds = array<i64: 32, 8>}, {transform_indices = @transform_5, window_bounds = array<i64: 32, 8>}, {transform_indices = @transform_6, window_bounds = array<i64: 32, 8, 128>}, {transform_indices = @transform_7, window_bounds = array<i64: 32, 1>}, {transform_indices = @transform_8, window_bounds = array<i64: 1, 32, 128>}]} {
    %c0_i32 = arith.constant 0 : i32
    %0 = arith.cmpi eq, %arg2, %c0_i32 : i32
    %1 = arith.extui %0 : i1 to i32
    %c0_i32_0 = arith.constant 0 : i32
    %2 = arith.cmpi ne, %1, %c0_i32_0 : i32
    scf.if %2 {
      %cst_34 = arith.constant 0.000000e+00 : f32
      %96 = vector.broadcast %cst_34 : f32 to vector<32x8xf32>
      %c0_35 = arith.constant 0 : index
      %c0_36 = arith.constant 0 : index
      %97 = vector.load %arg12[%c0_35, %c0_36] : memref<32x8xf32, #tpu.memory_space<vmem>>, vector<32x8xf32>
      tpu.vector_store %arg12[%c0_35, %c0_36], %96 {strides = array<i32>} : memref<32x8xf32, #tpu.memory_space<vmem>>, vector<32x8xf32>,
    } else {
    }
    %c0 = arith.constant 0 : index
    %c0_1 = arith.constant 0 : index
    %c0_2 = arith.constant 0 : index
    %3 = vector.load %arg3[%c0, %c0_1, %c0_2] : memref<1x32x128xf32, #tpu.memory_space<vmem>>, vector<1x32x128xf32>
    %4 = vector.shape_cast %3 : vector<1x32x128xf32> to vector<32x128xf32>
    %c0_3 = arith.constant 0 : index
    %c0_4 = arith.constant 0 : index
    %5 = vector.load %arg10[%c0_3, %c0_4] : memref<32x1xf32, #tpu.memory_space<vmem>>, vector<32x1xf32>
    %6 = vector.broadcast %5 : vector<32x1xf32> to vector<32x128xf32>
    %7 = arith.mulf %4, %6 : vector<32x128xf32>
    %c0_5 = arith.constant 0 : index
    %c0_6 = arith.constant 0 : index
    %c0_7 = arith.constant 0 : index
    %8 = vector.load %arg4[%c0_5, %c0_6, %c0_7] : memref<1x1x128xf32, #tpu.memory_space<vmem>>, vector<1x1x128xf32>
    %9 = vector.shape_cast %8 : vector<1x1x128xf32> to vector<1x128xf32>
    %cst = arith.constant 1.000000e+00 : f32
    %10 = vector.broadcast %cst : f32 to vector<1x128xf32>
    %11 = arith.subf %10, %9 : vector<1x128xf32>
    %12 = vector.broadcast %11 : vector<1x128xf32> to vector<32x128xf32>
    %13 = arith.mulf %4, %12 : vector<32x128xf32>
    %c0_8 = arith.constant 0 : index
    %c0_9 = arith.constant 0 : index
    %14 = vector.load %arg5[%c0_8, %c0_9] : memref<32x8xf32, #tpu.memory_space<vmem>>, vector<32x8xf32>
    %c0_10 = arith.constant 0 : index
    %c0_11 = arith.constant 0 : index
    %15 = vector.load %arg6[%c0_10, %c0_11] : memref<32x8xf32, #tpu.memory_space<vmem>>, vector<32x8xf32>
    %c0_12 = arith.constant 0 : index
    %c0_13 = arith.constant 0 : index
    %16 = vector.load %arg12[%c0_12, %c0_13] : memref<32x8xf32, #tpu.memory_space<vmem>>, vector<32x8xf32>
    %17 = vector.shape_cast %13 : vector<32x128xf32> to vector<32x1x128xf32>
    %18 = vector.shape_cast %17 : vector<32x1x128xf32> to vector<32x1x128xf32>
    %19 = vector.broadcast %18 : vector<32x1x128xf32> to vector<32x8x128xf32>
    %cst_14 = arith.constant 0.000000e+00 : f32
    %20 = vector.broadcast %cst_14 : f32 to vector<32x8x1xf32>
    %21 = vector.extract_strided_slice %19 {offsets = [0, 0, 0], sizes = [32, 8, 127], strides = [1, 1, 1]} : vector<32x8x128xf32> to vector<32x8x127xf32>
    %22 = tpu.concatenate %20, %21 in 2 : vector<32x8x1xf32>, vector<32x8x127xf32> -> vector<32x8x128xf32>
    %23 = vector.shape_cast %15 : vector<32x8xf32> to vector<32x8x1xf32>
    %24 = vector.broadcast %23 : vector<32x8x1xf32> to vector<32x8x128xf32>
    %25 = arith.mulf %24, %22 : vector<32x8x128xf32>
    %26 = arith.addf %19, %25 : vector<32x8x128xf32>
    %27 = arith.mulf %15, %15 : vector<32x8xf32>
    %cst_15 = arith.constant 0.000000e+00 : f32
    %28 = vector.broadcast %cst_15 : f32 to vector<32x8x2xf32>
    %29 = vector.extract_strided_slice %26 {offsets = [0, 0, 0], sizes = [32, 8, 126], strides = [1, 1, 1]} : vector<32x8x128xf32> to vector<32x8x126xf32>
    %30 = tpu.concatenate %28, %29 in 2 : vector<32x8x2xf32>, vector<32x8x126xf32> -> vector<32x8x128xf32>
    %31 = vector.shape_cast %27 : vector<32x8xf32> to vector<32x8x1xf32>
    %32 = vector.broadcast %31 : vector<32x8x1xf32> to vector<32x8x128xf32>
    %33 = arith.mulf %32, %30 : vector<32x8x128xf32>
    %34 = arith.addf %26, %33 : vector<32x8x128xf32>
    %35 = arith.mulf %27, %27 : vector<32x8xf32>
    %cst_16 = arith.constant 0.000000e+00 : f32
    %36 = vector.broadcast %cst_16 : f32 to vector<32x8x4xf32>
    %37 = vector.extract_strided_slice %34 {offsets = [0, 0, 0], sizes = [32, 8, 124], strides = [1, 1, 1]} : vector<32x8x128xf32> to vector<32x8x124xf32>
    %38 = tpu.concatenate %36, %37 in 2 : vector<32x8x4xf32>, vector<32x8x124xf32> -> vector<32x8x128xf32>
    %39 = vector.shape_cast %35 : vector<32x8xf32> to vector<32x8x1xf32>
    %40 = vector.broadcast %39 : vector<32x8x1xf32> to vector<32x8x128xf32>
    %41 = arith.mulf %40, %38 : vector<32x8x128xf32>
    %42 = arith.addf %34, %41 : vector<32x8x128xf32>
    %43 = arith.mulf %35, %35 : vector<32x8xf32>
    %cst_17 = arith.constant 0.000000e+00 : f32
    %44 = vector.broadcast %cst_17 : f32 to vector<32x8x8xf32>
    %45 = vector.extract_strided_slice %42 {offsets = [0, 0, 0], sizes = [32, 8, 120], strides = [1, 1, 1]} : vector<32x8x128xf32> to vector<32x8x120xf32>
    %46 = tpu.concatenate %44, %45 in 2 : vector<32x8x8xf32>, vector<32x8x120xf32> -> vector<32x8x128xf32>
    %47 = vector.shape_cast %43 : vector<32x8xf32> to vector<32x8x1xf32>
    %48 = vector.broadcast %47 : vector<32x8x1xf32> to vector<32x8x128xf32>
    %49 = arith.mulf %48, %46 : vector<32x8x128xf32>
    %50 = arith.addf %42, %49 : vector<32x8x128xf32>
    %51 = arith.mulf %43, %43 : vector<32x8xf32>
    %cst_18 = arith.constant 0.000000e+00 : f32
    %52 = vector.broadcast %cst_18 : f32 to vector<32x8x16xf32>
    %53 = vector.extract_strided_slice %50 {offsets = [0, 0, 0], sizes = [32, 8, 112], strides = [1, 1, 1]} : vector<32x8x128xf32> to vector<32x8x112xf32>
    %54 = tpu.concatenate %52, %53 in 2 : vector<32x8x16xf32>, vector<32x8x112xf32> -> vector<32x8x128xf32>
    %55 = vector.shape_cast %51 : vector<32x8xf32> to vector<32x8x1xf32>
    %56 = vector.broadcast %55 : vector<32x8x1xf32> to vector<32x8x128xf32>
    %57 = arith.mulf %56, %54 : vector<32x8x128xf32>
    %58 = arith.addf %50, %57 : vector<32x8x128xf32>
    %59 = arith.mulf %51, %51 : vector<32x8xf32>
    %cst_19 = arith.constant 0.000000e+00 : f32
    %60 = vector.broadcast %cst_19 : f32 to vector<32x8x32xf32>
    %61 = vector.extract_strided_slice %58 {offsets = [0, 0, 0], sizes = [32, 8, 96], strides = [1, 1, 1]} : vector<32x8x128xf32> to vector<32x8x96xf32>
    %62 = tpu.concatenate %60, %61 in 2 : vector<32x8x32xf32>, vector<32x8x96xf32> -> vector<32x8x128xf32>
    %63 = vector.shape_cast %59 : vector<32x8xf32> to vector<32x8x1xf32>
    %64 = vector.broadcast %63 : vector<32x8x1xf32> to vector<32x8x128xf32>
    %65 = arith.mulf %64, %62 : vector<32x8x128xf32>
    %66 = arith.addf %58, %65 : vector<32x8x128xf32>
    %67 = arith.mulf %59, %59 : vector<32x8xf32>
    %cst_20 = arith.constant 0.000000e+00 : f32
    %68 = vector.broadcast %cst_20 : f32 to vector<32x8x64xf32>
    %69 = vector.extract_strided_slice %66 {offsets = [0, 0, 0], sizes = [32, 8, 64], strides = [1, 1, 1]} : vector<32x8x128xf32> to vector<32x8x64xf32>
    %70 = tpu.concatenate %68, %69 in 2 : vector<32x8x64xf32>, vector<32x8x64xf32> -> vector<32x8x128xf32>
    %71 = vector.shape_cast %67 : vector<32x8xf32> to vector<32x8x1xf32>
    %72 = vector.broadcast %71 : vector<32x8x1xf32> to vector<32x8x128xf32>
    %73 = arith.mulf %72, %70 : vector<32x8x128xf32>
    %74 = arith.addf %66, %73 : vector<32x8x128xf32>
    %c0_21 = arith.constant 0 : index
    %c0_22 = arith.constant 0 : index
    %75 = vector.load %arg8[%c0_21, %c0_22] : memref<32x8xf32, #tpu.memory_space<vmem>>, vector<32x8xf32>
    %76 = vector.shape_cast %75 : vector<32x8xf32> to vector<32x8x1xf32>
    %77 = vector.broadcast %76 : vector<32x8x1xf32> to vector<32x8x128xf32>
    %78 = arith.mulf %77, %74 : vector<32x8x128xf32>
    %c0_23 = arith.constant 0 : index
    %c0_24 = arith.constant 0 : index
    %c0_25 = arith.constant 0 : index
    %79 = vector.load %arg9[%c0_23, %c0_24, %c0_25] : memref<32x8x128xf32, #tpu.memory_space<vmem>>, vector<32x8x128xf32>
    %80 = vector.shape_cast %16 : vector<32x8xf32> to vector<32x8x1xf32>
    %81 = vector.broadcast %80 : vector<32x8x1xf32> to vector<32x8x128xf32>
    %82 = arith.mulf %79, %81 : vector<32x8x128xf32>
    %83 = arith.addf %78, %82 : vector<32x8x128xf32>
    %cst_26 = arith.constant dense<0.000000e+00> : vector<32x128xf32>
    %84 = vector.multi_reduction <add>, %83, %cst_26 [1] : vector<32x8x128xf32> to vector<32x128xf32>
    %85 = arith.addf %84, %7 : vector<32x128xf32>
    %c0_27 = arith.constant 0 : index
    %c0_28 = arith.constant 0 : index
    %c0_29 = arith.constant 0 : index
    %86 = vector.load %arg11[%c0_27, %c0_28, %c0_29] : memref<1x32x128xf32, #tpu.memory_space<vmem>>, vector<1x32x128xf32>
    %87 = vector.shape_cast %86 : vector<1x32x128xf32> to vector<32x128xf32>
    %88 = vector.shape_cast %85 : vector<32x128xf32> to vector<1x32x128xf32>
    tpu.vector_store %arg11[%c0_27, %c0_28, %c0_29], %88 {strides = array<i32>} : memref<1x32x128xf32, #tpu.memory_space<vmem>>, vector<1x32x128xf32>,
    %c0_30 = arith.constant 0 : index
    %c0_31 = arith.constant 0 : index
    %89 = vector.load %arg7[%c0_30, %c0_31] : memref<32x8xf32, #tpu.memory_space<vmem>>, vector<32x8xf32>
    %90 = arith.mulf %89, %16 : vector<32x8xf32>
    %91 = vector.extract_strided_slice %74 {offsets = [0, 0, 127], sizes = [32, 8, 1], strides = [1, 1, 1]} : vector<32x8x128xf32> to vector<32x8x1xf32>
    %92 = vector.shape_cast %91 : vector<32x8x1xf32> to vector<32x8xf32>
    %93 = arith.mulf %14, %92 : vector<32x8xf32>
    %94 = arith.addf %90, %93 : vector<32x8xf32>
    %c0_32 = arith.constant 0 : index
    %c0_33 = arith.constant 0 : index
    %95 = vector.load %arg12[%c0_32, %c0_33] : memref<32x8xf32, #tpu.memory_space<vmem>>, vector<32x8xf32>
    tpu.vector_store %arg12[%c0_32, %c0_33], %94 {strides = array<i32>} : memref<32x8xf32, #tpu.memory_space<vmem>>, vector<32x8xf32>,
    return
  }
  func.func @transform_0(%arg0: i32, %arg1: i32, %arg2: i32) -> (i32, i32, i32) {
    %c0_i32 = arith.constant 0 : i32
    return %arg0, %arg1, %arg2 : i32, i32, i32
  }
  func.func @transform_1(%arg0: i32, %arg1: i32, %arg2: i32) -> (i32, i32, i32) {
    %c0_i32 = arith.constant 0 : i32
    %c0_i32_0 = arith.constant 0 : i32
    return %arg0, %c0_i32, %arg2 : i32, i32, i32
  }
  func.func @transform_2(%arg0: i32, %arg1: i32, %arg2: i32) -> (i32, i32) {
    %c0_i32 = arith.constant 0 : i32
    %c0_i32_0 = arith.constant 0 : i32
    return %arg1, %c0_i32 : i32, i32
  }
  func.func @transform_3(%arg0: i32, %arg1: i32, %arg2: i32) -> (i32, i32) {
    %c0_i32 = arith.constant 0 : i32
    %c0_i32_0 = arith.constant 0 : i32
    return %arg1, %c0_i32 : i32, i32
  }
  func.func @transform_4(%arg0: i32, %arg1: i32, %arg2: i32) -> (i32, i32) {
    %c0_i32 = arith.constant 0 : i32
    %c0_i32_0 = arith.constant 0 : i32
    return %arg1, %c0_i32 : i32, i32
  }
  func.func @transform_5(%arg0: i32, %arg1: i32, %arg2: i32) -> (i32, i32) {
    %c0_i32 = arith.constant 0 : i32
    %c0_i32_0 = arith.constant 0 : i32
    return %arg1, %c0_i32 : i32, i32
  }
  func.func @transform_6(%arg0: i32, %arg1: i32, %arg2: i32) -> (i32, i32, i32) {
    %c0_i32 = arith.constant 0 : i32
    %c0_i32_0 = arith.constant 0 : i32
    %c0_i32_1 = arith.constant 0 : i32
    return %arg1, %c0_i32, %c0_i32_0 : i32, i32, i32
  }
  func.func @transform_7(%arg0: i32, %arg1: i32, %arg2: i32) -> (i32, i32) {
    %c0_i32 = arith.constant 0 : i32
    %c0_i32_0 = arith.constant 0 : i32
    return %arg1, %c0_i32 : i32, i32
  }
  func.func @transform_8(%arg0: i32, %arg1: i32, %arg2: i32) -> (i32, i32, i32) {
    %c0_i32 = arith.constant 0 : i32
    return %arg0, %arg1, %arg2 : i32, i32, i32
  }
}

</mosaic_0001>

<bundles_post_ra>
// kernel: tpu_custom_call.1
= control target key start
LH: loop header
LB: loop body
LE: loop exit
PB: predicated region body
PF: predicated region fallthrough
CT: control target
= control target key end

     0   :  { %s9429_s0 = inlined_call_operand.vmem [shape: f32[2,64,256], index: 0, kind: input, shape index: {}]   ;;  %s9430_s1 = inlined_call_operand.vmem [shape: f32[2,1,256], index: 1, kind: input, shape index: {}]   ;;  %s9431_s2 = inlined_call_operand.vmem [shape: f32[64,8], index: 2, kind: input, shape index: {}]   ;;  %s9432_s3 = inlined_call_operand.vmem [shape: f32[64,8], index: 3, kind: input, shape index: {}]   ;;  %s9433_s4 = inlined_call_operand.vmem [shape: f32[64,8], index: 4, kind: input, shape index: {}]   ;;  %s9434_s5 = inlined_call_operand.vmem [shape: f32[64,8], index: 5, kind: input, shape index: {}]   ;;  %s9435_s6 = inlined_call_operand.hbm [shape: f32[64,8,128], index: 6, kind: input, shape index: {}]   ;;  %s9436_s7 = inlined_call_operand.vmem [shape: f32[64,1], index: 7, kind: input, shape index: {}]   ;;  %s9437_s8 = inlined_call_operand.hbm [shape: f32[2,64,256], index: 8, kind: output, shape index: {}]  }
   0x1   :  { %9593 = sst [smem:[#allocation75_spill]] %s9429_s0 }
   0x2   :  { %9594 = sst [smem:[#allocation76_spill]] %s9430_s1 }
   0x3   :  { %9595 = sst [smem:[#allocation77_spill]] %s9431_s2 }
   0x4   :  { %9596 = sst [smem:[#allocation78_spill]] %s9433_s4 }
   0x5   :  { %9597 = sst [smem:[#allocation79_spill]] %s9434_s5 }
   0x6   :  { %9598 = sst [smem:[#allocation80_spill]] %s9435_s6 }
   0x7   :  { %9599 = sst [smem:[#allocation81_spill]] %s9436_s7 }
   0x8   :  { %9600 = sst [smem:[#allocation82_spill]] %s9437_s8 }
   0x9   :  { %13 = vsyncpa [#allocation5], 0 }
   0xa   :  { %15 = vsyncpa [#allocation5 + $0x1], 0 }
   0xb   :  { %16 = vsyncpa [#allocation6], 0 }
   0xc   :  { %18 = vsyncpa [#allocation6 + $0x1], 0  ;;  %s6018_s27 = smov 0   ;;  %s6020_s28 = smov 0  }
   0xd   :  { %s6022_s29 = smov 0   ;;  %s6024_s30 = smov 0  }
   0xe   :  { %s6026_s9 = smov 0   ;;  %s6028_s10 = smov 0  }
   0xf   :  { %s6030_s11 = smov 0   ;;  %s6032_s12 = smov 0  }
  0x10   :  { %s6034_s13 = smov 0   ;;  %s6036_s14 = smov 0  }
  0x11   :  { %s6038_s15 = smov 0   ;;  %s6040_s16 = smov 0  }
  0x12   :  { %s6042_s17 = smov 0  }
  0x13 LB: > { %9601 = sst [smem:[#allocation10_spill]] %s5918_s30  ;;  %s5614_s18 = sadd.s32 4294967295, %s5954_s17   ;;  %s5954_s17 = sphi %s6042_s17, %s24_s17   ;;  %s5950_s16 = sphi %s6040_s16, %s10053_s16   ;;  %s5946_s15 = sphi %s6038_s15, %s10043_s15   ;;  %s5942_s14 = sphi %s6036_s14, %s10042_s14   ;;  %s5938_s13 = sphi %s6034_s13, %s10052_s13   ;;  %s5934_s12 = sphi %s6032_s12, %s10040_s12   ;;  %s5930_s11 = sphi %s6030_s11, %s10051_s11   ;;  %s5926_s10 = sphi %s6028_s10, %s10050_s10   ;;  %s5922_s9 = sphi %s6026_s9, %s10049_s9   ;;  %s5918_s30 = sphi %s6024_s30, %s10036_s30   ;;  %s5914_s29 = sphi %s6022_s29, %s10048_s29   ;;  %s5910_s28 = sphi %s6020_s28, %s10047_s28   ;;  %s5906_s27 = sphi %s6018_s27, %s10046_s27  }
  0x14   : > { %9602 = sst [smem:[#allocation11_spill]] %s5926_s10  ;;  %s36_s20 = sadd.s32 1, %s5942_s14 }
  0x15   : > { %9603 = sst [smem:[#allocation12_spill]] %s5942_s14  ;;  %s39_s21 = sadd.s32 1, %s5946_s15 }
  0x16   : > { %9604 = sst [smem:[#allocation13_spill]] %s5946_s15  ;;  %p37_p0 = scmp.ge.s32.totalorder %s36_s20, 2 }
  0x17   : > { %9605 = sst [smem:[#allocation14_spill]] %s5950_s16  ;;  %s43_s22 = sadd.s32 1, %s5950_s16 }
  0x18   : > { %p61_p1 = scmp.ne.s32.totalorder %s5926_s10, %s5922_s9  ;;  %s10055_s20 = smov (%p37_p0, %s36_s20), 0 }
  0x19   : > { %9606 = sst [smem:[#allocation15_spill]] %s10055_s20  ;;  %s10057_s21 = smov (!%p37_p0, %s39_s21), %s5946_s15 }
  0x1a   : > { %s50_s24 = ssub.s32 %s5942_s14, %s10055_s20  ;;  %p62_p2 = scmp.eq.s32.totalorder %s5954_s17, 0 }
  0x1b   : > { %p41_p3 = scmp.ge.s32.totalorder %s10057_s21, 2  ;;  %s212_s25 = sadd.s32 1, %s5918_s30 }
  0x1c   : > { %p6101_p4 = por %p62_p2, %p61_p1  ;;  %p219_p5 = scmp.ne.s32.totalorder %s5918_s30, %s5914_s29 }
  0x1d   : > { %s10059_s21 = smov (%p41_p3, %s10057_s21), 0  ;;  %s10061_s22 = smov (!%p41_p3, %s43_s22), %s5950_s16 }
  0x1e   : > { %9608 = sst [smem:[#allocation16_spill]] %s10059_s21  ;;  %s48_s23 = ssub.s32 %s5946_s15, %s10059_s21 }
  0x1f   : > { %p6112_p6 = por %p219_p5, %p62_p2  ;;  %p45_p7 = scmp.ge.s32.totalorder %s10061_s22, 2 }
  0x20   : > { %p210_p8 = scmp.eq.s32.totalorder %s48_s23, 0  ;;  %p225_p9 = scmp.ne.s32.totalorder %s5914_s29, %s5910_s28 }
  0x21   : > { %p226_p10 = scmp.eq.s32.totalorder %s5614_s18, 0  ;;  %s10063_s22 = smov (%p45_p7, %s10061_s22), 0 }
  0x22   : > { %9610 = sst [smem:[#allocation17_spill]] %s10063_s22  ;;  %s47_s8 = ssub.s32 %s5950_s16, %s10063_s22 }
  0x23   : > { %s6123_s20 = scalar_select %p210_p8, %s5918_s30, %s212_s25  }
  0x24   : > { %p6127_p11 = por %p226_p10, %p225_p9  ;;  %s49_s7 = sor.u32 %s48_s23, %s47_s8 }
  0x25   : > { %9611 = sst [smem:[#allocation18_spill]] %s6123_s20  ;;  %p279_p12 = scmp.eq.s32.totalorder %s5614_s18, 7 }
  0x26   : > { %s51_s5 = sor.u32 %s50_s24, %s49_s7  ;;  %p284_p13 = scmp.ne.s32.totalorder %s5922_s9, %s5906_s27 }
  0x27   : > { %p52_p0 = scmp.eq.s32.totalorder %s51_s5, 0  ;;  %p6138_p2 = por %p279_p12, %p61_p1 }
  0x28   : > { %s9614_s4 = sadd.s32 4294967294, %s5954_s17   ;;  %s9615_s25 = sadd.s32 1, %s5926_s10 }
  0x29   : > { %p285_p3 = scmp.eq.s32.totalorder %s9614_s4, 7  ;;  %p5617_p7 = scmp.ge.s32.totalorder %s5954_s17, 8 }
  0x2a   : > { %s6147_s20 = scalar_select %p52_p0, %s5926_s10, %s9615_s25  }
  0x2b   : > { %p6149_p5 = por %p285_p3, %p284_p13  ;;  %301 = sbr.rel (%p5617_p7) target bundleno = 77 (0x4d), region = 16 }
  0x2c   : > { %9616 = sst [smem:[#allocation19_spill]] %s6147_s20 }
  0x2d   : > { %s9617_s22 = scalar_select %p6149_p5, 1, 0 }
  0x2f   : > { %9618 = sst [smem:[#allocation20_spill]] %s9617_s22 }
  0x30   : > { %304 = sbr.rel (!%p6101_p4) target bundleno = 61 (0x3d), region = 20  ;;  %s306_s5 = sand.u32 (%p6101_p4), 1, %s5926_s10  }
  0x31   : > { %s5649_s7 = sshll.u32 (%p6101_p4), %s5946_s15, 3  ;;  %s5618_s4 = sshll.u32 (%p6101_p4), %s306_s5, 5 }
  0x32   : > { %s311_s8 = sadd.s32 (%p6101_p4), %s5942_s14, %s5649_s7  ;;  %s5621_s18 = sshll.u32 (%p6101_p4), %s5950_s16, 4 }
  0x33   : > { %s313_s23 = sadd.s32 (%p6101_p4), %s5621_s18, %s311_s8  ;;  %s9619_s0 = sld [smem:[#allocation75_spill]] (%p6101_p4) }
  0x34   : > { %s5622_s24 = sshll.u32 (%p6101_p4), %s313_s23, 3  ;;  %s308_s26 = scalar_lea.vmem (%p6101_p4), [#allocation3], %s5618_s4 }
  0x39   : > { %s315_s22 = scalar_lea.vmem %s9619_s0, %s5622_s24 }
  0x3a   : > { %v350_v0 = vld [vmem:[%s315_s22] sm:$0xff]  ;;  %v352_v1 = vld [vmem:[%s315_s22 + $0x10] sm:$0xff] }
  0x3b   : > { %v354_v2 = vld [vmem:[%s315_s22 + $0x20] sm:$0xff]  ;;  %351 = vst [vmem:[%s308_s26] sm:$0xff] %v350_v0  ;;  %353 = vst [vmem:[%s308_s26 + $0x8] sm:$0xff] %v352_v1  ;;  %v356_v3 = vld [vmem:[%s315_s22 + $0x30] sm:$0xff] }
  0x3c   : > { %355 = vst [vmem:[%s308_s26 + $0x10] sm:$0xff] %v354_v2  ;;  %357 = vst [vmem:[%s308_s26 + $0x18] sm:$0xff] %v356_v3 }
  0x3d PF: > { %s410_s5 = sand.u32 1, %s5918_s30   ;;  %s5650_s7 = sshll.u32 %s5946_s15, 12 }
  0x3e   : > { %s5623_s8 = sshll.u32 %s410_s5, 8  ;;  %s9620_s6 = sld [smem:[#allocation80_spill]] }
  0x3f   : > { %s414_s24 = scalar_lea.vmem [#allocation4], %s5623_s8  ;;  %s411_s4 = scalar_lea.sflag [#allocation5], %s410_s5 }
  0x40   : > { %s421_s25 = sshll.u32 %s414_s24, 4  ;;  %s5956_s22 = smov [#allocation4]   ;;  %s422_s25 = int_to_ptr.vmem [resolvable:$true] %s421_s25 }
  0x41   : > { %s5804_s0 = scalar_lea.vmem %s422_s25, 4096  ;;  %s5808_s26 = sshll.u32 %s5956_s22, 4  ;;  %s5809_s26 = int_to_ptr.vmem [resolvable:$false] %s5808_s26 }
  0x42   : > { %p5805_p1 = scmp.ne.s32.totalorder %s422_s25, %s5804_s0  ;;  %s5810_s16 = scalar_lea.vmem %s5809_s26, 8192 }
  0x43   : > { %p5811_p9 = scmp.lt.s32.totalorder %s422_s25, %s5809_s26  ;;  %p5812_p10 = scmp.lt.s32.totalorder %s5810_s16, %s5804_s0 }
  0x44   : > { %s420_s20 = scalar_lea.hbm %s9620_s6, %s5650_s7  ;;  %p5806_p4 = pnand %p5805_p1, %p6112_p6 }
  0x45   : > { %p5813_p12 = por %p5812_p10, %p5811_p9 }
  0x46   : > { %p5807_p8 = pneg %p5806_p4 }
  0x48   : > { %p5814_p13 = pnand %p5813_p12, %p5807_p8 }
  0x4a   : > { %5817 = shalt.err (!%p5814_p13)
}
  0x4b   : > { %s5957_s18 = smov 128   ;;  %s5958_s7 = smov 8  }
  0x4c   : > { %5652 = dma.hbm_to_vmem [thread:$0]  (%p6112_p6), %s420_s20, 4096, %s422_s25, %s411_s4, %s5957_s18, %s5957_s18, %s5958_s7  }
  0x4d PF: > { %p5626_p0 = scmp.ge.s32.totalorder %s5954_s17, 1  ;;  %p438_p3 = scmp.lt.s32.totalorder %s5954_s17, 9 }
  0x4f   : > { %p439_p7 = pnand %p5626_p0, %p438_p3 }
  0x51   : > { %442 = sbr.rel (%p439_p7) target bundleno = 1694 (0x69e), region = 86 }
  0x56   : > { %s9444_s0 = sand.u32 1, %s5922_s9   ;;  %s451_s16 = sand.u32 1, %s5914_s29  }
  0x57   : > { %s5627_s5 = sshll.u32 %s9444_s0, 5  ;;  %s5628_s8 = sshll.u32 %s451_s16, 8 }
  0x58   : > { %s6178_s23 = scalar_lea.vmem [#allocation3], %s5627_s5  ;;  %s452_s19 = scalar_lea.sflag [#allocation5], %s451_s16 }
  0x59   : > { %s6180_s20 = scalar_lea.vmem [#allocation4], %s5628_s8 }
  0x5a   : > { %5897 = dma.done.wait (%p6127_p11), %s452_s19, 4096  }
  0x5b   : > { %5899 = vsyncadd (%p6127_p11), %s452_s19, 4294963200  ;;  %p525_p6 = scmp.lt.s32.totalorder %s5938_s13, 1  ;;  %p527_p1 = scmp.lt.s32.totalorder %s5930_s11, 1 }
  0x5c   : > { %s5631_s24 = sshll.u32 %s5934_s12, 2  ;;  %s9621_s1 = sld [smem:[#allocation76_spill]] }
  0x5d   : > { %s526_s25 = scalar_select %p525_p6, %s5938_s13, 1 }
  0x5e   : > { %s528_s4 = scalar_select %p527_p1, %s5930_s11, 1 }
  0x5f   : > { %s5630_s22 = sshll.u32 %s526_s25, 1  ;;  %p533_p4 = scmp.lt.s32.totalorder %s5631_s24, 7 }
  0x60   : > { %s530_s26 = sadd.s32 %s5630_s22, %s528_s4  ;;  %s9622_s2 = sld [smem:[#allocation77_spill]] }
  0x61   : > { %s10065_s24 = smov (!%p533_p4, %s5631_s24), 7  ;;  %s9623_s30 = sld [smem:[#allocation78_spill]] }
  0x62   : > { %s531_s16 = scalar_lea.vmem %s9621_s1, %s530_s26  ;;  %s5632_s21 = sshll.u32 %s10065_s24, 3 }
  0x63   : > { %s6202_s14 = scalar_lea.vmem %s9432_s3, %s5632_s21  ;;  %s9624_s26 = sld [smem:[#allocation79_spill]] }
  0x64   : > { %s9625_s8 = sld [smem:[#allocation81_spill]]  ;;  %p5641_p11 = scmp.ne.s32.totalorder %s5930_s11, 0 }
  0x66   : > { %s6197_s0 = scalar_lea.vmem %s9622_s2, %s5632_s21  ;;  %s6217_s2 = scalar_lea.vmem [#allocation7], %s5627_s5 }
  0x67   : > { %s6207_s4 = scalar_lea.vmem %s9623_s30, %s5632_s21  ;;  %567 = sbr.rel (%p5641_p11) target bundleno = 111 (0x6f), region = 98 }
  0x69   : > { %s6212_s7 = scalar_lea.vmem %s9624_s26, %s5632_s21 }
  0x6a   : > { %s561_s19 = scalar_lea.vmem %s9625_s8, %s5632_s21 }
  0x6c   : > { %vm568_vm0 = vcmask 64512   ;;  %v5959_v4 = vmov 0.0  }
  0x6d   : > { %569 = vst.msk [vmem:[#allocation2] sm:$0xff] %vm568_vm0, %v5959_v4  ;;  %570 = vst.msk [vmem:[#allocation2 + $0x8] sm:$0xff] %vm568_vm0, %v5959_v4 }
  0x6e   : > { %571 = vst.msk [vmem:[#allocation2 + $0x10] sm:$0xff] %vm568_vm0, %v5959_v4  ;;  %572 = vst.msk [vmem:[#allocation2 + $0x18] sm:$0xff] %vm568_vm0, %v5959_v4 }
  0x6f PF: > { %v579_v5 = vld [vmem:[%s561_s19 + $0x10] sm:$0xff]  ;;  %v577_v6 = vld [vmem:[%s561_s19] sm:$0xff]  ;;  %v608_v7 = vlaneseq  ;;  %v5960_v8 = vmov 0   ;;  %v5961_v10 = vmov 1966171168   ;;  %v580_v15 = vld [vmem:[%s561_s19 + $0x18] sm:$0xff] }
  0x70   : > { %5781 = vset.pattern.permute.xlu1 %v5960_v8  ;;  %5780 = vset.pattern.permute.xlu0 %v5960_v8  ;;  %v605_v9 = vld [vmem:[%s531_s16] sm:$0x1]  ;;  %v635_v11 = vunpack.c.l.s4 %v5961_v10  ;;  %v578_v16 = vld [vmem:[%s561_s19 + $0x8] sm:$0xff]  ;;  %s5962_s1 = smov 1   ;;  %v575_v53 = vld [vmem:[%s6178_s23 + $0x10] sm:$0xff]  ;;  %vm1085_vm1 = vcmask 7168  }
  0x71   : > { %593 = vperm.xlu1 %5781, %v579_v5   ;;  %583 = vperm.xlu0 %5780, %v577_v6   ;;  %v606_v12 = vsub.f32 1.0, %v605_v9  ;;  %v6220_v13 = vshrl.u32 %v608_v7, 7  ;;  %v5232_v14 = vand.u32 127, %v608_v7  ;;  %v573_v19 = vld [vmem:[%s6178_s23] sm:$0xff]  ;;  %v574_v26 = vld [vmem:[%s6178_s23 + $0x8] sm:$0xff]  ;;  %s5963_s6 = smov 2  }
  0x72   : > { %v636_v17 = vunpack.c.0.s8 %v635_v11  ;;  %vm1538_vm2 = vcmask 15360   ;;  %s5964_s30 = smov 4   ;;  %vm1991_vm3 = vcmask 31744   ;;  %s5965_s10 = smov 8   ;;  %vm2444_vm4 = vcmask 64512  }
  0x73   : > { %v6223_v18 = vsub.s32 0, %v6220_v13  ;;  %v6233_v22 = vsub.s32 %v5232_v14, %v6220_v13  ;;  %vm2897_vm5 = vcmask 130048   ;;  %s5967_s15 = smov 32   ;;  %vm3350_vm6 = vcmask 261120   ;;  %s5968_s5 = smov 64  }
  0x74   : > { %v6230_v21 = vsub.s32 %v636_v17, %v6220_v13  ;;  %vm3803_vm7 = vcmask 523264   ;;  %vm5025_vm8 = vcmask 1041409   ;;  %vm5028_vm9 = vcmask 1042434   ;;  %s5423_s16 = sshll.u32 %s6217_s2, 4  ;;  %s10031_s22 = sld [smem:[#allocation82_spill]]  ;;  %s9283_s16 = int_to_ptr.vmem [resolvable:$true] %s5423_s16 }
  0x75   : > { %9626 = vst [vmem:[#allocation21_spill] sm:$0xff] %v6223_v18  ;;  %598 = vperm.xlu1 %5781, %v580_v15   ;;  %588 = vperm.xlu0 %5780, %v578_v16   ;;  %v6227_v20 = vrot.slane %v606_v12, %v6223_v18  ;;  %9627 = vst [vmem:[#allocation22_spill] sm:$0xff] %v6233_v22  ;;  %v576_v12 = vld [vmem:[%s6178_s23 + $0x18] sm:$0xff]  ;;  %vm5031_vm10 = vcmask 1043459   ;;  %vm5034_vm11 = vcmask 1044484   ;;  %vm5037_vm12 = vcmask 1045509  }
  0x76   : > { %vm5040_vm13 = vcmask 1046534   ;;  %vm5043_vm14 = vcmask 1047559   ;;  %s10032_s26 = sand.u32 1, %s5922_s9   ;;  %s5818_s24 = scalar_lea.vmem %s9283_s16, 512 }
  0x77   : > { %v613_v23 = vmul.f32 %v6227_v20, %v573_v19  ;;  %v614_v33 = vmul.f32 %v6227_v20, %v574_v26  ;;  %v615_v59 = vmul.f32 %v6227_v20, %v575_v53  ;;  %p5819_p8 = scmp.ne.s32.totalorder %s9283_s16, %s5818_s24  ;;  %s5970_s8 = smov [#allocation7]  }
  0x78   : > { %s5822_s19 = sshll.u32 %s5970_s8, 4  ;;  %s5823_s19 = int_to_ptr.vmem [resolvable:$false] %s5822_s19 }
  0x79   : > { %v640_v24 = vrot.slane %v613_v23, %v6230_v21  ;;  %v633_v25 = vcombine.high %v613_v23, %v613_v23  ;;  %v689_v41 = vrot.slane %v614_v33, %v6230_v21  ;;  %v682_v47 = vcombine.high %v614_v33, %v614_v33  ;;  %p5820_p9 = pnand %p5819_p8, %p6138_p2  ;;  %p5825_p12 = scmp.lt.s32.totalorder %s9283_s16, %s5823_s19 }
  0x7a   : > { %v738_v0 = vrot.slane %v615_v59, %v6230_v21  ;;  %v731_v6 = vcombine.high %v615_v59, %v615_v59  ;;  %v616_v23 = vmul.f32 %v6227_v20, %v576_v12 }
  0x7b   : > { %v656_v27 = vrot.slane %v640_v24, %v6230_v21  ;;  %v648_v28 = vcombine.high %v640_v24, %v640_v24  ;;  %v647_v29 = vrot.slane %v633_v25, %v6230_v21  ;;  %v697_v46 = vcombine.high %v689_v41, %v689_v41  ;;  %p5821_p10 = pneg %p5820_p9 }
  0x7c   : > { %v705_v49 = vrot.slane %v689_v41, %v6230_v21  ;;  %v696_v52 = vrot.slane %v682_v47, %v6230_v21  ;;  %v746_v5 = vcombine.high %v738_v0, %v738_v0  ;;  %v754_v8 = vrot.slane %v738_v0, %v6230_v21 }
  0x7d   : > { %v6241_v30 = vrot.slane %v656_v27, %v6223_v18  ;;  %v670_v31 = vrot.slane %v648_v28, %v6230_v21  ;;  %v678_v32 = vcombine.high %v656_v27, %v656_v27  ;;  %v649_v34 = vcombine.high %v647_v29, %v647_v29 }
  0x7e   : > { %v663_v38 = vrot.slane %v647_v29, %v6230_v21  ;;  %v719_v51 = vrot.slane %v697_v46, %v6230_v21  ;;  %v6288_v54 = vrot.slane %v705_v49, %v6223_v18  ;;  %v727_v55 = vcombine.high %v705_v49, %v705_v49 }
  0x7f   : > { %989 = vrot.lane.b32.xlu0 %v6241_v30, %s5962_s1  ;;  %v6248_v35 = vrot.slane %v670_v31, %v6223_v18  ;;  %v6251_v36 = vrot.slane %v678_v32, %v6223_v18  ;;  %v680_v37 = vcombine.high %v670_v31, %v670_v31  ;;  %v677_v40 = vrot.slane %v649_v34, %v6230_v21 }
  0x80   : > { %v6264_v42 = vrot.slane %v663_v38, %v6223_v18  ;;  %v679_v43 = vcombine.high %v663_v38, %v663_v38  ;;  %v6293_v56 = vrot.slane %v719_v51, %v6223_v18  ;;  %v729_v57 = vcombine.high %v719_v51, %v719_v51 }
  0x81   : > { %991 = vrot.lane.b32.xlu1 %v6248_v35, %s5962_s1  ;;  %v6257_v39 = vrot.slane %v680_v37, %v6223_v18  ;;  %v6269_v44 = vrot.slane %v677_v40, %v6223_v18  ;;  %v681_v45 = vcombine.high %v677_v40, %v677_v40  ;;  %v698_v58 = vcombine.high %v696_v52, %v696_v52 }
  0x82   : > { %v6274_v48 = vrot.slane %v679_v43, %v6223_v18  ;;  %v6299_v60 = vrot.slane %v727_v55, %v6223_v18  ;;  %v712_v61 = vrot.slane %v696_v52, %v6230_v21  ;;  %v6305_v62 = vrot.slane %v729_v57, %v6223_v18 }
  0x83   : > { %993 = vrot.lane.b32.xlu0 %v6251_v36, %s5962_s1  ;;  %v6280_v50 = vrot.slane %v681_v45, %v6223_v18  ;;  %v726_v63 = vrot.slane %v698_v58, %v6230_v21  ;;  %v768_v10 = vrot.slane %v746_v5, %v6230_v21  ;;  %v745_v11 = vrot.slane %v731_v6, %v6230_v21 }
  0x84   : > { %v6312_v1 = vrot.slane %v712_v61, %v6223_v18  ;;  %v728_v2 = vcombine.high %v712_v61, %v712_v61  ;;  %v6336_v14 = vrot.slane %v754_v8, %v6223_v18  ;;  %v776_v15 = vcombine.high %v754_v8, %v754_v8 }
  0x85   : > { %995 = vrot.lane.b32.xlu1 %v6257_v39, %s5962_s1  ;;  %v6317_v3 = vrot.slane %v726_v63, %v6223_v18  ;;  %v730_v4 = vcombine.high %v726_v63, %v726_v63  ;;  %v6341_v16 = vrot.slane %v768_v10, %v6223_v18  ;;  %v778_v17 = vcombine.high %v768_v10, %v768_v10 }
  0x86   : > { %v6322_v7 = vrot.slane %v728_v2, %v6223_v18  ;;  %v747_v19 = vcombine.high %v745_v11, %v745_v11  ;;  %v6347_v24 = vrot.slane %v776_v15, %v6223_v18  ;;  %v761_v25 = vrot.slane %v745_v11, %v6230_v21 }
  0x87   : > { %997 = vrot.lane.b32.xlu0 %v6264_v42, %s5962_s1  ;;  %v6328_v9 = vrot.slane %v730_v4, %v6223_v18  ;;  %v6353_v26 = vrot.slane %v778_v17, %v6223_v18  ;;  %v787_v28 = vrot.slane %v616_v23, %v6230_v21  ;;  %v780_v34 = vcombine.high %v616_v23, %v616_v23 }
  0x88   : > { %v775_v27 = vrot.slane %v747_v19, %v6230_v21  ;;  %v6360_v20 = vrot.slane %v761_v25, %v6223_v18  ;;  %v777_v29 = vcombine.high %v761_v25, %v761_v25  ;;  %v6421_v2 = vsub.s32 1, %v6220_v13 }
  0x89   : > { %999 = vrot.lane.b32.xlu1 %v6269_v44, %s5962_s1  ;;  %v795_v33 = vcombine.high %v787_v28, %v787_v28  ;;  %v803_v38 = vrot.slane %v787_v28, %v6230_v21  ;;  %v794_v43 = vrot.slane %v780_v34, %v6230_v21  ;;  %v6429_v5 = vsub.s32 2, %v6220_v13 }
  0x8a   : > { %v6365_v31 = vrot.slane %v775_v27, %v6223_v18  ;;  %v779_v32 = vcombine.high %v775_v27, %v775_v27  ;;  %v6370_v37 = vrot.slane %v777_v29, %v6223_v18  ;;  %9635 = vst [vmem:[#allocation30_spill] sm:$0xff] %v6421_v2  ;;  %v6436_v8 = vsub.s32 3, %v6220_v13  ;;  %v6465_v29 = vld [vmem:[%s6202_s14 + $0x8] sm:$0xff] }
  0x8b   : > { %1001 = vrot.lane.b32.xlu0 %v6274_v48, %s5962_s1  ;;  %v817_v41 = vrot.slane %v795_v33, %v6230_v21  ;;  %v6383_v45 = vrot.slane %v803_v38, %v6223_v18  ;;  %v825_v46 = vcombine.high %v803_v38, %v803_v38  ;;  %v796_v51 = vcombine.high %v794_v43, %v794_v43 }
  0x8c   : > { %v6376_v40 = vrot.slane %v779_v32, %v6223_v18  ;;  %v810_v53 = vrot.slane %v794_v43, %v6230_v21  ;;  %9637 = vst [vmem:[#allocation32_spill] sm:$0xff] %v6429_v5  ;;  %9638 = vst [vmem:[#allocation33_spill] sm:$0xff] %v6436_v8  ;;  %v6443_v11 = vsub.s32 4, %v6220_v13  ;;  %v6448_v15 = vsub.s32 5, %v6220_v13 }
  0x8d   : > { %1003 = vrot.lane.b32.xlu1 %v6280_v50, %s5962_s1  ;;  %v6388_v47 = vrot.slane %v817_v41, %v6223_v18  ;;  %v827_v49 = vcombine.high %v817_v41, %v817_v41  ;;  %v6393_v52 = vrot.slane %v825_v46, %v6223_v18  ;;  %v824_v57 = vrot.slane %v796_v51, %v6230_v21  ;;  %v6418_v21 = vld [vmem:[%s6202_s14] sm:$0xff] }
  0x8e   : > { %v6405_v58 = vrot.slane %v810_v53, %v6223_v18  ;;  %v826_v59 = vcombine.high %v810_v53, %v810_v53  ;;  %9634 = vst [vmem:[#allocation29_spill] sm:$0xff] %v6418_v21  ;;  %v1121_v6 = vrot.slane %v6418_v21, %v6223_v18  ;;  %v1128_v10 = vrot.slane %v6418_v21, %v6421_v2 }
  0x8f   : > { %1005 = vrot.lane.b32.xlu0 %v6288_v54, %s5962_s1  ;;  %9628 = vst [vmem:[#allocation23_spill] sm:$0xff] %v6388_v47  ;;  %9629 = vst [vmem:[#allocation24_spill] sm:$0xff] %v6393_v52  ;;  %v6399_v55 = vrot.slane %v827_v49, %v6223_v18  ;;  %v6410_v61 = vrot.slane %v824_v57, %v6223_v18  ;;  %v828_v63 = vcombine.high %v824_v57, %v824_v57  ;;  %v6484_v49 = vld [vmem:[%s6202_s14 + $0x10] sm:$0xff] }
  0x90   : > { %9631 = vst [vmem:[#allocation26_spill] sm:$0xff] %v6405_v58  ;;  %v6415_v0 = vrot.slane %v826_v59, %v6223_v18  ;;  %9639 = vst [vmem:[#allocation34_spill] sm:$0xff] %v6443_v11  ;;  %v1135_v12 = vrot.slane %v6418_v21, %v6429_v5  ;;  %v1142_v17 = vrot.slane %v6418_v21, %v6436_v8  ;;  %v6453_v19 = vsub.s32 6, %v6220_v13 }
  0x91   : > { %1007 = vrot.lane.b32.xlu1 %v6293_v56, %s5962_s1  ;;  %9630 = vst [vmem:[#allocation25_spill] sm:$0xff] %v6399_v55  ;;  %9632 = vst [vmem:[#allocation27_spill] sm:$0xff] %v6410_v61  ;;  %v6426_v4 = vrot.slane %v828_v63, %v6223_v18  ;;  %v1149_v23 = vrot.slane %v6418_v21, %v6443_v11  ;;  %v6458_v25 = vsub.s32 7, %v6220_v13 }
  0x92   : > { %9633 = vst [vmem:[#allocation28_spill] sm:$0xff] %v6415_v0  ;;  %9640 = vst [vmem:[#allocation35_spill] sm:$0xff] %v6448_v15  ;;  %v1156_v27 = vrot.slane %v6418_v21, %v6448_v15  ;;  %v1163_v28 = vrot.slane %v6418_v21, %v6453_v19  ;;  %v1177_v13 = vrot.slane %v6465_v29, %v6223_v18 }
  0x93   : > { %1009 = vrot.lane.b32.xlu0 %v6299_v60, %s5962_s1  ;;  %9636 = vst [vmem:[#allocation31_spill] sm:$0xff] %v6426_v4  ;;  %9641 = vst [vmem:[#allocation36_spill] sm:$0xff] %v6453_v19  ;;  %v1170_v32 = vrot.slane %v6418_v21, %v6458_v25  ;;  %v1184_v33 = vrot.slane %v6465_v29, %v6421_v2  ;;  %v1191_v34 = vrot.slane %v6465_v29, %v6429_v5 }
  0x94   : > { %9642 = vst [vmem:[#allocation37_spill] sm:$0xff] %v6458_v25  ;;  %9643 = vst [vmem:[#allocation38_spill] sm:$0xff] %v6465_v29  ;;  %v1198_v38 = vrot.slane %v6465_v29, %v6436_v8  ;;  %v1205_v41 = vrot.slane %v6465_v29, %v6443_v11  ;;  %v1212_v43 = vrot.slane %v6465_v29, %v6448_v15 }
  0x95   : > { %1011 = vrot.lane.b32.xlu1 %v6305_v62, %s5962_s1  ;;  %v1219_v46 = vrot.slane %v6465_v29, %v6453_v19  ;;  %9644 = vst [vmem:[#allocation39_spill] sm:$0xff] %v6484_v49  ;;  %v1226_v51 = vrot.slane %v6465_v29, %v6458_v25  ;;  %v1233_v53 = vrot.slane %v6484_v49, %v6223_v18 }
  0x96   : > { %v1240_v57 = vrot.slane %v6484_v49, %v6421_v2  ;;  %v1247_v59 = vrot.slane %v6484_v49, %v6429_v5  ;;  %v1254_v63 = vrot.slane %v6484_v49, %v6436_v8 }
  0x97   : > { %1013 = vrot.lane.b32.xlu0 %v6312_v1, %s5962_s1 }
  0x99   : > { %1015 = vrot.lane.b32.xlu1 %v6317_v3, %s5962_s1 }
  0x9b   : > { %1017 = vrot.lane.b32.xlu0 %v6322_v7, %s5962_s1 }
  0x9d   : > { %1019 = vrot.lane.b32.xlu1 %v6328_v9, %s5962_s1 }
  0x9f   : > { %1021 = vrot.lane.b32.xlu0 %v6336_v14, %s5962_s1 }
  0xa1   : > { %1023 = vrot.lane.b32.xlu1 %v6341_v16, %s5962_s1 }
  0xa3   : > { %1025 = vrot.lane.b32.xlu0 %v6347_v24, %s5962_s1 }
  0xa5   : > { %1027 = vrot.lane.b32.xlu1 %v6353_v26, %s5962_s1 }
  0xa7   : > { %1029 = vrot.lane.b32.xlu0 %v6360_v20, %s5962_s1 }
  0xa9   : > { %1031 = vrot.lane.b32.xlu1 %v6365_v31, %s5962_s1 }
  0xab   : > { %1033 = vrot.lane.b32.xlu0 %v6370_v37, %s5962_s1 }
  0xad   : > { %1035 = vrot.lane.b32.xlu1 %v6376_v40, %s5962_s1 }
  0xaf   : > { %1037 = vrot.lane.b32.xlu0 %v6383_v45, %s5962_s1 }
  0xb1   : > { %1039 = vrot.lane.b32.xlu1 %v6388_v47, %s5962_s1 }
  0xb3   : > { %1041 = vrot.lane.b32.xlu0 %v6393_v52, %s5962_s1 }
  0xb5   : > { %1043 = vrot.lane.b32.xlu1 %v6399_v55, %s5962_s1 }
  0xb7   : > { %1045 = vrot.lane.b32.xlu0 %v6405_v58, %s5962_s1 }
  0xb9   : > { %1047 = vrot.lane.b32.xlu1 %v6410_v61, %s5962_s1 }
  0xbb   : > { %1049 = vrot.lane.b32.xlu0 %v6415_v0, %s5962_s1 }
  0xbd   : > { %1051 = vrot.lane.b32.xlu1 %v6426_v4, %s5962_s1  ;;  %s5824_s1 = scalar_lea.vmem %s5823_s19, 1024 }
  0xbe   : > { %p5826_p13 = scmp.lt.s32.totalorder %s5824_s1, %s5818_s24 }
  0xbf   : > { %1123 = vbcast.lane.b32.xlu0 %v1121_v6, 256  ;;  %v1261_v6 = vrot.slane %v6484_v49, %v6443_v11 }
  0xc0   : > { %p5827_p0 = por %p5826_p13, %p5825_p12 }
  0xc1   : > { %1130 = vbcast.lane.b32.xlu1 %v1128_v10, 256  ;;  %v1268_v10 = vrot.slane %v6484_v49, %v6448_v15 }
  0xc2   : > { %p5828_p3 = pnand %p5827_p0, %p5821_p10 }
  0xc3   : > { %1137 = vbcast.lane.b32.xlu0 %v1135_v12, 256  ;;  %v1275_v12 = vrot.slane %v6484_v49, %v6453_v19 }
  0xc5   : > { %1144 = vbcast.lane.b32.xlu1 %v1142_v17, 256  ;;  %v6503_v17 = vld [vmem:[%s6202_s14 + $0x18] sm:$0xff]  ;;  %s5966_s14 = smov 16  }
  0xc6   : > { %9645 = vst [vmem:[#allocation40_spill] sm:$0xff] %v6503_v17 }
  0xc7   : > { %1151 = vbcast.lane.b32.xlu0 %v1149_v23, 256  ;;  %v1282_v23 = vrot.slane %v6484_v49, %v6458_v25 }
  0xc9   : > { %1158 = vbcast.lane.b32.xlu1 %v1156_v27, 256  ;;  %v1289_v27 = vrot.slane %v6503_v17, %v6223_v18 }
  0xcb   : > { %1165 = vbcast.lane.b32.xlu0 %v1163_v28, 256 }
  0xcd   : > { %1172 = vbcast.lane.b32.xlu1 %v1170_v32, 256 }
  0xcf   : > { %1179 = vbcast.lane.b32.xlu0 %v1177_v13, 256  ;;  %v1296_v13 = vrot.slane %v6503_v17, %v6421_v2 }
  0xd1   : > { %1186 = vbcast.lane.b32.xlu1 %v1184_v33, 256  ;;  %v1303_v33 = vrot.slane %v6503_v17, %v6429_v5 }
  0xd3   : > { %1193 = vbcast.lane.b32.xlu0 %v1191_v34, 256 }
  0xd5   : > { %1200 = vbcast.lane.b32.xlu1 %v1198_v38, 256 }
  0xd7   : > { %1207 = vbcast.lane.b32.xlu0 %v1205_v41, 256  ;;  %v1310_v41 = vrot.slane %v6503_v17, %v6436_v8 }
  0xd9   : > { %1214 = vbcast.lane.b32.xlu1 %v1212_v43, 256  ;;  %v1317_v43 = vrot.slane %v6503_v17, %v6443_v11 }
  0xdb   : > { %1221 = vbcast.lane.b32.xlu0 %v1219_v46, 256 }
  0xdd   : > { %1228 = vbcast.lane.b32.xlu1 %v1226_v51, 256 }
  0xdf   : > { %1235 = vbcast.lane.b32.xlu0 %v1233_v53, 256  ;;  %v1324_v53 = vrot.slane %v6503_v17, %v6448_v15 }
  0xe1   : > { %1242 = vbcast.lane.b32.xlu1 %v1240_v57, 256  ;;  %v1331_v57 = vrot.slane %v6503_v17, %v6453_v19 }
  0xe3   : > { %1249 = vbcast.lane.b32.xlu0 %v1247_v59, 256 }
  0xe5   : > { %1256 = vbcast.lane.b32.xlu1 %v1254_v63, 256 }
  0xe7   : > { %1263 = vbcast.lane.b32.xlu0 %v1261_v6, 256  ;;  %v1338_v6 = vrot.slane %v6503_v17, %v6458_v25 }
  0xe9   : > { %1270 = vbcast.lane.b32.xlu1 %v1268_v10, 256 }
  0xeb   : > { %1277 = vbcast.lane.b32.xlu0 %v1275_v12, 256 }
  0xec   : > { %v6509_v28 = vpop.permute.xlu1 %593  ;;  %v6511_v32 = vpop.permute.xlu0 %583 }
  0xed   : > { %9646 = vst [vmem:[#allocation41_spill] sm:$0xff] %v6509_v28  ;;  %9647 = vst [vmem:[#allocation42_spill] sm:$0xff] %v6511_v32  ;;  %1284 = vbcast.lane.b32.xlu1 %v1282_v23, 256 }
  0xef   : > { %1291 = vbcast.lane.b32.xlu0 %v1289_v27, 256 }
  0xf0   : > { %v6517_v34 = vpop.permute.xlu1 %598  ;;  %v6519_v38 = vpop.permute.xlu0 %588 }
  0xf1   : > { %9648 = vst [vmem:[#allocation43_spill] sm:$0xff] %v6517_v34  ;;  %9649 = vst [vmem:[#allocation44_spill] sm:$0xff] %v6519_v38  ;;  %1298 = vbcast.lane.b32.xlu1 %v1296_v13, 256 }
  0xf3   : > { %1305 = vbcast.lane.b32.xlu0 %v1303_v33, 256 }
  0xf4   : > { %v990_v46 = vpop.permute.xlu0 %989  ;;  %v992_v51 = vpop.permute.xlu1 %991 }
  0xf5   : > { %1312 = vbcast.lane.b32.xlu1 %v1310_v41, 256  ;;  %v1086_v0 = vsel %vm1085_vm1, 0.0, %v990_v46  ;;  %v1087_v21 = vsel %vm1085_vm1, 0.0, %v992_v51 }
  0xf7   : > { %1319 = vbcast.lane.b32.xlu0 %v1317_v43, 256 }
  0xf8   : > { %v994_v59 = vpop.permute.xlu0 %993  ;;  %v996_v63 = vpop.permute.xlu1 %995 }
  0xf9   : > { %1326 = vbcast.lane.b32.xlu1 %v1324_v53, 256 }
  0xfb   : > { %1333 = vbcast.lane.b32.xlu0 %v1331_v57, 256 }
  0xfc   : > { %v998_v10 = vpop.permute.xlu0 %997  ;;  %v1000_v12 = vpop.permute.xlu1 %999 }
  0xfd   : > { %1340 = vbcast.lane.b32.xlu1 %v1338_v6, 256 }
 0x100   : > { %v1002_v23 = vpop.permute.xlu0 %1001  ;;  %v1004_v27 = vpop.permute.xlu1 %1003 }
 0x104   : > { %v6531_v13 = vpop.permute.xlu0 %1005  ;;  %v6533_v33 = vpop.permute.xlu1 %1007 }
 0x108   : > { %v6535_v41 = vpop.permute.xlu0 %1009  ;;  %v6537_v43 = vpop.permute.xlu1 %1011 }
 0x10c   : > { %v6539_v22 = vpop.permute.xlu0 %1013  ;;  %v6541_v53 = vpop.permute.xlu1 %1015 }
 0x110   : > { %v6543_v38 = vpop.permute.xlu0 %1017  ;;  %v6545_v57 = vpop.permute.xlu1 %1019 }
 0x114   : > { %v6547_v34 = vpop.permute.xlu0 %1021  ;;  %v6549_v6 = vpop.permute.xlu1 %1023 }
 0x118   : > { %v6551_v28 = vpop.permute.xlu0 %1025  ;;  %v6553_v32 = vpop.permute.xlu1 %1027 }
 0x11c   : > { %v6555_v17 = vpop.permute.xlu0 %1029  ;;  %v6557_v49 = vpop.permute.xlu1 %1031 }
 0x120   : > { %v6559_v25 = vpop.permute.xlu0 %1033  ;;  %v6561_v19 = vpop.permute.xlu1 %1035 }
 0x124   : > { %v6563_v29 = vpop.permute.xlu0 %1037  ;;  %v6565_v15 = vpop.permute.xlu1 %1039 }
 0x128   : > { %v6567_v11 = vpop.permute.xlu0 %1041  ;;  %v6569_v8 = vpop.permute.xlu1 %1043 }
 0x129   : > { %9650 = vst [vmem:[#allocation45_spill] sm:$0xff] %v6567_v11  ;;  %9651 = vst [vmem:[#allocation46_spill] sm:$0xff] %v6569_v8 }
 0x12c   : > { %v6571_v5 = vpop.permute.xlu0 %1045  ;;  %v6573_v2 = vpop.permute.xlu1 %1047 }
 0x12d   : > { %9652 = vst [vmem:[#allocation47_spill] sm:$0xff] %v6571_v5  ;;  %9653 = vst [vmem:[#allocation48_spill] sm:$0xff] %v6573_v2  ;;  %v1088_v2 = vsel %vm1085_vm1, 0.0, %v994_v59  ;;  %v1094_v59 = vsel %vm1085_vm1, 0.0, %v6531_v13  ;;  %v1096_v13 = vsel %vm1085_vm1, 0.0, %v6535_v41  ;;  %v1098_v41 = vsel %vm1085_vm1, 0.0, %v6539_v22 }
 0x12e   : > { %v1100_v22 = vsel %vm1085_vm1, 0.0, %v6543_v38  ;;  %v1102_v38 = vsel %vm1085_vm1, 0.0, %v6547_v34  ;;  %v1104_v34 = vsel %vm1085_vm1, 0.0, %v6551_v28  ;;  %v1106_v28 = vsel %vm1085_vm1, 0.0, %v6555_v17 }
 0x12f   : > { %v1108_v17 = vsel %vm1085_vm1, 0.0, %v6559_v25  ;;  %v1110_v25 = vsel %vm1085_vm1, 0.0, %v6563_v29 }
 0x130   : > { %v6575_v18 = vpop.permute.xlu0 %1049  ;;  %v6577_v4 = vpop.permute.xlu1 %1051  ;;  %v9658_v29 = vld [vmem:[#allocation45_spill] sm:$0xff] }
 0x131   : > { %9654 = vst [vmem:[#allocation49_spill] sm:$0xff] %v6575_v18  ;;  %9655 = vst [vmem:[#allocation50_spill] sm:$0xff] %v6577_v4  ;;  %v1089_v18 = vsel %vm1085_vm1, 0.0, %v996_v63  ;;  %v1095_v63 = vsel %vm1085_vm1, 0.0, %v6533_v33  ;;  %v1097_v33 = vsel %vm1085_vm1, 0.0, %v6537_v43  ;;  %v1099_v43 = vsel %vm1085_vm1, 0.0, %v6541_v53 }
 0x132   : > { %v1101_v53 = vsel %vm1085_vm1, 0.0, %v6545_v57  ;;  %v1103_v57 = vsel %vm1085_vm1, 0.0, %v6549_v6  ;;  %v1105_v6 = vsel %vm1085_vm1, 0.0, %v6553_v32  ;;  %v1107_v32 = vsel %vm1085_vm1, 0.0, %v6557_v49 }
 0x133   : > { %v1109_v49 = vsel %vm1085_vm1, 0.0, %v6561_v19  ;;  %v1111_v19 = vsel %vm1085_vm1, 0.0, %v6565_v15  ;;  %v9659_v15 = vld [vmem:[#allocation46_spill] sm:$0xff] }
 0x134   : > { %v1124_v61 = vpop.permute.xlu0 %1123  ;;  %v1131_v58 = vpop.permute.xlu1 %1130 }
 0x135   : > { %v1342_v55 = vmul.f32 %v1124_v61, %v1086_v0  ;;  %v1343_v52 = vmul.f32 %v1131_v58, %v1087_v21  ;;  %v1093_v21 = vsel %vm1085_vm1, 0.0, %v1004_v27 }
 0x137   : > { %v6582_v11 = vadd.f32 %v1342_v55, %v6241_v30  ;;  %v6585_v5 = vadd.f32 %v1343_v52, %v6248_v35  ;;  %v1090_v52 = vsel %vm1085_vm1, 0.0, %v998_v10  ;;  %v1091_v55 = vsel %vm1085_vm1, 0.0, %v1000_v12 }
 0x138   : > { %v1138_v4 = vpop.permute.xlu0 %1137  ;;  %v1145_v8 = vpop.permute.xlu1 %1144 }
 0x139   : > { %v1344_v47 = vmul.f32 %v1138_v4, %v1088_v2  ;;  %v1345_v46 = vmul.f32 %v1145_v8, %v1089_v18  ;;  %1442 = vrot.lane.b32.xlu0 %v6582_v11, %s5963_s6  ;;  %1444 = vrot.lane.b32.xlu1 %v6585_v5, %s5963_s6 }
 0x13b   : > { %v6594_v30 = vadd.f32 %v1344_v47, %v6251_v36  ;;  %v6597_v35 = vadd.f32 %v1345_v46, %v6257_v39  ;;  %v1092_v47 = vsel %vm1085_vm1, 0.0, %v1002_v23 }
 0x13c   : > { %v1152_v58 = vpop.permute.xlu0 %1151  ;;  %v1159_v61 = vpop.permute.xlu1 %1158 }
 0x13d   : > { %v1346_v18 = vmul.f32 %v1152_v58, %v1090_v52  ;;  %v1347_v0 = vmul.f32 %v1159_v61, %v1091_v55  ;;  %1446 = vrot.lane.b32.xlu0 %v6594_v30, %s5963_s6  ;;  %1448 = vrot.lane.b32.xlu1 %v6597_v35, %s5963_s6 }
 0x13f   : > { %v6606_v36 = vadd.f32 %v1346_v18, %v6264_v42  ;;  %v6609_v39 = vadd.f32 %v1347_v0, %v6269_v44 }
 0x140   : > { %v1166_v2 = vpop.permute.xlu0 %1165  ;;  %v1173_v4 = vpop.permute.xlu1 %1172 }
 0x141   : > { %v1348_v8 = vmul.f32 %v1166_v2, %v1092_v47  ;;  %v1349_v51 = vmul.f32 %v1173_v4, %v1093_v21  ;;  %1450 = vrot.lane.b32.xlu0 %v6606_v36, %s5963_s6  ;;  %1452 = vrot.lane.b32.xlu1 %v6609_v39, %s5963_s6 }
 0x143   : > { %v6618_v42 = vadd.f32 %v1348_v8, %v6274_v48  ;;  %v6621_v44 = vadd.f32 %v1349_v51, %v6280_v50 }
 0x144   : > { %v1180_v10 = vpop.permute.xlu0 %1179  ;;  %v1187_v12 = vpop.permute.xlu1 %1186 }
 0x145   : > { %v1350_v23 = vmul.f32 %v1180_v10, %v1094_v59  ;;  %v1351_v27 = vmul.f32 %v1187_v12, %v1095_v63  ;;  %1454 = vrot.lane.b32.xlu0 %v6618_v42, %s5963_s6  ;;  %1456 = vrot.lane.b32.xlu1 %v6621_v44, %s5963_s6 }
 0x147   : > { %v6632_v48 = vadd.f32 %v1350_v23, %v6288_v54  ;;  %v6635_v50 = vadd.f32 %v1351_v27, %v6293_v56 }
 0x148   : > { %v1194_v46 = vpop.permute.xlu0 %1193  ;;  %v1201_v52 = vpop.permute.xlu1 %1200 }
 0x149   : > { %v1352_v55 = vmul.f32 %v1194_v46, %v1096_v13  ;;  %v1353_v58 = vmul.f32 %v1201_v52, %v1097_v33  ;;  %1458 = vrot.lane.b32.xlu0 %v6632_v48, %s5963_s6  ;;  %1460 = vrot.lane.b32.xlu1 %v6635_v50, %s5963_s6 }
 0x14b   : > { %v6646_v54 = vadd.f32 %v1352_v55, %v6299_v60  ;;  %v6649_v56 = vadd.f32 %v1353_v58, %v6305_v62 }
 0x14c   : > { %v1208_v61 = vpop.permute.xlu0 %1207  ;;  %v1215_v18 = vpop.permute.xlu1 %1214 }
 0x14d   : > { %v1354_v0 = vmul.f32 %v1208_v61, %v1098_v41  ;;  %v1355_v47 = vmul.f32 %v1215_v18, %v1099_v43  ;;  %1462 = vrot.lane.b32.xlu0 %v6646_v54, %s5963_s6  ;;  %1464 = vrot.lane.b32.xlu1 %v6649_v56, %s5963_s6 }
 0x14f   : > { %v6660_v60 = vadd.f32 %v1354_v0, %v6312_v1  ;;  %v6663_v62 = vadd.f32 %v1355_v47, %v6317_v3 }
 0x150   : > { %v1222_v21 = vpop.permute.xlu0 %1221  ;;  %v1229_v2 = vpop.permute.xlu1 %1228 }
 0x151   : > { %v1356_v4 = vmul.f32 %v1222_v21, %v1100_v22  ;;  %v1357_v8 = vmul.f32 %v1229_v2, %v1101_v53  ;;  %1466 = vrot.lane.b32.xlu0 %v6660_v60, %s5963_s6  ;;  %1468 = vrot.lane.b32.xlu1 %v6663_v62, %s5963_s6  ;;  %v1112_v21 = vsel %vm1085_vm1, 0.0, %v9658_v29  ;;  %v1113_v2 = vsel %vm1085_vm1, 0.0, %v9659_v15  ;;  %v9678_v29 = vld [vmem:[#allocation21_spill] sm:$0xff]  ;;  %v9679_v15 = vld [vmem:[#allocation30_spill] sm:$0xff] }
 0x153   : > { %v6674_v1 = vadd.f32 %v1356_v4, %v6322_v7  ;;  %v6677_v3 = vadd.f32 %v1357_v8, %v6328_v9 }
 0x154   : > { %v1236_v51 = vpop.permute.xlu0 %1235  ;;  %v1243_v59 = vpop.permute.xlu1 %1242 }
 0x155   : > { %v1358_v63 = vmul.f32 %v1236_v51, %v1102_v38  ;;  %v1359_v10 = vmul.f32 %v1243_v59, %v1103_v57  ;;  %1470 = vrot.lane.b32.xlu0 %v6674_v1, %s5963_s6  ;;  %1472 = vrot.lane.b32.xlu1 %v6677_v3, %s5963_s6  ;;  %v9662_v59 = vld [vmem:[#allocation25_spill] sm:$0xff] }
 0x157   : > { %v6688_v7 = vadd.f32 %v1358_v63, %v6336_v14  ;;  %v6691_v9 = vadd.f32 %v1359_v10, %v6341_v16  ;;  %v9664_v10 = vld [vmem:[#allocation47_spill] sm:$0xff] }
 0x158   : > { %v1250_v12 = vpop.permute.xlu0 %1249  ;;  %v1257_v23 = vpop.permute.xlu1 %1256 }
 0x159   : > { %v1360_v27 = vmul.f32 %v1250_v12, %v1104_v34  ;;  %v1361_v13 = vmul.f32 %v1257_v23, %v1105_v6  ;;  %1474 = vrot.lane.b32.xlu0 %v6688_v7, %s5963_s6  ;;  %1476 = vrot.lane.b32.xlu1 %v6691_v9, %s5963_s6  ;;  %v1114_v34 = vsel %vm1085_vm1, 0.0, %v9664_v10  ;;  %v9665_v6 = vld [vmem:[#allocation48_spill] sm:$0xff]  ;;  %v9683_v10 = vld [vmem:[#allocation35_spill] sm:$0xff] }
 0x15a   : > { %v1115_v12 = vsel %vm1085_vm1, 0.0, %v9665_v6  ;;  %v9684_v6 = vld [vmem:[#allocation38_spill] sm:$0xff] }
 0x15b   : > { %v6702_v14 = vadd.f32 %v1360_v27, %v6347_v24  ;;  %v6705_v16 = vadd.f32 %v1361_v13, %v6353_v26 }
 0x15c   : > { %v1264_v33 = vpop.permute.xlu0 %1263  ;;  %v1271_v46 = vpop.permute.xlu1 %1270 }
 0x15d   : > { %v1362_v52 = vmul.f32 %v1264_v33, %v1106_v28  ;;  %v1363_v55 = vmul.f32 %v1271_v46, %v1107_v32  ;;  %1478 = vrot.lane.b32.xlu0 %v6702_v14, %s5963_s6  ;;  %1480 = vrot.lane.b32.xlu1 %v6705_v16, %s5963_s6  ;;  %v9666_v32 = vld [vmem:[#allocation26_spill] sm:$0xff]  ;;  %v9668_v46 = vld [vmem:[#allocation27_spill] sm:$0xff] }
 0x15f   : > { %v6716_v24 = vadd.f32 %v1362_v52, %v6360_v20  ;;  %v6719_v26 = vadd.f32 %v1363_v55, %v6365_v31  ;;  %v9670_v55 = vld [vmem:[#allocation49_spill] sm:$0xff] }
 0x160   : > { %v1278_v58 = vpop.permute.xlu0 %1277  ;;  %v1285_v41 = vpop.permute.xlu1 %1284 }
 0x161   : > { %v1364_v43 = vmul.f32 %v1278_v58, %v1108_v17  ;;  %v1365_v61 = vmul.f32 %v1285_v41, %v1109_v49  ;;  %1482 = vrot.lane.b32.xlu0 %v6716_v24, %s5963_s6  ;;  %1484 = vrot.lane.b32.xlu1 %v6719_v26, %s5963_s6  ;;  %v1116_v17 = vsel %vm1085_vm1, 0.0, %v9670_v55  ;;  %v9671_v49 = vld [vmem:[#allocation50_spill] sm:$0xff] }
 0x162   : > { %v1117_v58 = vsel %vm1085_vm1, 0.0, %v9671_v49 }
 0x163   : > { %v6730_v20 = vadd.f32 %v1364_v43, %v6370_v37  ;;  %v6733_v31 = vadd.f32 %v1365_v61, %v6376_v40  ;;  %v9656_v40 = vld [vmem:[#allocation23_spill] sm:$0xff]  ;;  %v9672_v61 = vld [vmem:[#allocation29_spill] sm:$0xff] }
 0x164   : > { %v1292_v18 = vpop.permute.xlu0 %1291  ;;  %v1299_v0 = vpop.permute.xlu1 %1298 }
 0x165   : > { %v1366_v47 = vmul.f32 %v1292_v18, %v1110_v25  ;;  %v1367_v22 = vmul.f32 %v1299_v0, %v1111_v19  ;;  %1486 = vrot.lane.b32.xlu0 %v6730_v20, %s5963_s6  ;;  %1488 = vrot.lane.b32.xlu1 %v6733_v31, %s5963_s6  ;;  %v6783_v25 = vmul.f32 %v9672_v61, %v9672_v61  ;;  %v9674_v0 = vld [vmem:[#allocation28_spill] sm:$0xff] }
 0x167   : > { %v6744_v37 = vadd.f32 %v1366_v47, %v6383_v45  ;;  %v6747_v53 = vadd.f32 %v1367_v22, %v9656_v40  ;;  %v9660_v45 = vld [vmem:[#allocation24_spill] sm:$0xff]  ;;  %9673 = vst [vmem:[#allocation47_spill] sm:$0xff] %v6783_v25  ;;  %v9676_v22 = vld [vmem:[#allocation31_spill] sm:$0xff] }
 0x168   : > { %v1306_v4 = vpop.permute.xlu0 %1305  ;;  %v1313_v8 = vpop.permute.xlu1 %1312 }
 0x169   : > { %9657 = vst [vmem:[#allocation23_spill] sm:$0xff] %v6747_v53  ;;  %v1368_v38 = vmul.f32 %v1306_v4, %v1112_v21  ;;  %v1369_v57 = vmul.f32 %v1313_v8, %v1113_v2  ;;  %1490 = vrot.lane.b32.xlu0 %v6744_v37, %s5963_s6  ;;  %1492 = vrot.lane.b32.xlu1 %v6747_v53, %s5963_s6  ;;  %v9680_v4 = vld [vmem:[#allocation32_spill] sm:$0xff] }
 0x16a   : > { %v1574_v21 = vrot.slane %v6783_v25, %v9678_v29  ;;  %v1581_v2 = vrot.slane %v6783_v25, %v9679_v15  ;;  %v1588_v8 = vrot.slane %v6783_v25, %v9680_v4 }
 0x16b   : > { %v6758_v51 = vadd.f32 %v1368_v38, %v9660_v45  ;;  %v6761_v63 = vadd.f32 %v1369_v57, %v9662_v59  ;;  %v9681_v38 = vld [vmem:[#allocation33_spill] sm:$0xff]  ;;  %v9682_v45 = vld [vmem:[#allocation34_spill] sm:$0xff] }
 0x16c   : > { %v1320_v23 = vpop.permute.xlu0 %1319  ;;  %v1327_v27 = vpop.permute.xlu1 %1326  ;;  %v1595_v57 = vrot.slane %v6783_v25, %v9681_v38  ;;  %v1602_v59 = vrot.slane %v6783_v25, %v9682_v45 }
 0x16d   : > { %9661 = vst [vmem:[#allocation45_spill] sm:$0xff] %v6758_v51  ;;  %9663 = vst [vmem:[#allocation46_spill] sm:$0xff] %v6761_v63  ;;  %v1370_v13 = vmul.f32 %v1320_v23, %v1114_v34  ;;  %v1371_v28 = vmul.f32 %v1327_v27, %v1115_v12  ;;  %1494 = vrot.lane.b32.xlu0 %v6758_v51, %s5963_s6  ;;  %1496 = vrot.lane.b32.xlu1 %v6761_v63, %s5963_s6  ;;  %v9686_v23 = vld [vmem:[#allocation36_spill] sm:$0xff] }
 0x16e   : > { %v1609_v34 = vrot.slane %v6783_v25, %v9683_v10  ;;  %v6813_v12 = vmul.f32 %v9684_v6, %v9684_v6  ;;  %v1616_v27 = vrot.slane %v6783_v25, %v9686_v23 }
 0x16f   : > { %v6772_v33 = vadd.f32 %v1370_v13, %v9666_v32  ;;  %v6775_v52 = vadd.f32 %v1371_v28, %v9668_v46  ;;  %v9687_v13 = vld [vmem:[#allocation37_spill] sm:$0xff] }
 0x170   : > { %v1334_v41 = vpop.permute.xlu0 %1333  ;;  %v1341_v43 = vpop.permute.xlu1 %1340  ;;  %9685 = vst [vmem:[#allocation27_spill] sm:$0xff] %v6813_v12  ;;  %v1623_v28 = vrot.slane %v6783_v25, %v9687_v13  ;;  %v1630_v32 = vrot.slane %v6813_v12, %v9678_v29  ;;  %v1637_v46 = vrot.slane %v6813_v12, %v9679_v15  ;;  %v1644_v55 = vrot.slane %v6813_v12, %v9680_v4 }
 0x171   : > { %9667 = vst [vmem:[#allocation24_spill] sm:$0xff] %v6772_v33  ;;  %9669 = vst [vmem:[#allocation25_spill] sm:$0xff] %v6775_v52  ;;  %v1372_v19 = vmul.f32 %v1334_v41, %v1116_v17  ;;  %v1373_v18 = vmul.f32 %v1341_v43, %v1117_v58  ;;  %1498 = vrot.lane.b32.xlu0 %v6772_v33, %s5963_s6  ;;  %1500 = vrot.lane.b32.xlu1 %v6775_v52, %s5963_s6  ;;  %v9688_v41 = vld [vmem:[#allocation39_spill] sm:$0xff] }
 0x172   : > { %v1651_v17 = vrot.slane %v6813_v12, %v9681_v38  ;;  %v1658_v49 = vrot.slane %v6813_v12, %v9682_v45  ;;  %v1665_v58 = vrot.slane %v6813_v12, %v9683_v10  ;;  %v6833_v43 = vmul.f32 %v9688_v41, %v9688_v41 }
 0x173   : > { %v6790_v47 = vadd.f32 %v1372_v19, %v9674_v0  ;;  %v6793_v40 = vadd.f32 %v1373_v18, %v9676_v22  ;;  %v1672_v61 = vrot.slane %v6813_v12, %v9686_v23  ;;  %v1679_v19 = vrot.slane %v6813_v12, %v9687_v13 }
 0x174   : > { %9689 = vst [vmem:[#allocation49_spill] sm:$0xff] %v6833_v43  ;;  %v1686_v18 = vrot.slane %v6833_v43, %v9678_v29  ;;  %v1693_v0 = vrot.slane %v6833_v43, %v9679_v15  ;;  %v1700_v22 = vrot.slane %v6833_v43, %v9680_v4  ;;  %v1735_v6 = vrot.slane %v6833_v43, %v9687_v13 }
 0x175   : > { %9675 = vst [vmem:[#allocation48_spill] sm:$0xff] %v6790_v47  ;;  %9677 = vst [vmem:[#allocation26_spill] sm:$0xff] %v6793_v40  ;;  %1502 = vrot.lane.b32.xlu0 %v6790_v47, %s5963_s6  ;;  %1504 = vrot.lane.b32.xlu1 %v6793_v40, %s5963_s6 }
 0x179   : > { %1576 = vbcast.lane.b32.xlu0 %v1574_v21, 256  ;;  %1583 = vbcast.lane.b32.xlu1 %v1581_v2, 256  ;;  %v1707_v21 = vrot.slane %v6833_v43, %v9681_v38  ;;  %v1714_v2 = vrot.slane %v6833_v43, %v9682_v45 }
 0x17d   : > { %1590 = vbcast.lane.b32.xlu0 %v1588_v8, 256  ;;  %1597 = vbcast.lane.b32.xlu1 %v1595_v57, 256  ;;  %v1721_v8 = vrot.slane %v6833_v43, %v9683_v10  ;;  %v9690_v57 = vld [vmem:[#allocation40_spill] sm:$0xff] }
 0x181   : > { %1604 = vbcast.lane.b32.xlu0 %v1602_v59, 256  ;;  %1611 = vbcast.lane.b32.xlu1 %v1609_v34, 256  ;;  %v6853_v59 = vmul.f32 %v9690_v57, %v9690_v57  ;;  %v1728_v34 = vrot.slane %v6833_v43, %v9686_v23 }
 0x183   : > { %9691 = vst [vmem:[#allocation50_spill] sm:$0xff] %v6853_v59 }
 0x185   : > { %1618 = vbcast.lane.b32.xlu0 %v1616_v27, 256  ;;  %1625 = vbcast.lane.b32.xlu1 %v1623_v28, 256  ;;  %v1742_v27 = vrot.slane %v6853_v59, %v9678_v29  ;;  %v1749_v28 = vrot.slane %v6853_v59, %v9679_v15 }
 0x189   : > { %1632 = vbcast.lane.b32.xlu0 %v1630_v32, 256  ;;  %1639 = vbcast.lane.b32.xlu1 %v1637_v46, 256  ;;  %v1756_v32 = vrot.slane %v6853_v59, %v9680_v4  ;;  %v1763_v46 = vrot.slane %v6853_v59, %v9681_v38 }
 0x18d   : > { %1646 = vbcast.lane.b32.xlu0 %v1644_v55, 256  ;;  %1653 = vbcast.lane.b32.xlu1 %v1651_v17, 256 }
 0x191   : > { %1660 = vbcast.lane.b32.xlu0 %v1658_v49, 256  ;;  %1667 = vbcast.lane.b32.xlu1 %v1665_v58, 256  ;;  %v1770_v49 = vrot.slane %v6853_v59, %v9682_v45  ;;  %v1777_v58 = vrot.slane %v6853_v59, %v9683_v10 }
 0x195   : > { %1674 = vbcast.lane.b32.xlu0 %v1672_v61, 256  ;;  %1681 = vbcast.lane.b32.xlu1 %v1679_v19, 256  ;;  %v1784_v19 = vrot.slane %v6853_v59, %v9686_v23 }
 0x199   : > { %1688 = vbcast.lane.b32.xlu0 %v1686_v18, 256  ;;  %1695 = vbcast.lane.b32.xlu1 %v1693_v0, 256  ;;  %v1791_v18 = vrot.slane %v6853_v59, %v9687_v13 }
 0x19d   : > { %1702 = vbcast.lane.b32.xlu0 %v1700_v22, 256  ;;  %1709 = vbcast.lane.b32.xlu1 %v1707_v21, 256 }
 0x1a1   : > { %1716 = vbcast.lane.b32.xlu0 %v1714_v2, 256  ;;  %1723 = vbcast.lane.b32.xlu1 %v1721_v8, 256 }
 0x1a5   : > { %1730 = vbcast.lane.b32.xlu0 %v1728_v34, 256  ;;  %1737 = vbcast.lane.b32.xlu1 %v1735_v6, 256 }
 0x1a9   : > { %1744 = vbcast.lane.b32.xlu0 %v1742_v27, 256  ;;  %1751 = vbcast.lane.b32.xlu1 %v1749_v28, 256 }
 0x1ab   : > { %v1443_v55 = vpop.permute.xlu0 %1442  ;;  %v1445_v17 = vpop.permute.xlu1 %1444 }
 0x1ac   : > { %v1539_v47 = vsel %vm1538_vm2, 0.0, %v1443_v55  ;;  %v1540_v25 = vsel %vm1538_vm2, 0.0, %v1445_v17 }
 0x1ad   : > { %1758 = vbcast.lane.b32.xlu0 %v1756_v32, 256  ;;  %1765 = vbcast.lane.b32.xlu1 %v1763_v46, 256 }
 0x1af   : > { %v1447_v41 = vpop.permute.xlu0 %1446  ;;  %v1449_v61 = vpop.permute.xlu1 %1448 }
 0x1b1   : > { %1772 = vbcast.lane.b32.xlu0 %v1770_v49, 256  ;;  %1779 = vbcast.lane.b32.xlu1 %v1777_v58, 256 }
 0x1b3   : > { %v1451_v0 = vpop.permute.xlu0 %1450  ;;  %v1453_v22 = vpop.permute.xlu1 %1452 }
 0x1b5   : > { %1786 = vbcast.lane.b32.xlu0 %v1784_v19, 256  ;;  %1793 = vbcast.lane.b32.xlu1 %v1791_v18, 256 }
 0x1b7   : > { %v1455_v21 = vpop.permute.xlu0 %1454  ;;  %v1457_v2 = vpop.permute.xlu1 %1456 }
 0x1bb   : > { %v6875_v8 = vpop.permute.xlu0 %1458  ;;  %v6877_v57 = vpop.permute.xlu1 %1460 }
 0x1bf   : > { %v6879_v34 = vpop.permute.xlu0 %1462  ;;  %v6881_v6 = vpop.permute.xlu1 %1464 }
 0x1c3   : > { %v6883_v27 = vpop.permute.xlu0 %1466  ;;  %v6885_v28 = vpop.permute.xlu1 %1468 }
 0x1c7   : > { %v6887_v32 = vpop.permute.xlu0 %1470  ;;  %v6889_v46 = vpop.permute.xlu1 %1472 }
 0x1cb   : > { %v6891_v49 = vpop.permute.xlu0 %1474  ;;  %v6893_v58 = vpop.permute.xlu1 %1476 }
 0x1cf   : > { %v6895_v19 = vpop.permute.xlu0 %1478  ;;  %v6897_v18 = vpop.permute.xlu1 %1480 }
 0x1d3   : > { %v6899_v59 = vpop.permute.xlu0 %1482  ;;  %v6901_v43 = vpop.permute.xlu1 %1484 }
 0x1d7   : > { %v6903_v12 = vpop.permute.xlu0 %1486  ;;  %v6905_v13 = vpop.permute.xlu1 %1488 }
 0x1db   : > { %v6907_v23 = vpop.permute.xlu0 %1490  ;;  %v6909_v10 = vpop.permute.xlu1 %1492 }
 0x1df   : > { %v6911_v45 = vpop.permute.xlu0 %1494  ;;  %v6913_v38 = vpop.permute.xlu1 %1496 }
 0x1e0   : > { %9692 = vst [vmem:[#allocation29_spill] sm:$0xff] %v6911_v45  ;;  %9693 = vst [vmem:[#allocation28_spill] sm:$0xff] %v6913_v38 }
 0x1e3   : > { %v6915_v4 = vpop.permute.xlu0 %1498  ;;  %v6917_v15 = vpop.permute.xlu1 %1500 }
 0x1e4   : > { %9694 = vst [vmem:[#allocation31_spill] sm:$0xff] %v6915_v4  ;;  %9695 = vst [vmem:[#allocation38_spill] sm:$0xff] %v6917_v15  ;;  %v1541_v15 = vsel %vm1538_vm2, 0.0, %v1447_v41  ;;  %v1547_v41 = vsel %vm1538_vm2, 0.0, %v6875_v8  ;;  %v1549_v8 = vsel %vm1538_vm2, 0.0, %v6879_v34  ;;  %v1551_v34 = vsel %vm1538_vm2, 0.0, %v6883_v27 }
 0x1e5   : > { %v1553_v27 = vsel %vm1538_vm2, 0.0, %v6887_v32  ;;  %v1555_v32 = vsel %vm1538_vm2, 0.0, %v6891_v49  ;;  %v1557_v49 = vsel %vm1538_vm2, 0.0, %v6895_v19  ;;  %v1559_v19 = vsel %vm1538_vm2, 0.0, %v6899_v59 }
 0x1e6   : > { %v1561_v59 = vsel %vm1538_vm2, 0.0, %v6903_v12  ;;  %v1563_v12 = vsel %vm1538_vm2, 0.0, %v6907_v23 }
 0x1e7   : > { %v6919_v29 = vpop.permute.xlu0 %1502  ;;  %v6921_v40 = vpop.permute.xlu1 %1504  ;;  %v9700_v23 = vld [vmem:[#allocation29_spill] sm:$0xff] }
 0x1e8   : > { %9696 = vst [vmem:[#allocation39_spill] sm:$0xff] %v6919_v29  ;;  %9697 = vst [vmem:[#allocation40_spill] sm:$0xff] %v6921_v40  ;;  %v1542_v29 = vsel %vm1538_vm2, 0.0, %v1449_v61  ;;  %v1548_v61 = vsel %vm1538_vm2, 0.0, %v6877_v57  ;;  %v1550_v57 = vsel %vm1538_vm2, 0.0, %v6881_v6  ;;  %v1552_v6 = vsel %vm1538_vm2, 0.0, %v6885_v28 }
 0x1e9   : > { %v1554_v28 = vsel %vm1538_vm2, 0.0, %v6889_v46  ;;  %v1556_v46 = vsel %vm1538_vm2, 0.0, %v6893_v58  ;;  %v1558_v58 = vsel %vm1538_vm2, 0.0, %v6897_v18  ;;  %v1560_v18 = vsel %vm1538_vm2, 0.0, %v6901_v43 }
 0x1ea   : > { %v1562_v43 = vsel %vm1538_vm2, 0.0, %v6905_v13  ;;  %v1564_v13 = vsel %vm1538_vm2, 0.0, %v6909_v10  ;;  %v9701_v10 = vld [vmem:[#allocation28_spill] sm:$0xff] }
 0x1eb   : > { %v1577_v52 = vpop.permute.xlu0 %1576  ;;  %v1584_v33 = vpop.permute.xlu1 %1583 }
 0x1ec   : > { %v1795_v63 = vmul.f32 %v1577_v52, %v1539_v47  ;;  %v1796_v51 = vmul.f32 %v1584_v33, %v1540_v25 }
 0x1ee   : > { %v6926_v45 = vadd.f32 %v1795_v63, %v6582_v11  ;;  %v6929_v4 = vadd.f32 %v1796_v51, %v6585_v5  ;;  %v1543_v51 = vsel %vm1538_vm2, 0.0, %v1451_v0  ;;  %v1544_v63 = vsel %vm1538_vm2, 0.0, %v1453_v22 }
 0x1ef   : > { %v1591_v40 = vpop.permute.xlu0 %1590  ;;  %v1598_v38 = vpop.permute.xlu1 %1597 }
 0x1f0   : > { %v1797_v53 = vmul.f32 %v1591_v40, %v1541_v15  ;;  %v1798_v55 = vmul.f32 %v1598_v38, %v1542_v29  ;;  %1895 = vrot.lane.b32.xlu0 %v6926_v45, %s5964_s30  ;;  %1897 = vrot.lane.b32.xlu1 %v6929_v4, %s5964_s30  ;;  %v1546_v40 = vsel %vm1538_vm2, 0.0, %v1457_v2 }
 0x1f2   : > { %v6938_v11 = vadd.f32 %v1797_v53, %v6594_v30  ;;  %v6941_v5 = vadd.f32 %v1798_v55, %v6597_v35  ;;  %v1545_v53 = vsel %vm1538_vm2, 0.0, %v1455_v21 }
 0x1f3   : > { %v1605_v33 = vpop.permute.xlu0 %1604  ;;  %v1612_v52 = vpop.permute.xlu1 %1611 }
 0x1f4   : > { %v1799_v25 = vmul.f32 %v1605_v33, %v1543_v51  ;;  %v1800_v47 = vmul.f32 %v1612_v52, %v1544_v63  ;;  %1899 = vrot.lane.b32.xlu0 %v6938_v11, %s5964_s30  ;;  %1901 = vrot.lane.b32.xlu1 %v6941_v5, %s5964_s30 }
 0x1f6   : > { %v6950_v30 = vadd.f32 %v1799_v25, %v6606_v36  ;;  %v6953_v35 = vadd.f32 %v1800_v47, %v6609_v39 }
 0x1f7   : > { %v1619_v29 = vpop.permute.xlu0 %1618  ;;  %v1626_v15 = vpop.permute.xlu1 %1625 }
 0x1f8   : > { %v1801_v38 = vmul.f32 %v1619_v29, %v1545_v53  ;;  %v1802_v17 = vmul.f32 %v1626_v15, %v1546_v40  ;;  %1903 = vrot.lane.b32.xlu0 %v6950_v30, %s5964_s30  ;;  %1905 = vrot.lane.b32.xlu1 %v6953_v35, %s5964_s30 }
 0x1fa   : > { %v6962_v36 = vadd.f32 %v1801_v38, %v6618_v42  ;;  %v6965_v39 = vadd.f32 %v1802_v17, %v6621_v44 }
 0x1fb   : > { %v1633_v0 = vpop.permute.xlu0 %1632  ;;  %v1640_v22 = vpop.permute.xlu1 %1639 }
 0x1fc   : > { %v1803_v21 = vmul.f32 %v1633_v0, %v1547_v41  ;;  %v1804_v2 = vmul.f32 %v1640_v22, %v1548_v61  ;;  %1907 = vrot.lane.b32.xlu0 %v6962_v36, %s5964_s30  ;;  %1909 = vrot.lane.b32.xlu1 %v6965_v39, %s5964_s30 }
 0x1fe   : > { %v6976_v42 = vadd.f32 %v1803_v21, %v6632_v48  ;;  %v6979_v44 = vadd.f32 %v1804_v2, %v6635_v50 }
 0x1ff   : > { %v1647_v55 = vpop.permute.xlu0 %1646  ;;  %v1654_v51 = vpop.permute.xlu1 %1653 }
 0x200   : > { %v1805_v63 = vmul.f32 %v1647_v55, %v1549_v8  ;;  %v1806_v33 = vmul.f32 %v1654_v51, %v1550_v57  ;;  %1911 = vrot.lane.b32.xlu0 %v6976_v42, %s5964_s30  ;;  %1913 = vrot.lane.b32.xlu1 %v6979_v44, %s5964_s30 }
 0x202   : > { %v6990_v48 = vadd.f32 %v1805_v63, %v6646_v54  ;;  %v6993_v50 = vadd.f32 %v1806_v33, %v6649_v56 }
 0x203   : > { %v1661_v52 = vpop.permute.xlu0 %1660  ;;  %v1668_v25 = vpop.permute.xlu1 %1667 }
 0x204   : > { %v1807_v47 = vmul.f32 %v1661_v52, %v1551_v34  ;;  %v1808_v53 = vmul.f32 %v1668_v25, %v1552_v6  ;;  %1915 = vrot.lane.b32.xlu0 %v6990_v48, %s5964_s30  ;;  %1917 = vrot.lane.b32.xlu1 %v6993_v50, %s5964_s30 }
 0x206   : > { %v7004_v54 = vadd.f32 %v1807_v47, %v6660_v60  ;;  %v7007_v56 = vadd.f32 %v1808_v53, %v6663_v62 }
 0x207   : > { %v1675_v40 = vpop.permute.xlu0 %1674  ;;  %v1682_v29 = vpop.permute.xlu1 %1681 }
 0x208   : > { %v1809_v15 = vmul.f32 %v1675_v40, %v1553_v27  ;;  %v1810_v38 = vmul.f32 %v1682_v29, %v1554_v28  ;;  %1919 = vrot.lane.b32.xlu0 %v7004_v54, %s5964_s30  ;;  %1921 = vrot.lane.b32.xlu1 %v7007_v56, %s5964_s30  ;;  %v1565_v40 = vsel %vm1538_vm2, 0.0, %v9700_v23  ;;  %v1566_v29 = vsel %vm1538_vm2, 0.0, %v9701_v10  ;;  %v9720_v23 = vld [vmem:[#allocation21_spill] sm:$0xff]  ;;  %v9721_v10 = vld [vmem:[#allocation30_spill] sm:$0xff] }
 0x20a   : > { %v7018_v60 = vadd.f32 %v1809_v15, %v6674_v1  ;;  %v7021_v62 = vadd.f32 %v1810_v38, %v6677_v3 }
 0x20b   : > { %v1689_v17 = vpop.permute.xlu0 %1688  ;;  %v1696_v41 = vpop.permute.xlu1 %1695 }
 0x20c   : > { %v1811_v61 = vmul.f32 %v1689_v17, %v1555_v32  ;;  %v1812_v0 = vmul.f32 %v1696_v41, %v1556_v46  ;;  %1923 = vrot.lane.b32.xlu0 %v7018_v60, %s5964_s30  ;;  %1925 = vrot.lane.b32.xlu1 %v7021_v62, %s5964_s30  ;;  %v9704_v41 = vld [vmem:[#allocation46_spill] sm:$0xff] }
 0x20e   : > { %v7032_v1 = vadd.f32 %v1811_v61, %v6688_v7  ;;  %v7035_v3 = vadd.f32 %v1812_v0, %v6691_v9  ;;  %v9706_v0 = vld [vmem:[#allocation31_spill] sm:$0xff] }
 0x20f   : > { %v1703_v22 = vpop.permute.xlu0 %1702  ;;  %v1710_v21 = vpop.permute.xlu1 %1709 }
 0x210   : > { %v1813_v2 = vmul.f32 %v1703_v22, %v1557_v49  ;;  %v1814_v8 = vmul.f32 %v1710_v21, %v1558_v58  ;;  %1927 = vrot.lane.b32.xlu0 %v7032_v1, %s5964_s30  ;;  %1929 = vrot.lane.b32.xlu1 %v7035_v3, %s5964_s30  ;;  %v1567_v49 = vsel %vm1538_vm2, 0.0, %v9706_v0  ;;  %v9707_v58 = vld [vmem:[#allocation38_spill] sm:$0xff]  ;;  %v9725_v0 = vld [vmem:[#allocation35_spill] sm:$0xff] }
 0x211   : > { %v1568_v22 = vsel %vm1538_vm2, 0.0, %v9707_v58  ;;  %v9726_v58 = vld [vmem:[#allocation36_spill] sm:$0xff] }
 0x212   : > { %v7046_v7 = vadd.f32 %v1813_v2, %v6702_v14  ;;  %v7049_v9 = vadd.f32 %v1814_v8, %v6705_v16 }
 0x213   : > { %v1717_v57 = vpop.permute.xlu0 %1716  ;;  %v1724_v55 = vpop.permute.xlu1 %1723 }
 0x214   : > { %v1815_v51 = vmul.f32 %v1717_v57, %v1559_v19  ;;  %v1816_v63 = vmul.f32 %v1724_v55, %v1560_v18  ;;  %1931 = vrot.lane.b32.xlu0 %v7046_v7, %s5964_s30  ;;  %1933 = vrot.lane.b32.xlu1 %v7049_v9, %s5964_s30  ;;  %v9708_v18 = vld [vmem:[#allocation24_spill] sm:$0xff]  ;;  %v9710_v55 = vld [vmem:[#allocation25_spill] sm:$0xff] }
 0x216   : > { %v7060_v14 = vadd.f32 %v1815_v51, %v6716_v24  ;;  %v7063_v16 = vadd.f32 %v1816_v63, %v6719_v26  ;;  %v9712_v63 = vld [vmem:[#allocation39_spill] sm:$0xff] }
 0x217   : > { %v1731_v33 = vpop.permute.xlu0 %1730  ;;  %v1738_v34 = vpop.permute.xlu1 %1737 }
 0x218   : > { %v1817_v6 = vmul.f32 %v1731_v33, %v1561_v59  ;;  %v1818_v52 = vmul.f32 %v1738_v34, %v1562_v43  ;;  %1935 = vrot.lane.b32.xlu0 %v7060_v14, %s5964_s30  ;;  %1937 = vrot.lane.b32.xlu1 %v7063_v16, %s5964_s30  ;;  %v1569_v59 = vsel %vm1538_vm2, 0.0, %v9712_v63  ;;  %v9713_v43 = vld [vmem:[#allocation40_spill] sm:$0xff] }
 0x219   : > { %v1570_v33 = vsel %vm1538_vm2, 0.0, %v9713_v43 }
 0x21a   : > { %v7074_v24 = vadd.f32 %v1817_v6, %v6730_v20  ;;  %v7077_v26 = vadd.f32 %v1818_v52, %v6733_v31  ;;  %v9698_v31 = vld [vmem:[#allocation23_spill] sm:$0xff] }
 0x21b   : > { %v1745_v25 = vpop.permute.xlu0 %1744  ;;  %v1752_v47 = vpop.permute.xlu1 %1751 }
 0x21c   : > { %v1819_v53 = vmul.f32 %v1745_v25, %v1563_v12  ;;  %v1820_v27 = vmul.f32 %v1752_v47, %v1564_v13  ;;  %1939 = vrot.lane.b32.xlu0 %v7074_v24, %s5964_s30  ;;  %1941 = vrot.lane.b32.xlu1 %v7077_v26, %s5964_s30  ;;  %v9714_v13 = vld [vmem:[#allocation47_spill] sm:$0xff]  ;;  %v9716_v47 = vld [vmem:[#allocation48_spill] sm:$0xff] }
 0x21d   : > { %v7131_v25 = vmul.f32 %v9714_v13, %v9714_v13 }
 0x21e   : > { %v7088_v20 = vadd.f32 %v1819_v53, %v6744_v37  ;;  %v7091_v28 = vadd.f32 %v1820_v27, %v9698_v31  ;;  %v9702_v37 = vld [vmem:[#allocation45_spill] sm:$0xff]  ;;  %v9718_v27 = vld [vmem:[#allocation26_spill] sm:$0xff] }
 0x21f   : > { %v1759_v15 = vpop.permute.xlu0 %1758  ;;  %v1766_v38 = vpop.permute.xlu1 %1765  ;;  %9715 = vst [vmem:[#allocation31_spill] sm:$0xff] %v7131_v25 }
 0x220   : > { %9699 = vst [vmem:[#allocation23_spill] sm:$0xff] %v7091_v28  ;;  %v1821_v32 = vmul.f32 %v1759_v15, %v1565_v40  ;;  %v1822_v46 = vmul.f32 %v1766_v38, %v1566_v29  ;;  %1943 = vrot.lane.b32.xlu0 %v7088_v20, %s5964_s30  ;;  %1945 = vrot.lane.b32.xlu1 %v7091_v28, %s5964_s30  ;;  %v9722_v15 = vld [vmem:[#allocation32_spill] sm:$0xff] }
 0x221   : > { %v2027_v40 = vrot.slane %v7131_v25, %v9720_v23  ;;  %v2034_v29 = vrot.slane %v7131_v25, %v9721_v10  ;;  %v2041_v38 = vrot.slane %v7131_v25, %v9722_v15 }
 0x222   : > { %v7102_v17 = vadd.f32 %v1821_v32, %v9702_v37  ;;  %v7105_v61 = vadd.f32 %v1822_v46, %v9704_v41  ;;  %v9723_v32 = vld [vmem:[#allocation33_spill] sm:$0xff]  ;;  %v9724_v37 = vld [vmem:[#allocation34_spill] sm:$0xff] }
 0x223   : > { %v1773_v21 = vpop.permute.xlu0 %1772  ;;  %v1780_v2 = vpop.permute.xlu1 %1779  ;;  %v2048_v46 = vrot.slane %v7131_v25, %v9723_v32  ;;  %v2055_v41 = vrot.slane %v7131_v25, %v9724_v37 }
 0x224   : > { %9703 = vst [vmem:[#allocation29_spill] sm:$0xff] %v7102_v17  ;;  %9705 = vst [vmem:[#allocation28_spill] sm:$0xff] %v7105_v61  ;;  %v1823_v8 = vmul.f32 %v1773_v21, %v1567_v49  ;;  %v1824_v19 = vmul.f32 %v1780_v2, %v1568_v22  ;;  %1947 = vrot.lane.b32.xlu0 %v7102_v17, %s5964_s30  ;;  %1949 = vrot.lane.b32.xlu1 %v7105_v61, %s5964_s30  ;;  %v9727_v21 = vld [vmem:[#allocation37_spill] sm:$0xff] }
 0x225   : > { %v2062_v49 = vrot.slane %v7131_v25, %v9725_v0  ;;  %v2069_v22 = vrot.slane %v7131_v25, %v9726_v58  ;;  %v2076_v2 = vrot.slane %v7131_v25, %v9727_v21 }
 0x226   : > { %v7116_v57 = vadd.f32 %v1823_v8, %v9708_v18  ;;  %v7119_v51 = vadd.f32 %v1824_v19, %v9710_v55  ;;  %v9728_v8 = vld [vmem:[#allocation27_spill] sm:$0xff] }
 0x227   : > { %v1787_v34 = vpop.permute.xlu0 %1786  ;;  %v1794_v6 = vpop.permute.xlu1 %1793  ;;  %v7161_v19 = vmul.f32 %v9728_v8, %v9728_v8 }
 0x228   : > { %9709 = vst [vmem:[#allocation45_spill] sm:$0xff] %v7116_v57  ;;  %9711 = vst [vmem:[#allocation46_spill] sm:$0xff] %v7119_v51  ;;  %v1825_v52 = vmul.f32 %v1787_v34, %v1569_v59  ;;  %v1826_v12 = vmul.f32 %v1794_v6, %v1570_v33  ;;  %1951 = vrot.lane.b32.xlu0 %v7116_v57, %s5964_s30  ;;  %1953 = vrot.lane.b32.xlu1 %v7119_v51, %s5964_s30 }
 0x229   : > { %9729 = vst [vmem:[#allocation25_spill] sm:$0xff] %v7161_v19  ;;  %v2083_v18 = vrot.slane %v7161_v19, %v9720_v23  ;;  %v2090_v55 = vrot.slane %v7161_v19, %v9721_v10  ;;  %v2097_v63 = vrot.slane %v7161_v19, %v9722_v15  ;;  %v2104_v59 = vrot.slane %v7161_v19, %v9723_v32 }
 0x22a   : > { %v7134_v53 = vadd.f32 %v1825_v52, %v9716_v47  ;;  %v7137_v31 = vadd.f32 %v1826_v12, %v9718_v27  ;;  %v2111_v43 = vrot.slane %v7161_v19, %v9724_v37  ;;  %v2118_v33 = vrot.slane %v7161_v19, %v9725_v0  ;;  %v9730_v52 = vld [vmem:[#allocation49_spill] sm:$0xff] }
 0x22b   : > { %v2125_v34 = vrot.slane %v7161_v19, %v9726_v58  ;;  %v2132_v6 = vrot.slane %v7161_v19, %v9727_v21  ;;  %v7181_v12 = vmul.f32 %v9730_v52, %v9730_v52 }
 0x22c   : > { %9717 = vst [vmem:[#allocation38_spill] sm:$0xff] %v7134_v53  ;;  %9719 = vst [vmem:[#allocation24_spill] sm:$0xff] %v7137_v31  ;;  %1955 = vrot.lane.b32.xlu0 %v7134_v53, %s5964_s30  ;;  %1957 = vrot.lane.b32.xlu1 %v7137_v31, %s5964_s30 }
 0x22d   : > { %9731 = vst [vmem:[#allocation39_spill] sm:$0xff] %v7181_v12  ;;  %v2139_v13 = vrot.slane %v7181_v12, %v9720_v23  ;;  %v2146_v47 = vrot.slane %v7181_v12, %v9721_v10  ;;  %v2153_v27 = vrot.slane %v7181_v12, %v9722_v15 }
 0x230   : > { %2029 = vbcast.lane.b32.xlu0 %v2027_v40, 256  ;;  %2036 = vbcast.lane.b32.xlu1 %v2034_v29, 256  ;;  %v2160_v40 = vrot.slane %v7181_v12, %v9723_v32  ;;  %v2167_v29 = vrot.slane %v7181_v12, %v9724_v37 }
 0x234   : > { %2043 = vbcast.lane.b32.xlu0 %v2041_v38, 256  ;;  %2050 = vbcast.lane.b32.xlu1 %v2048_v46, 256  ;;  %v2174_v38 = vrot.slane %v7181_v12, %v9725_v0  ;;  %v2181_v46 = vrot.slane %v7181_v12, %v9726_v58 }
 0x238   : > { %2057 = vbcast.lane.b32.xlu0 %v2055_v41, 256  ;;  %2064 = vbcast.lane.b32.xlu1 %v2062_v49, 256  ;;  %v2188_v41 = vrot.slane %v7181_v12, %v9727_v21  ;;  %v9732_v49 = vld [vmem:[#allocation50_spill] sm:$0xff] }
 0x23c   : > { %2071 = vbcast.lane.b32.xlu0 %v2069_v22, 256  ;;  %2078 = vbcast.lane.b32.xlu1 %v2076_v2, 256  ;;  %v7201_v22 = vmul.f32 %v9732_v49, %v9732_v49 }
 0x23e   : > { %9733 = vst [vmem:[#allocation40_spill] sm:$0xff] %v7201_v22  ;;  %v2195_v2 = vrot.slane %v7201_v22, %v9720_v23  ;;  %v2202_v8 = vrot.slane %v7201_v22, %v9721_v10  ;;  %v2237_v52 = vrot.slane %v7201_v22, %v9726_v58 }
 0x240   : > { %2085 = vbcast.lane.b32.xlu0 %v2083_v18, 256  ;;  %2092 = vbcast.lane.b32.xlu1 %v2090_v55, 256  ;;  %v2209_v18 = vrot.slane %v7201_v22, %v9722_v15  ;;  %v2216_v55 = vrot.slane %v7201_v22, %v9723_v32 }
 0x244   : > { %2099 = vbcast.lane.b32.xlu0 %v2097_v63, 256  ;;  %2106 = vbcast.lane.b32.xlu1 %v2104_v59, 256 }
 0x248   : > { %2113 = vbcast.lane.b32.xlu0 %v2111_v43, 256  ;;  %2120 = vbcast.lane.b32.xlu1 %v2118_v33, 256  ;;  %v2223_v43 = vrot.slane %v7201_v22, %v9724_v37  ;;  %v2230_v33 = vrot.slane %v7201_v22, %v9725_v0 }
 0x24c   : > { %2127 = vbcast.lane.b32.xlu0 %v2125_v34, 256  ;;  %2134 = vbcast.lane.b32.xlu1 %v2132_v6, 256 }
 0x250   : > { %2141 = vbcast.lane.b32.xlu0 %v2139_v13, 256  ;;  %2148 = vbcast.lane.b32.xlu1 %v2146_v47, 256  ;;  %v2244_v13 = vrot.slane %v7201_v22, %v9727_v21 }
 0x254   : > { %2155 = vbcast.lane.b32.xlu0 %v2153_v27, 256  ;;  %2162 = vbcast.lane.b32.xlu1 %v2160_v40, 256 }
 0x258   : > { %2169 = vbcast.lane.b32.xlu0 %v2167_v29, 256  ;;  %2176 = vbcast.lane.b32.xlu1 %v2174_v38, 256 }
 0x25c   : > { %2183 = vbcast.lane.b32.xlu0 %v2181_v46, 256  ;;  %2190 = vbcast.lane.b32.xlu1 %v2188_v41, 256 }
 0x260   : > { %2197 = vbcast.lane.b32.xlu0 %v2195_v2, 256  ;;  %2204 = vbcast.lane.b32.xlu1 %v2202_v8, 256 }
 0x262   : > { %v1896_v63 = vpop.permute.xlu0 %1895  ;;  %v1898_v59 = vpop.permute.xlu1 %1897 }
 0x263   : > { %v1992_v53 = vsel %vm1991_vm3, 0.0, %v1896_v63  ;;  %v1993_v25 = vsel %vm1991_vm3, 0.0, %v1898_v59 }
 0x264   : > { %2211 = vbcast.lane.b32.xlu0 %v2209_v18, 256  ;;  %2218 = vbcast.lane.b32.xlu1 %v2216_v55, 256 }
 0x266   : > { %v1900_v34 = vpop.permute.xlu0 %1899  ;;  %v1902_v6 = vpop.permute.xlu1 %1901 }
 0x268   : > { %2225 = vbcast.lane.b32.xlu0 %v2223_v43, 256  ;;  %2232 = vbcast.lane.b32.xlu1 %v2230_v33, 256 }
 0x26a   : > { %v1904_v47 = vpop.permute.xlu0 %1903  ;;  %v1906_v27 = vpop.permute.xlu1 %1905 }
 0x26c   : > { %2239 = vbcast.lane.b32.xlu0 %v2237_v52, 256  ;;  %2246 = vbcast.lane.b32.xlu1 %v2244_v13, 256 }
 0x26e   : > { %v1908_v40 = vpop.permute.xlu0 %1907  ;;  %v1910_v29 = vpop.permute.xlu1 %1909 }
 0x272   : > { %v7219_v38 = vpop.permute.xlu0 %1911  ;;  %v7221_v46 = vpop.permute.xlu1 %1913 }
 0x276   : > { %v7223_v41 = vpop.permute.xlu0 %1915  ;;  %v7225_v49 = vpop.permute.xlu1 %1917 }
 0x27a   : > { %v7227_v2 = vpop.permute.xlu0 %1919  ;;  %v7229_v8 = vpop.permute.xlu1 %1921 }
 0x27e   : > { %v7231_v18 = vpop.permute.xlu0 %1923  ;;  %v7233_v55 = vpop.permute.xlu1 %1925 }
 0x282   : > { %v7235_v43 = vpop.permute.xlu0 %1927  ;;  %v7237_v33 = vpop.permute.xlu1 %1929 }
 0x286   : > { %v7239_v52 = vpop.permute.xlu0 %1931  ;;  %v7241_v13 = vpop.permute.xlu1 %1933 }
 0x28a   : > { %v7243_v22 = vpop.permute.xlu0 %1935  ;;  %v7245_v12 = vpop.permute.xlu1 %1937 }
 0x28e   : > { %v7247_v19 = vpop.permute.xlu0 %1939  ;;  %v7249_v21 = vpop.permute.xlu1 %1941 }
 0x292   : > { %v7251_v58 = vpop.permute.xlu0 %1943  ;;  %v7253_v0 = vpop.permute.xlu1 %1945 }
 0x296   : > { %v7255_v37 = vpop.permute.xlu0 %1947  ;;  %v7257_v32 = vpop.permute.xlu1 %1949 }
 0x297   : > { %9734 = vst [vmem:[#allocation47_spill] sm:$0xff] %v7255_v37  ;;  %9735 = vst [vmem:[#allocation48_spill] sm:$0xff] %v7257_v32 }
 0x29a   : > { %v7259_v15 = vpop.permute.xlu0 %1951  ;;  %v7261_v10 = vpop.permute.xlu1 %1953 }
 0x29b   : > { %9736 = vst [vmem:[#allocation26_spill] sm:$0xff] %v7259_v15  ;;  %9737 = vst [vmem:[#allocation27_spill] sm:$0xff] %v7261_v10  ;;  %v1994_v10 = vsel %vm1991_vm3, 0.0, %v1900_v34  ;;  %v2000_v34 = vsel %vm1991_vm3, 0.0, %v7219_v38  ;;  %v2002_v38 = vsel %vm1991_vm3, 0.0, %v7223_v41  ;;  %v2004_v41 = vsel %vm1991_vm3, 0.0, %v7227_v2 }
 0x29c   : > { %v2006_v2 = vsel %vm1991_vm3, 0.0, %v7231_v18  ;;  %v2008_v18 = vsel %vm1991_vm3, 0.0, %v7235_v43  ;;  %v2010_v43 = vsel %vm1991_vm3, 0.0, %v7239_v52  ;;  %v2012_v52 = vsel %vm1991_vm3, 0.0, %v7243_v22 }
 0x29d   : > { %v2014_v22 = vsel %vm1991_vm3, 0.0, %v7247_v19  ;;  %v2016_v19 = vsel %vm1991_vm3, 0.0, %v7251_v58 }
 0x29e   : > { %v7263_v23 = vpop.permute.xlu0 %1955  ;;  %v7265_v31 = vpop.permute.xlu1 %1957  ;;  %v9742_v58 = vld [vmem:[#allocation47_spill] sm:$0xff] }
 0x29f   : > { %9738 = vst [vmem:[#allocation49_spill] sm:$0xff] %v7263_v23  ;;  %9739 = vst [vmem:[#allocation50_spill] sm:$0xff] %v7265_v31  ;;  %v1995_v23 = vsel %vm1991_vm3, 0.0, %v1902_v6  ;;  %v2001_v6 = vsel %vm1991_vm3, 0.0, %v7221_v46  ;;  %v2003_v46 = vsel %vm1991_vm3, 0.0, %v7225_v49  ;;  %v2005_v49 = vsel %vm1991_vm3, 0.0, %v7229_v8 }
 0x2a0   : > { %v2007_v8 = vsel %vm1991_vm3, 0.0, %v7233_v55  ;;  %v2009_v55 = vsel %vm1991_vm3, 0.0, %v7237_v33  ;;  %v2011_v33 = vsel %vm1991_vm3, 0.0, %v7241_v13  ;;  %v2013_v13 = vsel %vm1991_vm3, 0.0, %v7245_v12 }
 0x2a1   : > { %v2015_v12 = vsel %vm1991_vm3, 0.0, %v7249_v21  ;;  %v2017_v21 = vsel %vm1991_vm3, 0.0, %v7253_v0  ;;  %v9743_v0 = vld [vmem:[#allocation48_spill] sm:$0xff] }
 0x2a2   : > { %v2030_v51 = vpop.permute.xlu0 %2029  ;;  %v2037_v57 = vpop.permute.xlu1 %2036 }
 0x2a3   : > { %v2248_v61 = vmul.f32 %v2030_v51, %v1992_v53  ;;  %v2249_v17 = vmul.f32 %v2037_v57, %v1993_v25 }
 0x2a5   : > { %v7270_v37 = vadd.f32 %v2248_v61, %v6926_v45  ;;  %v7273_v15 = vadd.f32 %v2249_v17, %v6929_v4  ;;  %v1996_v17 = vsel %vm1991_vm3, 0.0, %v1904_v47  ;;  %v1997_v61 = vsel %vm1991_vm3, 0.0, %v1906_v27 }
 0x2a6   : > { %v2044_v31 = vpop.permute.xlu0 %2043  ;;  %v2051_v32 = vpop.permute.xlu1 %2050 }
 0x2a7   : > { %v2250_v28 = vmul.f32 %v2044_v31, %v1994_v10  ;;  %v2251_v63 = vmul.f32 %v2051_v32, %v1995_v23  ;;  %2348 = vrot.lane.b32.xlu0 %v7270_v37, %s5965_s10  ;;  %2350 = vrot.lane.b32.xlu1 %v7273_v15, %s5965_s10  ;;  %v1999_v31 = vsel %vm1991_vm3, 0.0, %v1910_v29 }
 0x2a9   : > { %v7282_v45 = vadd.f32 %v2250_v28, %v6938_v11  ;;  %v7285_v4 = vadd.f32 %v2251_v63, %v6941_v5  ;;  %v1998_v28 = vsel %vm1991_vm3, 0.0, %v1908_v40 }
 0x2aa   : > { %v2058_v57 = vpop.permute.xlu0 %2057  ;;  %v2065_v51 = vpop.permute.xlu1 %2064 }
 0x2ab   : > { %v2252_v25 = vmul.f32 %v2058_v57, %v1996_v17  ;;  %v2253_v53 = vmul.f32 %v2065_v51, %v1997_v61  ;;  %2352 = vrot.lane.b32.xlu0 %v7282_v45, %s5965_s10  ;;  %2354 = vrot.lane.b32.xlu1 %v7285_v4, %s5965_s10 }
 0x2ad   : > { %v7294_v11 = vadd.f32 %v2252_v25, %v6950_v30  ;;  %v7297_v5 = vadd.f32 %v2253_v53, %v6953_v35 }
 0x2ae   : > { %v2072_v23 = vpop.permute.xlu0 %2071  ;;  %v2079_v10 = vpop.permute.xlu1 %2078 }
 0x2af   : > { %v2254_v32 = vmul.f32 %v2072_v23, %v1998_v28  ;;  %v2255_v59 = vmul.f32 %v2079_v10, %v1999_v31  ;;  %2356 = vrot.lane.b32.xlu0 %v7294_v11, %s5965_s10  ;;  %2358 = vrot.lane.b32.xlu1 %v7297_v5, %s5965_s10 }
 0x2b1   : > { %v7306_v30 = vadd.f32 %v2254_v32, %v6962_v36  ;;  %v7309_v35 = vadd.f32 %v2255_v59, %v6965_v39 }
 0x2b2   : > { %v2086_v47 = vpop.permute.xlu0 %2085  ;;  %v2093_v27 = vpop.permute.xlu1 %2092 }
 0x2b3   : > { %v2256_v40 = vmul.f32 %v2086_v47, %v2000_v34  ;;  %v2257_v29 = vmul.f32 %v2093_v27, %v2001_v6  ;;  %2360 = vrot.lane.b32.xlu0 %v7306_v30, %s5965_s10  ;;  %2362 = vrot.lane.b32.xlu1 %v7309_v35, %s5965_s10 }
 0x2b5   : > { %v7320_v36 = vadd.f32 %v2256_v40, %v6976_v42  ;;  %v7323_v39 = vadd.f32 %v2257_v29, %v6979_v44 }
 0x2b6   : > { %v2100_v63 = vpop.permute.xlu0 %2099  ;;  %v2107_v17 = vpop.permute.xlu1 %2106 }
 0x2b7   : > { %v2258_v61 = vmul.f32 %v2100_v63, %v2002_v38  ;;  %v2259_v57 = vmul.f32 %v2107_v17, %v2003_v46  ;;  %2364 = vrot.lane.b32.xlu0 %v7320_v36, %s5965_s10  ;;  %2366 = vrot.lane.b32.xlu1 %v7323_v39, %s5965_s10 }
 0x2b9   : > { %v7334_v42 = vadd.f32 %v2258_v61, %v6990_v48  ;;  %v7337_v44 = vadd.f32 %v2259_v57, %v6993_v50 }
 0x2ba   : > { %v2114_v51 = vpop.permute.xlu0 %2113  ;;  %v2121_v25 = vpop.permute.xlu1 %2120 }
 0x2bb   : > { %v2260_v53 = vmul.f32 %v2114_v51, %v2004_v41  ;;  %v2261_v28 = vmul.f32 %v2121_v25, %v2005_v49  ;;  %2368 = vrot.lane.b32.xlu0 %v7334_v42, %s5965_s10  ;;  %2370 = vrot.lane.b32.xlu1 %v7337_v44, %s5965_s10 }
 0x2bd   : > { %v7348_v48 = vadd.f32 %v2260_v53, %v7004_v54  ;;  %v7351_v50 = vadd.f32 %v2261_v28, %v7007_v56 }
 0x2be   : > { %v2128_v31 = vpop.permute.xlu0 %2127  ;;  %v2135_v23 = vpop.permute.xlu1 %2134 }
 0x2bf   : > { %v2262_v10 = vmul.f32 %v2128_v31, %v2006_v2  ;;  %v2263_v32 = vmul.f32 %v2135_v23, %v2007_v8  ;;  %2372 = vrot.lane.b32.xlu0 %v7348_v48, %s5965_s10  ;;  %2374 = vrot.lane.b32.xlu1 %v7351_v50, %s5965_s10  ;;  %v2018_v31 = vsel %vm1991_vm3, 0.0, %v9742_v58  ;;  %v2019_v23 = vsel %vm1991_vm3, 0.0, %v9743_v0  ;;  %v9762_v58 = vld [vmem:[#allocation21_spill] sm:$0xff]  ;;  %v9763_v0 = vld [vmem:[#allocation30_spill] sm:$0xff] }
 0x2c1   : > { %v7362_v54 = vadd.f32 %v2262_v10, %v7018_v60  ;;  %v7365_v56 = vadd.f32 %v2263_v32, %v7021_v62 }
 0x2c2   : > { %v2142_v59 = vpop.permute.xlu0 %2141  ;;  %v2149_v34 = vpop.permute.xlu1 %2148 }
 0x2c3   : > { %v2264_v6 = vmul.f32 %v2142_v59, %v2008_v18  ;;  %v2265_v47 = vmul.f32 %v2149_v34, %v2009_v55  ;;  %2376 = vrot.lane.b32.xlu0 %v7362_v54, %s5965_s10  ;;  %2378 = vrot.lane.b32.xlu1 %v7365_v56, %s5965_s10  ;;  %v9746_v34 = vld [vmem:[#allocation28_spill] sm:$0xff] }
 0x2c5   : > { %v7376_v60 = vadd.f32 %v2264_v6, %v7032_v1  ;;  %v7379_v62 = vadd.f32 %v2265_v47, %v7035_v3  ;;  %v9748_v47 = vld [vmem:[#allocation26_spill] sm:$0xff] }
 0x2c6   : > { %v2156_v27 = vpop.permute.xlu0 %2155  ;;  %v2163_v40 = vpop.permute.xlu1 %2162 }
 0x2c7   : > { %v2266_v29 = vmul.f32 %v2156_v27, %v2010_v43  ;;  %v2267_v38 = vmul.f32 %v2163_v40, %v2011_v33  ;;  %2380 = vrot.lane.b32.xlu0 %v7376_v60, %s5965_s10  ;;  %2382 = vrot.lane.b32.xlu1 %v7379_v62, %s5965_s10  ;;  %v2020_v43 = vsel %vm1991_vm3, 0.0, %v9748_v47  ;;  %v9749_v33 = vld [vmem:[#allocation27_spill] sm:$0xff] }
 0x2c8   : > { %v2021_v27 = vsel %vm1991_vm3, 0.0, %v9749_v33  ;;  %v9767_v47 = vld [vmem:[#allocation35_spill] sm:$0xff]  ;;  %v9768_v33 = vld [vmem:[#allocation36_spill] sm:$0xff] }
 0x2c9   : > { %v7390_v1 = vadd.f32 %v2266_v29, %v7046_v7  ;;  %v7393_v3 = vadd.f32 %v2267_v38, %v7049_v9 }
 0x2ca   : > { %v2170_v46 = vpop.permute.xlu0 %2169  ;;  %v2177_v63 = vpop.permute.xlu1 %2176 }
 0x2cb   : > { %v2268_v17 = vmul.f32 %v2170_v46, %v2012_v52  ;;  %v2269_v61 = vmul.f32 %v2177_v63, %v2013_v13  ;;  %2384 = vrot.lane.b32.xlu0 %v7390_v1, %s5965_s10  ;;  %2386 = vrot.lane.b32.xlu1 %v7393_v3, %s5965_s10  ;;  %v9750_v13 = vld [vmem:[#allocation45_spill] sm:$0xff]  ;;  %v9752_v63 = vld [vmem:[#allocation46_spill] sm:$0xff] }
 0x2cd   : > { %v7404_v7 = vadd.f32 %v2268_v17, %v7060_v14  ;;  %v7407_v9 = vadd.f32 %v2269_v61, %v7063_v16  ;;  %v9754_v61 = vld [vmem:[#allocation49_spill] sm:$0xff] }
 0x2ce   : > { %v2184_v57 = vpop.permute.xlu0 %2183  ;;  %v2191_v41 = vpop.permute.xlu1 %2190 }
 0x2cf   : > { %v2270_v49 = vmul.f32 %v2184_v57, %v2014_v22  ;;  %v2271_v51 = vmul.f32 %v2191_v41, %v2015_v12  ;;  %2388 = vrot.lane.b32.xlu0 %v7404_v7, %s5965_s10  ;;  %2390 = vrot.lane.b32.xlu1 %v7407_v9, %s5965_s10  ;;  %v2022_v22 = vsel %vm1991_vm3, 0.0, %v9754_v61  ;;  %v9755_v12 = vld [vmem:[#allocation50_spill] sm:$0xff] }
 0x2d0   : > { %v2023_v57 = vsel %vm1991_vm3, 0.0, %v9755_v12 }
 0x2d1   : > { %v7418_v14 = vadd.f32 %v2270_v49, %v7074_v24  ;;  %v7421_v16 = vadd.f32 %v2271_v51, %v7077_v26  ;;  %v9740_v26 = vld [vmem:[#allocation23_spill] sm:$0xff] }
 0x2d2   : > { %v2198_v25 = vpop.permute.xlu0 %2197  ;;  %v2205_v53 = vpop.permute.xlu1 %2204 }
 0x2d3   : > { %v2272_v28 = vmul.f32 %v2198_v25, %v2016_v19  ;;  %v2273_v2 = vmul.f32 %v2205_v53, %v2017_v21  ;;  %2392 = vrot.lane.b32.xlu0 %v7418_v14, %s5965_s10  ;;  %2394 = vrot.lane.b32.xlu1 %v7421_v16, %s5965_s10  ;;  %v9756_v21 = vld [vmem:[#allocation31_spill] sm:$0xff]  ;;  %v9758_v53 = vld [vmem:[#allocation38_spill] sm:$0xff] }
 0x2d4   : > { %v7475_v25 = vmul.f32 %v9756_v21, %v9756_v21 }
 0x2d5   : > { %v7432_v24 = vadd.f32 %v2272_v28, %v7088_v20  ;;  %v7435_v8 = vadd.f32 %v2273_v2, %v9740_v26  ;;  %v9744_v20 = vld [vmem:[#allocation29_spill] sm:$0xff]  ;;  %v9760_v2 = vld [vmem:[#allocation24_spill] sm:$0xff] }
 0x2d6   : > { %v2212_v10 = vpop.permute.xlu0 %2211  ;;  %v2219_v32 = vpop.permute.xlu1 %2218  ;;  %9757 = vst [vmem:[#allocation26_spill] sm:$0xff] %v7475_v25 }
 0x2d7   : > { %9741 = vst [vmem:[#allocation23_spill] sm:$0xff] %v7435_v8  ;;  %v2274_v18 = vmul.f32 %v2212_v10, %v2018_v31  ;;  %v2275_v55 = vmul.f32 %v2219_v32, %v2019_v23  ;;  %2396 = vrot.lane.b32.xlu0 %v7432_v24, %s5965_s10  ;;  %2398 = vrot.lane.b32.xlu1 %v7435_v8, %s5965_s10  ;;  %v9764_v10 = vld [vmem:[#allocation32_spill] sm:$0xff] }
 0x2d8   : > { %v2480_v31 = vrot.slane %v7475_v25, %v9762_v58  ;;  %v2487_v23 = vrot.slane %v7475_v25, %v9763_v0  ;;  %v2494_v32 = vrot.slane %v7475_v25, %v9764_v10 }
 0x2d9   : > { %v7446_v59 = vadd.f32 %v2274_v18, %v9744_v20  ;;  %v7449_v6 = vadd.f32 %v2275_v55, %v9746_v34  ;;  %v9765_v18 = vld [vmem:[#allocation33_spill] sm:$0xff]  ;;  %v9766_v20 = vld [vmem:[#allocation34_spill] sm:$0xff] }
 0x2da   : > { %v2226_v40 = vpop.permute.xlu0 %2225  ;;  %v2233_v29 = vpop.permute.xlu1 %2232  ;;  %v2501_v55 = vrot.slane %v7475_v25, %v9765_v18  ;;  %v2508_v34 = vrot.slane %v7475_v25, %v9766_v20 }
 0x2db   : > { %9745 = vst [vmem:[#allocation47_spill] sm:$0xff] %v7446_v59  ;;  %9747 = vst [vmem:[#allocation48_spill] sm:$0xff] %v7449_v6  ;;  %v2276_v38 = vmul.f32 %v2226_v40, %v2020_v43  ;;  %v2277_v52 = vmul.f32 %v2233_v29, %v2021_v27  ;;  %2400 = vrot.lane.b32.xlu0 %v7446_v59, %s5965_s10  ;;  %2402 = vrot.lane.b32.xlu1 %v7449_v6, %s5965_s10  ;;  %v9769_v40 = vld [vmem:[#allocation37_spill] sm:$0xff] }
 0x2dc   : > { %v2515_v43 = vrot.slane %v7475_v25, %v9767_v47  ;;  %v2522_v27 = vrot.slane %v7475_v25, %v9768_v33  ;;  %v2529_v29 = vrot.slane %v7475_v25, %v9769_v40 }
 0x2dd   : > { %v7460_v46 = vadd.f32 %v2276_v38, %v9750_v13  ;;  %v7463_v17 = vadd.f32 %v2277_v52, %v9752_v63  ;;  %v9770_v38 = vld [vmem:[#allocation25_spill] sm:$0xff] }
 0x2de   : > { %v2240_v41 = vpop.permute.xlu0 %2239  ;;  %v2247_v49 = vpop.permute.xlu1 %2246  ;;  %v7505_v52 = vmul.f32 %v9770_v38, %v9770_v38 }
 0x2df   : > { %9751 = vst [vmem:[#allocation29_spill] sm:$0xff] %v7460_v46  ;;  %9753 = vst [vmem:[#allocation28_spill] sm:$0xff] %v7463_v17  ;;  %v2278_v51 = vmul.f32 %v2240_v41, %v2022_v22  ;;  %v2279_v19 = vmul.f32 %v2247_v49, %v2023_v57  ;;  %2404 = vrot.lane.b32.xlu0 %v7460_v46, %s5965_s10  ;;  %2406 = vrot.lane.b32.xlu1 %v7463_v17, %s5965_s10 }
 0x2e0   : > { %9771 = vst [vmem:[#allocation46_spill] sm:$0xff] %v7505_v52  ;;  %v2536_v13 = vrot.slane %v7505_v52, %v9762_v58  ;;  %v2543_v63 = vrot.slane %v7505_v52, %v9763_v0  ;;  %v2550_v61 = vrot.slane %v7505_v52, %v9764_v10  ;;  %v2557_v22 = vrot.slane %v7505_v52, %v9765_v18 }
 0x2e1   : > { %v7478_v28 = vadd.f32 %v2278_v51, %v9758_v53  ;;  %v7481_v26 = vadd.f32 %v2279_v19, %v9760_v2  ;;  %v2564_v12 = vrot.slane %v7505_v52, %v9766_v20  ;;  %v2571_v57 = vrot.slane %v7505_v52, %v9767_v47  ;;  %v9772_v51 = vld [vmem:[#allocation39_spill] sm:$0xff] }
 0x2e2   : > { %v2578_v41 = vrot.slane %v7505_v52, %v9768_v33  ;;  %v2585_v49 = vrot.slane %v7505_v52, %v9769_v40  ;;  %v7525_v19 = vmul.f32 %v9772_v51, %v9772_v51 }
 0x2e3   : > { %9759 = vst [vmem:[#allocation27_spill] sm:$0xff] %v7478_v28  ;;  %9761 = vst [vmem:[#allocation45_spill] sm:$0xff] %v7481_v26  ;;  %2408 = vrot.lane.b32.xlu0 %v7478_v28, %s5965_s10  ;;  %2410 = vrot.lane.b32.xlu1 %v7481_v26, %s5965_s10 }
 0x2e4   : > { %9773 = vst [vmem:[#allocation49_spill] sm:$0xff] %v7525_v19  ;;  %v2592_v21 = vrot.slane %v7525_v19, %v9762_v58  ;;  %v2599_v53 = vrot.slane %v7525_v19, %v9763_v0  ;;  %v2606_v2 = vrot.slane %v7525_v19, %v9764_v10 }
 0x2e7   : > { %2482 = vbcast.lane.b32.xlu0 %v2480_v31, 256  ;;  %2489 = vbcast.lane.b32.xlu1 %v2487_v23, 256  ;;  %v2613_v31 = vrot.slane %v7525_v19, %v9765_v18  ;;  %v2620_v23 = vrot.slane %v7525_v19, %v9766_v20 }
 0x2eb   : > { %2496 = vbcast.lane.b32.xlu0 %v2494_v32, 256  ;;  %2503 = vbcast.lane.b32.xlu1 %v2501_v55, 256  ;;  %v2627_v32 = vrot.slane %v7525_v19, %v9767_v47  ;;  %v2634_v55 = vrot.slane %v7525_v19, %v9768_v33 }
 0x2ef   : > { %2510 = vbcast.lane.b32.xlu0 %v2508_v34, 256  ;;  %2517 = vbcast.lane.b32.xlu1 %v2515_v43, 256  ;;  %v2641_v34 = vrot.slane %v7525_v19, %v9769_v40  ;;  %v9774_v43 = vld [vmem:[#allocation40_spill] sm:$0xff] }
 0x2f3   : > { %2524 = vbcast.lane.b32.xlu0 %v2522_v27, 256  ;;  %2531 = vbcast.lane.b32.xlu1 %v2529_v29, 256  ;;  %v7545_v27 = vmul.f32 %v9774_v43, %v9774_v43 }
 0x2f5   : > { %9775 = vst [vmem:[#allocation50_spill] sm:$0xff] %v7545_v27  ;;  %v2648_v29 = vrot.slane %v7545_v27, %v9762_v58  ;;  %v2655_v38 = vrot.slane %v7545_v27, %v9763_v0  ;;  %v2690_v51 = vrot.slane %v7545_v27, %v9768_v33 }
 0x2f7   : > { %2538 = vbcast.lane.b32.xlu0 %v2536_v13, 256  ;;  %2545 = vbcast.lane.b32.xlu1 %v2543_v63, 256  ;;  %v2662_v13 = vrot.slane %v7545_v27, %v9764_v10  ;;  %v2669_v63 = vrot.slane %v7545_v27, %v9765_v18 }
 0x2fb   : > { %2552 = vbcast.lane.b32.xlu0 %v2550_v61, 256  ;;  %2559 = vbcast.lane.b32.xlu1 %v2557_v22, 256 }
 0x2ff   : > { %2566 = vbcast.lane.b32.xlu0 %v2564_v12, 256  ;;  %2573 = vbcast.lane.b32.xlu1 %v2571_v57, 256  ;;  %v2676_v12 = vrot.slane %v7545_v27, %v9766_v20  ;;  %v2683_v57 = vrot.slane %v7545_v27, %v9767_v47 }
 0x303   : > { %2580 = vbcast.lane.b32.xlu0 %v2578_v41, 256  ;;  %2587 = vbcast.lane.b32.xlu1 %v2585_v49, 256 }
 0x307   : > { %2594 = vbcast.lane.b32.xlu0 %v2592_v21, 256  ;;  %2601 = vbcast.lane.b32.xlu1 %v2599_v53, 256  ;;  %v2697_v21 = vrot.slane %v7545_v27, %v9769_v40 }
 0x30b   : > { %2608 = vbcast.lane.b32.xlu0 %v2606_v2, 256  ;;  %2615 = vbcast.lane.b32.xlu1 %v2613_v31, 256 }
 0x30f   : > { %2622 = vbcast.lane.b32.xlu0 %v2620_v23, 256  ;;  %2629 = vbcast.lane.b32.xlu1 %v2627_v32, 256 }
 0x313   : > { %2636 = vbcast.lane.b32.xlu0 %v2634_v55, 256  ;;  %2643 = vbcast.lane.b32.xlu1 %v2641_v34, 256 }
 0x317   : > { %2650 = vbcast.lane.b32.xlu0 %v2648_v29, 256  ;;  %2657 = vbcast.lane.b32.xlu1 %v2655_v38, 256 }
 0x319   : > { %v2349_v61 = vpop.permute.xlu0 %2348  ;;  %v2351_v22 = vpop.permute.xlu1 %2350 }
 0x31a   : > { %v2445_v28 = vsel %vm2444_vm4, 0.0, %v2349_v61  ;;  %v2446_v25 = vsel %vm2444_vm4, 0.0, %v2351_v22 }
 0x31b   : > { %2664 = vbcast.lane.b32.xlu0 %v2662_v13, 256  ;;  %2671 = vbcast.lane.b32.xlu1 %v2669_v63, 256 }
 0x31d   : > { %v2353_v41 = vpop.permute.xlu0 %2352  ;;  %v2355_v49 = vpop.permute.xlu1 %2354 }
 0x31f   : > { %2678 = vbcast.lane.b32.xlu0 %v2676_v12, 256  ;;  %2685 = vbcast.lane.b32.xlu1 %v2683_v57, 256 }
 0x321   : > { %v2357_v53 = vpop.permute.xlu0 %2356  ;;  %v2359_v2 = vpop.permute.xlu1 %2358 }
 0x323   : > { %2692 = vbcast.lane.b32.xlu0 %v2690_v51, 256  ;;  %2699 = vbcast.lane.b32.xlu1 %v2697_v21, 256 }
 0x325   : > { %v2361_v31 = vpop.permute.xlu0 %2360  ;;  %v2363_v23 = vpop.permute.xlu1 %2362 }
 0x329   : > { %v7563_v32 = vpop.permute.xlu0 %2364  ;;  %v7565_v55 = vpop.permute.xlu1 %2366 }
 0x32d   : > { %v7567_v34 = vpop.permute.xlu0 %2368  ;;  %v7569_v43 = vpop.permute.xlu1 %2370 }
 0x331   : > { %v7571_v29 = vpop.permute.xlu0 %2372  ;;  %v7573_v38 = vpop.permute.xlu1 %2374 }
 0x335   : > { %v7575_v13 = vpop.permute.xlu0 %2376  ;;  %v7577_v63 = vpop.permute.xlu1 %2378 }
 0x339   : > { %v7579_v12 = vpop.permute.xlu0 %2380  ;;  %v7581_v57 = vpop.permute.xlu1 %2382 }
 0x33d   : > { %v7583_v51 = vpop.permute.xlu0 %2384  ;;  %v7585_v21 = vpop.permute.xlu1 %2386 }
 0x341   : > { %v7587_v27 = vpop.permute.xlu0 %2388  ;;  %v7589_v19 = vpop.permute.xlu1 %2390 }
 0x345   : > { %v7591_v52 = vpop.permute.xlu0 %2392  ;;  %v7593_v40 = vpop.permute.xlu1 %2394 }
 0x349   : > { %v7595_v33 = vpop.permute.xlu0 %2396  ;;  %v7597_v47 = vpop.permute.xlu1 %2398 }
 0x34d   : > { %v7599_v20 = vpop.permute.xlu0 %2400  ;;  %v7601_v18 = vpop.permute.xlu1 %2402 }
 0x34e   : > { %9776 = vst [vmem:[#allocation31_spill] sm:$0xff] %v7599_v20  ;;  %9777 = vst [vmem:[#allocation38_spill] sm:$0xff] %v7601_v18 }
 0x351   : > { %v7603_v10 = vpop.permute.xlu0 %2404  ;;  %v7605_v0 = vpop.permute.xlu1 %2406 }
 0x352   : > { %9778 = vst [vmem:[#allocation24_spill] sm:$0xff] %v7603_v10  ;;  %9779 = vst [vmem:[#allocation25_spill] sm:$0xff] %v7605_v0  ;;  %v2447_v0 = vsel %vm2444_vm4, 0.0, %v2353_v41  ;;  %v2453_v41 = vsel %vm2444_vm4, 0.0, %v7563_v32  ;;  %v2455_v32 = vsel %vm2444_vm4, 0.0, %v7567_v34  ;;  %v2457_v34 = vsel %vm2444_vm4, 0.0, %v7571_v29 }
 0x353   : > { %v2459_v29 = vsel %vm2444_vm4, 0.0, %v7575_v13  ;;  %v2461_v13 = vsel %vm2444_vm4, 0.0, %v7579_v12  ;;  %v2463_v12 = vsel %vm2444_vm4, 0.0, %v7583_v51  ;;  %v2465_v51 = vsel %vm2444_vm4, 0.0, %v7587_v27 }
 0x354   : > { %v2467_v27 = vsel %vm2444_vm4, 0.0, %v7591_v52  ;;  %v2469_v52 = vsel %vm2444_vm4, 0.0, %v7595_v33 }
 0x355   : > { %v7607_v58 = vpop.permute.xlu0 %2408  ;;  %v7609_v26 = vpop.permute.xlu1 %2410  ;;  %v9784_v33 = vld [vmem:[#allocation31_spill] sm:$0xff] }
 0x356   : > { %9780 = vst [vmem:[#allocation39_spill] sm:$0xff] %v7607_v58  ;;  %9781 = vst [vmem:[#allocation40_spill] sm:$0xff] %v7609_v26  ;;  %v2448_v58 = vsel %vm2444_vm4, 0.0, %v2355_v49  ;;  %v2454_v49 = vsel %vm2444_vm4, 0.0, %v7565_v55  ;;  %v2456_v55 = vsel %vm2444_vm4, 0.0, %v7569_v43  ;;  %v2458_v43 = vsel %vm2444_vm4, 0.0, %v7573_v38 }
 0x357   : > { %v2460_v38 = vsel %vm2444_vm4, 0.0, %v7577_v63  ;;  %v2462_v63 = vsel %vm2444_vm4, 0.0, %v7581_v57  ;;  %v2464_v57 = vsel %vm2444_vm4, 0.0, %v7585_v21  ;;  %v2466_v21 = vsel %vm2444_vm4, 0.0, %v7589_v19 }
 0x358   : > { %v2468_v19 = vsel %vm2444_vm4, 0.0, %v7593_v40  ;;  %v2470_v40 = vsel %vm2444_vm4, 0.0, %v7597_v47  ;;  %v9785_v47 = vld [vmem:[#allocation38_spill] sm:$0xff] }
 0x359   : > { %v2483_v17 = vpop.permute.xlu0 %2482  ;;  %v2490_v46 = vpop.permute.xlu1 %2489 }
 0x35a   : > { %v2701_v6 = vmul.f32 %v2483_v17, %v2445_v28  ;;  %v2702_v59 = vmul.f32 %v2490_v46, %v2446_v25 }
 0x35c   : > { %v7614_v20 = vadd.f32 %v2701_v6, %v7270_v37  ;;  %v7617_v10 = vadd.f32 %v2702_v59, %v7273_v15  ;;  %v2449_v59 = vsel %vm2444_vm4, 0.0, %v2357_v53  ;;  %v2450_v6 = vsel %vm2444_vm4, 0.0, %v2359_v2 }
 0x35d   : > { %v2497_v26 = vpop.permute.xlu0 %2496  ;;  %v2504_v18 = vpop.permute.xlu1 %2503 }
 0x35e   : > { %v2703_v8 = vmul.f32 %v2497_v26, %v2447_v0  ;;  %v2704_v61 = vmul.f32 %v2504_v18, %v2448_v58  ;;  %2801 = vrot.lane.b32.xlu0 %v7614_v20, %s5966_s14  ;;  %2803 = vrot.lane.b32.xlu1 %v7617_v10, %s5966_s14  ;;  %v2452_v26 = vsel %vm2444_vm4, 0.0, %v2363_v23 }
 0x360   : > { %v7626_v37 = vadd.f32 %v2703_v8, %v7282_v45  ;;  %v7629_v15 = vadd.f32 %v2704_v61, %v7285_v4  ;;  %v2451_v8 = vsel %vm2444_vm4, 0.0, %v2361_v31 }
 0x361   : > { %v2511_v46 = vpop.permute.xlu0 %2510  ;;  %v2518_v17 = vpop.permute.xlu1 %2517 }
 0x362   : > { %v2705_v25 = vmul.f32 %v2511_v46, %v2449_v59  ;;  %v2706_v28 = vmul.f32 %v2518_v17, %v2450_v6  ;;  %2805 = vrot.lane.b32.xlu0 %v7626_v37, %s5966_s14  ;;  %2807 = vrot.lane.b32.xlu1 %v7629_v15, %s5966_s14 }
 0x364   : > { %v7638_v45 = vadd.f32 %v2705_v25, %v7294_v11  ;;  %v7641_v4 = vadd.f32 %v2706_v28, %v7297_v5 }
 0x365   : > { %v2525_v58 = vpop.permute.xlu0 %2524  ;;  %v2532_v0 = vpop.permute.xlu1 %2531 }
 0x366   : > { %v2707_v18 = vmul.f32 %v2525_v58, %v2451_v8  ;;  %v2708_v22 = vmul.f32 %v2532_v0, %v2452_v26  ;;  %2809 = vrot.lane.b32.xlu0 %v7638_v45, %s5966_s14  ;;  %2811 = vrot.lane.b32.xlu1 %v7641_v4, %s5966_s14 }
 0x368   : > { %v7650_v11 = vadd.f32 %v2707_v18, %v7306_v30  ;;  %v7653_v5 = vadd.f32 %v2708_v22, %v7309_v35 }
 0x369   : > { %v2539_v53 = vpop.permute.xlu0 %2538  ;;  %v2546_v2 = vpop.permute.xlu1 %2545 }
 0x36a   : > { %v2709_v31 = vmul.f32 %v2539_v53, %v2453_v41  ;;  %v2710_v23 = vmul.f32 %v2546_v2, %v2454_v49  ;;  %2813 = vrot.lane.b32.xlu0 %v7650_v11, %s5966_s14  ;;  %2815 = vrot.lane.b32.xlu1 %v7653_v5, %s5966_s14 }
 0x36c   : > { %v7664_v30 = vadd.f32 %v2709_v31, %v7320_v36  ;;  %v7667_v35 = vadd.f32 %v2710_v23, %v7323_v39 }
 0x36d   : > { %v2553_v61 = vpop.permute.xlu0 %2552  ;;  %v2560_v59 = vpop.permute.xlu1 %2559 }
 0x36e   : > { %v2711_v6 = vmul.f32 %v2553_v61, %v2455_v32  ;;  %v2712_v46 = vmul.f32 %v2560_v59, %v2456_v55  ;;  %2817 = vrot.lane.b32.xlu0 %v7664_v30, %s5966_s14  ;;  %2819 = vrot.lane.b32.xlu1 %v7667_v35, %s5966_s14 }
 0x370   : > { %v7678_v36 = vadd.f32 %v2711_v6, %v7334_v42  ;;  %v7681_v39 = vadd.f32 %v2712_v46, %v7337_v44 }
 0x371   : > { %v2567_v17 = vpop.permute.xlu0 %2566  ;;  %v2574_v25 = vpop.permute.xlu1 %2573 }
 0x372   : > { %v2713_v28 = vmul.f32 %v2567_v17, %v2457_v34  ;;  %v2714_v8 = vmul.f32 %v2574_v25, %v2458_v43  ;;  %2821 = vrot.lane.b32.xlu0 %v7678_v36, %s5966_s14  ;;  %2823 = vrot.lane.b32.xlu1 %v7681_v39, %s5966_s14 }
 0x374   : > { %v7692_v42 = vadd.f32 %v2713_v28, %v7348_v48  ;;  %v7695_v44 = vadd.f32 %v2714_v8, %v7351_v50 }
 0x375   : > { %v2581_v26 = vpop.permute.xlu0 %2580  ;;  %v2588_v58 = vpop.permute.xlu1 %2587 }
 0x376   : > { %v2715_v0 = vmul.f32 %v2581_v26, %v2459_v29  ;;  %v2716_v18 = vmul.f32 %v2588_v58, %v2460_v38  ;;  %2825 = vrot.lane.b32.xlu0 %v7692_v42, %s5966_s14  ;;  %2827 = vrot.lane.b32.xlu1 %v7695_v44, %s5966_s14  ;;  %v2471_v26 = vsel %vm2444_vm4, 0.0, %v9784_v33  ;;  %v2472_v58 = vsel %vm2444_vm4, 0.0, %v9785_v47  ;;  %v9804_v33 = vld [vmem:[#allocation21_spill] sm:$0xff]  ;;  %v9805_v47 = vld [vmem:[#allocation30_spill] sm:$0xff] }
 0x378   : > { %v7706_v48 = vadd.f32 %v2715_v0, %v7362_v54  ;;  %v7709_v50 = vadd.f32 %v2716_v18, %v7365_v56 }
 0x379   : > { %v2595_v22 = vpop.permute.xlu0 %2594  ;;  %v2602_v41 = vpop.permute.xlu1 %2601 }
 0x37a   : > { %v2717_v49 = vmul.f32 %v2595_v22, %v2461_v13  ;;  %v2718_v53 = vmul.f32 %v2602_v41, %v2462_v63  ;;  %2829 = vrot.lane.b32.xlu0 %v7706_v48, %s5966_s14  ;;  %2831 = vrot.lane.b32.xlu1 %v7709_v50, %s5966_s14  ;;  %v9788_v41 = vld [vmem:[#allocation48_spill] sm:$0xff] }
 0x37c   : > { %v7720_v54 = vadd.f32 %v2717_v49, %v7376_v60  ;;  %v7723_v56 = vadd.f32 %v2718_v53, %v7379_v62  ;;  %v9790_v53 = vld [vmem:[#allocation24_spill] sm:$0xff] }
 0x37d   : > { %v2609_v2 = vpop.permute.xlu0 %2608  ;;  %v2616_v31 = vpop.permute.xlu1 %2615 }
 0x37e   : > { %v2719_v23 = vmul.f32 %v2609_v2, %v2463_v12  ;;  %v2720_v32 = vmul.f32 %v2616_v31, %v2464_v57  ;;  %2833 = vrot.lane.b32.xlu0 %v7720_v54, %s5966_s14  ;;  %2835 = vrot.lane.b32.xlu1 %v7723_v56, %s5966_s14  ;;  %v2473_v12 = vsel %vm2444_vm4, 0.0, %v9790_v53  ;;  %v9791_v57 = vld [vmem:[#allocation25_spill] sm:$0xff]  ;;  %v9809_v53 = vld [vmem:[#allocation35_spill] sm:$0xff] }
 0x37f   : > { %v2474_v2 = vsel %vm2444_vm4, 0.0, %v9791_v57  ;;  %v9810_v57 = vld [vmem:[#allocation36_spill] sm:$0xff] }
 0x380   : > { %v7734_v60 = vadd.f32 %v2719_v23, %v7390_v1  ;;  %v7737_v62 = vadd.f32 %v2720_v32, %v7393_v3 }
 0x381   : > { %v2623_v55 = vpop.permute.xlu0 %2622  ;;  %v2630_v61 = vpop.permute.xlu1 %2629 }
 0x382   : > { %v2721_v59 = vmul.f32 %v2623_v55, %v2465_v51  ;;  %v2722_v6 = vmul.f32 %v2630_v61, %v2466_v21  ;;  %2837 = vrot.lane.b32.xlu0 %v7734_v60, %s5966_s14  ;;  %2839 = vrot.lane.b32.xlu1 %v7737_v62, %s5966_s14  ;;  %v9792_v21 = vld [vmem:[#allocation29_spill] sm:$0xff]  ;;  %v9794_v61 = vld [vmem:[#allocation28_spill] sm:$0xff] }
 0x384   : > { %v7748_v1 = vadd.f32 %v2721_v59, %v7404_v7  ;;  %v7751_v3 = vadd.f32 %v2722_v6, %v7407_v9  ;;  %v9796_v6 = vld [vmem:[#allocation39_spill] sm:$0xff] }
 0x385   : > { %v2637_v46 = vpop.permute.xlu0 %2636  ;;  %v2644_v34 = vpop.permute.xlu1 %2643 }
 0x386   : > { %v2723_v43 = vmul.f32 %v2637_v46, %v2467_v27  ;;  %v2724_v17 = vmul.f32 %v2644_v34, %v2468_v19  ;;  %2841 = vrot.lane.b32.xlu0 %v7748_v1, %s5966_s14  ;;  %2843 = vrot.lane.b32.xlu1 %v7751_v3, %s5966_s14  ;;  %v2475_v27 = vsel %vm2444_vm4, 0.0, %v9796_v6  ;;  %v9797_v19 = vld [vmem:[#allocation40_spill] sm:$0xff] }
 0x387   : > { %v2476_v46 = vsel %vm2444_vm4, 0.0, %v9797_v19 }
 0x388   : > { %v7762_v7 = vadd.f32 %v2723_v43, %v7418_v14  ;;  %v7765_v9 = vadd.f32 %v2724_v17, %v7421_v16  ;;  %v9782_v16 = vld [vmem:[#allocation23_spill] sm:$0xff] }
 0x389   : > { %v2651_v25 = vpop.permute.xlu0 %2650  ;;  %v2658_v28 = vpop.permute.xlu1 %2657 }
 0x38a   : > { %v2725_v8 = vmul.f32 %v2651_v25, %v2469_v52  ;;  %v2726_v29 = vmul.f32 %v2658_v28, %v2470_v40  ;;  %2845 = vrot.lane.b32.xlu0 %v7762_v7, %s5966_s14  ;;  %2847 = vrot.lane.b32.xlu1 %v7765_v9, %s5966_s14  ;;  %v9798_v40 = vld [vmem:[#allocation26_spill] sm:$0xff]  ;;  %v9800_v28 = vld [vmem:[#allocation27_spill] sm:$0xff] }
 0x38b   : > { %v7819_v25 = vmul.f32 %v9798_v40, %v9798_v40 }
 0x38c   : > { %v7776_v14 = vadd.f32 %v2725_v8, %v7432_v24  ;;  %v7779_v38 = vadd.f32 %v2726_v29, %v9782_v16  ;;  %v9786_v24 = vld [vmem:[#allocation47_spill] sm:$0xff]  ;;  %v9802_v29 = vld [vmem:[#allocation45_spill] sm:$0xff] }
 0x38d   : > { %v2665_v0 = vpop.permute.xlu0 %2664  ;;  %v2672_v18 = vpop.permute.xlu1 %2671  ;;  %9799 = vst [vmem:[#allocation24_spill] sm:$0xff] %v7819_v25 }
 0x38e   : > { %9783 = vst [vmem:[#allocation23_spill] sm:$0xff] %v7779_v38  ;;  %v2727_v13 = vmul.f32 %v2665_v0, %v2471_v26  ;;  %v2728_v63 = vmul.f32 %v2672_v18, %v2472_v58  ;;  %2849 = vrot.lane.b32.xlu0 %v7776_v14, %s5966_s14  ;;  %2851 = vrot.lane.b32.xlu1 %v7779_v38, %s5966_s14  ;;  %v9806_v0 = vld [vmem:[#allocation32_spill] sm:$0xff] }
 0x38f   : > { %v2933_v26 = vrot.slane %v7819_v25, %v9804_v33  ;;  %v2940_v58 = vrot.slane %v7819_v25, %v9805_v47  ;;  %v2947_v18 = vrot.slane %v7819_v25, %v9806_v0 }
 0x390   : > { %v7790_v22 = vadd.f32 %v2727_v13, %v9786_v24  ;;  %v7793_v49 = vadd.f32 %v2728_v63, %v9788_v41  ;;  %v9807_v13 = vld [vmem:[#allocation33_spill] sm:$0xff]  ;;  %v9808_v24 = vld [vmem:[#allocation34_spill] sm:$0xff] }
 0x391   : > { %v2679_v31 = vpop.permute.xlu0 %2678  ;;  %v2686_v23 = vpop.permute.xlu1 %2685  ;;  %v2954_v63 = vrot.slane %v7819_v25, %v9807_v13  ;;  %v2961_v41 = vrot.slane %v7819_v25, %v9808_v24 }
 0x392   : > { %9787 = vst [vmem:[#allocation31_spill] sm:$0xff] %v7790_v22  ;;  %9789 = vst [vmem:[#allocation38_spill] sm:$0xff] %v7793_v49  ;;  %v2729_v32 = vmul.f32 %v2679_v31, %v2473_v12  ;;  %v2730_v51 = vmul.f32 %v2686_v23, %v2474_v2  ;;  %2853 = vrot.lane.b32.xlu0 %v7790_v22, %s5966_s14  ;;  %2855 = vrot.lane.b32.xlu1 %v7793_v49, %s5966_s14  ;;  %v9811_v31 = vld [vmem:[#allocation37_spill] sm:$0xff] }
 0x393   : > { %v2968_v12 = vrot.slane %v7819_v25, %v9809_v53  ;;  %v2975_v2 = vrot.slane %v7819_v25, %v9810_v57  ;;  %v2982_v23 = vrot.slane %v7819_v25, %v9811_v31 }
 0x394   : > { %v7804_v55 = vadd.f32 %v2729_v32, %v9792_v21  ;;  %v7807_v59 = vadd.f32 %v2730_v51, %v9794_v61  ;;  %v9812_v32 = vld [vmem:[#allocation46_spill] sm:$0xff] }
 0x395   : > { %v2693_v34 = vpop.permute.xlu0 %2692  ;;  %v2700_v43 = vpop.permute.xlu1 %2699  ;;  %v7849_v51 = vmul.f32 %v9812_v32, %v9812_v32 }
 0x396   : > { %9793 = vst [vmem:[#allocation47_spill] sm:$0xff] %v7804_v55  ;;  %9795 = vst [vmem:[#allocation48_spill] sm:$0xff] %v7807_v59  ;;  %v2731_v17 = vmul.f32 %v2693_v34, %v2475_v27  ;;  %v2732_v52 = vmul.f32 %v2700_v43, %v2476_v46  ;;  %2857 = vrot.lane.b32.xlu0 %v7804_v55, %s5966_s14  ;;  %2859 = vrot.lane.b32.xlu1 %v7807_v59, %s5966_s14 }
 0x397   : > { %9813 = vst [vmem:[#allocation28_spill] sm:$0xff] %v7849_v51  ;;  %v2989_v21 = vrot.slane %v7849_v51, %v9804_v33  ;;  %v2996_v61 = vrot.slane %v7849_v51, %v9805_v47  ;;  %v3003_v6 = vrot.slane %v7849_v51, %v9806_v0  ;;  %v3010_v27 = vrot.slane %v7849_v51, %v9807_v13 }
 0x398   : > { %v7822_v8 = vadd.f32 %v2731_v17, %v9800_v28  ;;  %v7825_v16 = vadd.f32 %v2732_v52, %v9802_v29  ;;  %v3017_v19 = vrot.slane %v7849_v51, %v9808_v24  ;;  %v3024_v46 = vrot.slane %v7849_v51, %v9809_v53  ;;  %v9814_v17 = vld [vmem:[#allocation49_spill] sm:$0xff] }
 0x399   : > { %v3031_v34 = vrot.slane %v7849_v51, %v9810_v57  ;;  %v3038_v43 = vrot.slane %v7849_v51, %v9811_v31  ;;  %v7869_v52 = vmul.f32 %v9814_v17, %v9814_v17 }
 0x39a   : > { %9801 = vst [vmem:[#allocation25_spill] sm:$0xff] %v7822_v8  ;;  %9803 = vst [vmem:[#allocation29_spill] sm:$0xff] %v7825_v16  ;;  %2861 = vrot.lane.b32.xlu0 %v7822_v8, %s5966_s14  ;;  %2863 = vrot.lane.b32.xlu1 %v7825_v16, %s5966_s14 }
 0x39b   : > { %9815 = vst [vmem:[#allocation39_spill] sm:$0xff] %v7869_v52  ;;  %v3045_v40 = vrot.slane %v7869_v52, %v9804_v33  ;;  %v3052_v28 = vrot.slane %v7869_v52, %v9805_v47  ;;  %v3059_v29 = vrot.slane %v7869_v52, %v9806_v0 }
 0x39e   : > { %2935 = vbcast.lane.b32.xlu0 %v2933_v26, 256  ;;  %2942 = vbcast.lane.b32.xlu1 %v2940_v58, 256  ;;  %v3066_v26 = vrot.slane %v7869_v52, %v9807_v13  ;;  %v3073_v58 = vrot.slane %v7869_v52, %v9808_v24 }
 0x3a2   : > { %2949 = vbcast.lane.b32.xlu0 %v2947_v18, 256  ;;  %2956 = vbcast.lane.b32.xlu1 %v2954_v63, 256  ;;  %v3080_v18 = vrot.slane %v7869_v52, %v9809_v53  ;;  %v3087_v63 = vrot.slane %v7869_v52, %v9810_v57 }
 0x3a6   : > { %2963 = vbcast.lane.b32.xlu0 %v2961_v41, 256  ;;  %2970 = vbcast.lane.b32.xlu1 %v2968_v12, 256  ;;  %v3094_v41 = vrot.slane %v7869_v52, %v9811_v31  ;;  %v9816_v12 = vld [vmem:[#allocation50_spill] sm:$0xff] }
 0x3aa   : > { %2977 = vbcast.lane.b32.xlu0 %v2975_v2, 256  ;;  %2984 = vbcast.lane.b32.xlu1 %v2982_v23, 256  ;;  %v7889_v2 = vmul.f32 %v9816_v12, %v9816_v12 }
 0x3ac   : > { %9817 = vst [vmem:[#allocation40_spill] sm:$0xff] %v7889_v2  ;;  %v3101_v23 = vrot.slane %v7889_v2, %v9804_v33  ;;  %v3108_v32 = vrot.slane %v7889_v2, %v9805_v47  ;;  %v3143_v17 = vrot.slane %v7889_v2, %v9810_v57 }
 0x3ae   : > { %2991 = vbcast.lane.b32.xlu0 %v2989_v21, 256  ;;  %2998 = vbcast.lane.b32.xlu1 %v2996_v61, 256  ;;  %v3115_v21 = vrot.slane %v7889_v2, %v9806_v0  ;;  %v3122_v61 = vrot.slane %v7889_v2, %v9807_v13 }
 0x3b2   : > { %3005 = vbcast.lane.b32.xlu0 %v3003_v6, 256  ;;  %3012 = vbcast.lane.b32.xlu1 %v3010_v27, 256 }
 0x3b6   : > { %3019 = vbcast.lane.b32.xlu0 %v3017_v19, 256  ;;  %3026 = vbcast.lane.b32.xlu1 %v3024_v46, 256  ;;  %v3129_v19 = vrot.slane %v7889_v2, %v9808_v24  ;;  %v3136_v46 = vrot.slane %v7889_v2, %v9809_v53 }
 0x3ba   : > { %3033 = vbcast.lane.b32.xlu0 %v3031_v34, 256  ;;  %3040 = vbcast.lane.b32.xlu1 %v3038_v43, 256 }
 0x3be   : > { %3047 = vbcast.lane.b32.xlu0 %v3045_v40, 256  ;;  %3054 = vbcast.lane.b32.xlu1 %v3052_v28, 256  ;;  %v3150_v40 = vrot.slane %v7889_v2, %v9811_v31 }
 0x3c2   : > { %3061 = vbcast.lane.b32.xlu0 %v3059_v29, 256  ;;  %3068 = vbcast.lane.b32.xlu1 %v3066_v26, 256 }
 0x3c6   : > { %3075 = vbcast.lane.b32.xlu0 %v3073_v58, 256  ;;  %3082 = vbcast.lane.b32.xlu1 %v3080_v18, 256 }
 0x3ca   : > { %3089 = vbcast.lane.b32.xlu0 %v3087_v63, 256  ;;  %3096 = vbcast.lane.b32.xlu1 %v3094_v41, 256 }
 0x3ce   : > { %3103 = vbcast.lane.b32.xlu0 %v3101_v23, 256  ;;  %3110 = vbcast.lane.b32.xlu1 %v3108_v32, 256 }
 0x3d0   : > { %v2802_v6 = vpop.permute.xlu0 %2801  ;;  %v2804_v27 = vpop.permute.xlu1 %2803 }
 0x3d1   : > { %v2898_v8 = vsel %vm2897_vm5, 0.0, %v2802_v6  ;;  %v2899_v25 = vsel %vm2897_vm5, 0.0, %v2804_v27 }
 0x3d2   : > { %3117 = vbcast.lane.b32.xlu0 %v3115_v21, 256  ;;  %3124 = vbcast.lane.b32.xlu1 %v3122_v61, 256 }
 0x3d4   : > { %v2806_v34 = vpop.permute.xlu0 %2805  ;;  %v2808_v43 = vpop.permute.xlu1 %2807 }
 0x3d6   : > { %3131 = vbcast.lane.b32.xlu0 %v3129_v19, 256  ;;  %3138 = vbcast.lane.b32.xlu1 %v3136_v46, 256 }
 0x3d8   : > { %v2810_v28 = vpop.permute.xlu0 %2809  ;;  %v2812_v29 = vpop.permute.xlu1 %2811 }
 0x3da   : > { %3145 = vbcast.lane.b32.xlu0 %v3143_v17, 256  ;;  %3152 = vbcast.lane.b32.xlu1 %v3150_v40, 256 }
 0x3dc   : > { %v2814_v26 = vpop.permute.xlu0 %2813  ;;  %v2816_v58 = vpop.permute.xlu1 %2815 }
 0x3e0   : > { %v7907_v18 = vpop.permute.xlu0 %2817  ;;  %v7909_v63 = vpop.permute.xlu1 %2819 }
 0x3e4   : > { %v7911_v41 = vpop.permute.xlu0 %2821  ;;  %v7913_v12 = vpop.permute.xlu1 %2823 }
 0x3e8   : > { %v7915_v23 = vpop.permute.xlu0 %2825  ;;  %v7917_v32 = vpop.permute.xlu1 %2827 }
 0x3ec   : > { %v7919_v21 = vpop.permute.xlu0 %2829  ;;  %v7921_v61 = vpop.permute.xlu1 %2831 }
 0x3f0   : > { %v7923_v19 = vpop.permute.xlu0 %2833  ;;  %v7925_v46 = vpop.permute.xlu1 %2835 }
 0x3f4   : > { %v7927_v17 = vpop.permute.xlu0 %2837  ;;  %v7929_v40 = vpop.permute.xlu1 %2839 }
 0x3f8   : > { %v7931_v2 = vpop.permute.xlu0 %2841  ;;  %v7933_v52 = vpop.permute.xlu1 %2843 }
 0x3fc   : > { %v7935_v51 = vpop.permute.xlu0 %2845  ;;  %v7937_v31 = vpop.permute.xlu1 %2847 }
 0x400   : > { %v7939_v57 = vpop.permute.xlu0 %2849  ;;  %v7941_v53 = vpop.permute.xlu1 %2851 }
 0x404   : > { %v7943_v24 = vpop.permute.xlu0 %2853  ;;  %v7945_v13 = vpop.permute.xlu1 %2855 }
 0x405   : > { %9818 = vst [vmem:[#allocation26_spill] sm:$0xff] %v7943_v24  ;;  %9819 = vst [vmem:[#allocation27_spill] sm:$0xff] %v7945_v13 }
 0x408   : > { %v7947_v0 = vpop.permute.xlu0 %2857  ;;  %v7949_v47 = vpop.permute.xlu1 %2859 }
 0x409   : > { %9820 = vst [vmem:[#allocation45_spill] sm:$0xff] %v7947_v0  ;;  %9821 = vst [vmem:[#allocation46_spill] sm:$0xff] %v7949_v47  ;;  %v2900_v47 = vsel %vm2897_vm5, 0.0, %v2806_v34  ;;  %v2906_v34 = vsel %vm2897_vm5, 0.0, %v7907_v18  ;;  %v2908_v18 = vsel %vm2897_vm5, 0.0, %v7911_v41  ;;  %v2910_v41 = vsel %vm2897_vm5, 0.0, %v7915_v23 }
 0x40a   : > { %v2912_v23 = vsel %vm2897_vm5, 0.0, %v7919_v21  ;;  %v2914_v21 = vsel %vm2897_vm5, 0.0, %v7923_v19  ;;  %v2916_v19 = vsel %vm2897_vm5, 0.0, %v7927_v17  ;;  %v2918_v17 = vsel %vm2897_vm5, 0.0, %v7931_v2 }
 0x40b   : > { %v2920_v2 = vsel %vm2897_vm5, 0.0, %v7935_v51  ;;  %v2922_v51 = vsel %vm2897_vm5, 0.0, %v7939_v57 }
 0x40c   : > { %v7951_v33 = vpop.permute.xlu0 %2861  ;;  %v7953_v16 = vpop.permute.xlu1 %2863  ;;  %v9826_v57 = vld [vmem:[#allocation26_spill] sm:$0xff] }
 0x40d   : > { %9822 = vst [vmem:[#allocation49_spill] sm:$0xff] %v7951_v33  ;;  %9823 = vst [vmem:[#allocation50_spill] sm:$0xff] %v7953_v16  ;;  %v2901_v33 = vsel %vm2897_vm5, 0.0, %v2808_v43  ;;  %v2907_v43 = vsel %vm2897_vm5, 0.0, %v7909_v63  ;;  %v2909_v63 = vsel %vm2897_vm5, 0.0, %v7913_v12  ;;  %v2911_v12 = vsel %vm2897_vm5, 0.0, %v7917_v32 }
 0x40e   : > { %v2913_v32 = vsel %vm2897_vm5, 0.0, %v7921_v61  ;;  %v2915_v61 = vsel %vm2897_vm5, 0.0, %v7925_v46  ;;  %v2917_v46 = vsel %vm2897_vm5, 0.0, %v7929_v40  ;;  %v2919_v40 = vsel %vm2897_vm5, 0.0, %v7933_v52 }
 0x40f   : > { %v2921_v52 = vsel %vm2897_vm5, 0.0, %v7937_v31  ;;  %v2923_v31 = vsel %vm2897_vm5, 0.0, %v7941_v53  ;;  %v9827_v53 = vld [vmem:[#allocation27_spill] sm:$0xff] }
 0x410   : > { %v2936_v59 = vpop.permute.xlu0 %2935  ;;  %v2943_v55 = vpop.permute.xlu1 %2942 }
 0x411   : > { %v3154_v49 = vmul.f32 %v2936_v59, %v2898_v8  ;;  %v3155_v22 = vmul.f32 %v2943_v55, %v2899_v25 }
 0x413   : > { %v7958_v24 = vadd.f32 %v3154_v49, %v7614_v20  ;;  %v7961_v0 = vadd.f32 %v3155_v22, %v7617_v10  ;;  %v2902_v22 = vsel %vm2897_vm5, 0.0, %v2810_v28  ;;  %v2903_v49 = vsel %vm2897_vm5, 0.0, %v2812_v29 }
 0x414   : > { %v2950_v16 = vpop.permute.xlu0 %2949  ;;  %v2957_v13 = vpop.permute.xlu1 %2956 }
 0x415   : > { %v3156_v38 = vmul.f32 %v2950_v16, %v2900_v47  ;;  %v3157_v6 = vmul.f32 %v2957_v13, %v2901_v33  ;;  %3254 = vrot.lane.b32.xlu0 %v7958_v24, %s5967_s15  ;;  %3256 = vrot.lane.b32.xlu1 %v7961_v0, %s5967_s15  ;;  %v2905_v16 = vsel %vm2897_vm5, 0.0, %v2816_v58 }
 0x417   : > { %v7970_v20 = vadd.f32 %v3156_v38, %v7626_v37  ;;  %v7973_v10 = vadd.f32 %v3157_v6, %v7629_v15  ;;  %v2904_v38 = vsel %vm2897_vm5, 0.0, %v2814_v26 }
 0x418   : > { %v2964_v55 = vpop.permute.xlu0 %2963  ;;  %v2971_v59 = vpop.permute.xlu1 %2970 }
 0x419   : > { %v3158_v25 = vmul.f32 %v2964_v55, %v2902_v22  ;;  %v3159_v8 = vmul.f32 %v2971_v59, %v2903_v49  ;;  %3258 = vrot.lane.b32.xlu0 %v7970_v20, %s5967_s15  ;;  %3260 = vrot.lane.b32.xlu1 %v7973_v10, %s5967_s15 }
 0x41b   : > { %v7982_v37 = vadd.f32 %v3158_v25, %v7638_v45  ;;  %v7985_v15 = vadd.f32 %v3159_v8, %v7641_v4 }
 0x41c   : > { %v2978_v33 = vpop.permute.xlu0 %2977  ;;  %v2985_v47 = vpop.permute.xlu1 %2984 }
 0x41d   : > { %v3160_v13 = vmul.f32 %v2978_v33, %v2904_v38  ;;  %v3161_v27 = vmul.f32 %v2985_v47, %v2905_v16  ;;  %3262 = vrot.lane.b32.xlu0 %v7982_v37, %s5967_s15  ;;  %3264 = vrot.lane.b32.xlu1 %v7985_v15, %s5967_s15 }
 0x41f   : > { %v7994_v45 = vadd.f32 %v3160_v13, %v7650_v11  ;;  %v7997_v4 = vadd.f32 %v3161_v27, %v7653_v5 }
 0x420   : > { %v2992_v28 = vpop.permute.xlu0 %2991  ;;  %v2999_v29 = vpop.permute.xlu1 %2998 }
 0x421   : > { %v3162_v26 = vmul.f32 %v2992_v28, %v2906_v34  ;;  %v3163_v58 = vmul.f32 %v2999_v29, %v2907_v43  ;;  %3266 = vrot.lane.b32.xlu0 %v7994_v45, %s5967_s15  ;;  %3268 = vrot.lane.b32.xlu1 %v7997_v4, %s5967_s15 }
 0x423   : > { %v8008_v11 = vadd.f32 %v3162_v26, %v7664_v30  ;;  %v8011_v5 = vadd.f32 %v3163_v58, %v7667_v35 }
 0x424   : > { %v3006_v6 = vpop.permute.xlu0 %3005  ;;  %v3013_v22 = vpop.permute.xlu1 %3012 }
 0x425   : > { %v3164_v49 = vmul.f32 %v3006_v6, %v2908_v18  ;;  %v3165_v55 = vmul.f32 %v3013_v22, %v2909_v63  ;;  %3270 = vrot.lane.b32.xlu0 %v8008_v11, %s5967_s15  ;;  %3272 = vrot.lane.b32.xlu1 %v8011_v5, %s5967_s15 }
 0x427   : > { %v8022_v30 = vadd.f32 %v3164_v49, %v7678_v36  ;;  %v8025_v35 = vadd.f32 %v3165_v55, %v7681_v39 }
 0x428   : > { %v3020_v59 = vpop.permute.xlu0 %3019  ;;  %v3027_v25 = vpop.permute.xlu1 %3026 }
 0x429   : > { %v3166_v8 = vmul.f32 %v3020_v59, %v2910_v41  ;;  %v3167_v38 = vmul.f32 %v3027_v25, %v2911_v12  ;;  %3274 = vrot.lane.b32.xlu0 %v8022_v30, %s5967_s15  ;;  %3276 = vrot.lane.b32.xlu1 %v8025_v35, %s5967_s15 }
 0x42b   : > { %v8036_v36 = vadd.f32 %v3166_v8, %v7692_v42  ;;  %v8039_v39 = vadd.f32 %v3167_v38, %v7695_v44 }
 0x42c   : > { %v3034_v16 = vpop.permute.xlu0 %3033  ;;  %v3041_v33 = vpop.permute.xlu1 %3040 }
 0x42d   : > { %v3168_v47 = vmul.f32 %v3034_v16, %v2912_v23  ;;  %v3169_v13 = vmul.f32 %v3041_v33, %v2913_v32  ;;  %3278 = vrot.lane.b32.xlu0 %v8036_v36, %s5967_s15  ;;  %3280 = vrot.lane.b32.xlu1 %v8039_v39, %s5967_s15  ;;  %v2924_v16 = vsel %vm2897_vm5, 0.0, %v9826_v57  ;;  %v2925_v33 = vsel %vm2897_vm5, 0.0, %v9827_v53  ;;  %v9846_v57 = vld [vmem:[#allocation21_spill] sm:$0xff]  ;;  %v9847_v53 = vld [vmem:[#allocation30_spill] sm:$0xff] }
 0x42f   : > { %v8050_v42 = vadd.f32 %v3168_v47, %v7706_v48  ;;  %v8053_v44 = vadd.f32 %v3169_v13, %v7709_v50 }
 0x430   : > { %v3048_v27 = vpop.permute.xlu0 %3047  ;;  %v3055_v34 = vpop.permute.xlu1 %3054 }
 0x431   : > { %v3170_v43 = vmul.f32 %v3048_v27, %v2914_v21  ;;  %v3171_v28 = vmul.f32 %v3055_v34, %v2915_v61  ;;  %3282 = vrot.lane.b32.xlu0 %v8050_v42, %s5967_s15  ;;  %3284 = vrot.lane.b32.xlu1 %v8053_v44, %s5967_s15  ;;  %v9830_v34 = vld [vmem:[#allocation38_spill] sm:$0xff] }
 0x433   : > { %v8064_v48 = vadd.f32 %v3170_v43, %v7720_v54  ;;  %v8067_v50 = vadd.f32 %v3171_v28, %v7723_v56  ;;  %v9832_v28 = vld [vmem:[#allocation45_spill] sm:$0xff] }
 0x434   : > { %v3062_v29 = vpop.permute.xlu0 %3061  ;;  %v3069_v26 = vpop.permute.xlu1 %3068 }
 0x435   : > { %v3172_v58 = vmul.f32 %v3062_v29, %v2916_v19  ;;  %v3173_v18 = vmul.f32 %v3069_v26, %v2917_v46  ;;  %3286 = vrot.lane.b32.xlu0 %v8064_v48, %s5967_s15  ;;  %3288 = vrot.lane.b32.xlu1 %v8067_v50, %s5967_s15  ;;  %v2926_v19 = vsel %vm2897_vm5, 0.0, %v9832_v28  ;;  %v9833_v46 = vld [vmem:[#allocation46_spill] sm:$0xff]  ;;  %v9851_v28 = vld [vmem:[#allocation35_spill] sm:$0xff] }
 0x436   : > { %v2927_v29 = vsel %vm2897_vm5, 0.0, %v9833_v46  ;;  %v9852_v46 = vld [vmem:[#allocation36_spill] sm:$0xff] }
 0x437   : > { %v8078_v54 = vadd.f32 %v3172_v58, %v7734_v60  ;;  %v8081_v56 = vadd.f32 %v3173_v18, %v7737_v62 }
 0x438   : > { %v3076_v63 = vpop.permute.xlu0 %3075  ;;  %v3083_v6 = vpop.permute.xlu1 %3082 }
 0x439   : > { %v3174_v22 = vmul.f32 %v3076_v63, %v2918_v17  ;;  %v3175_v49 = vmul.f32 %v3083_v6, %v2919_v40  ;;  %3290 = vrot.lane.b32.xlu0 %v8078_v54, %s5967_s15  ;;  %3292 = vrot.lane.b32.xlu1 %v8081_v56, %s5967_s15  ;;  %v9834_v40 = vld [vmem:[#allocation47_spill] sm:$0xff]  ;;  %v9836_v6 = vld [vmem:[#allocation48_spill] sm:$0xff] }
 0x43b   : > { %v8092_v60 = vadd.f32 %v3174_v22, %v7748_v1  ;;  %v8095_v62 = vadd.f32 %v3175_v49, %v7751_v3  ;;  %v9838_v49 = vld [vmem:[#allocation49_spill] sm:$0xff] }
 0x43c   : > { %v3090_v55 = vpop.permute.xlu0 %3089  ;;  %v3097_v41 = vpop.permute.xlu1 %3096 }
 0x43d   : > { %v3176_v12 = vmul.f32 %v3090_v55, %v2920_v2  ;;  %v3177_v59 = vmul.f32 %v3097_v41, %v2921_v52  ;;  %3294 = vrot.lane.b32.xlu0 %v8092_v60, %s5967_s15  ;;  %3296 = vrot.lane.b32.xlu1 %v8095_v62, %s5967_s15  ;;  %v2928_v2 = vsel %vm2897_vm5, 0.0, %v9838_v49  ;;  %v9839_v52 = vld [vmem:[#allocation50_spill] sm:$0xff] }
 0x43e   : > { %v2929_v55 = vsel %vm2897_vm5, 0.0, %v9839_v52 }
 0x43f   : > { %v8106_v1 = vadd.f32 %v3176_v12, %v7762_v7  ;;  %v8109_v3 = vadd.f32 %v3177_v59, %v7765_v9  ;;  %v9824_v9 = vld [vmem:[#allocation23_spill] sm:$0xff] }
 0x440   : > { %v3104_v25 = vpop.permute.xlu0 %3103  ;;  %v3111_v8 = vpop.permute.xlu1 %3110 }
 0x441   : > { %v3178_v38 = vmul.f32 %v3104_v25, %v2922_v51  ;;  %v3179_v23 = vmul.f32 %v3111_v8, %v2923_v31  ;;  %3298 = vrot.lane.b32.xlu0 %v8106_v1, %s5967_s15  ;;  %3300 = vrot.lane.b32.xlu1 %v8109_v3, %s5967_s15  ;;  %v9840_v31 = vld [vmem:[#allocation24_spill] sm:$0xff]  ;;  %v9842_v8 = vld [vmem:[#allocation25_spill] sm:$0xff] }
 0x442   : > { %v8163_v25 = vmul.f32 %v9840_v31, %v9840_v31 }
 0x443   : > { %v8120_v7 = vadd.f32 %v3178_v38, %v7776_v14  ;;  %v8123_v32 = vadd.f32 %v3179_v23, %v9824_v9  ;;  %v9828_v14 = vld [vmem:[#allocation31_spill] sm:$0xff]  ;;  %v9844_v23 = vld [vmem:[#allocation29_spill] sm:$0xff] }
 0x444   : > { %v3118_v47 = vpop.permute.xlu0 %3117  ;;  %v3125_v13 = vpop.permute.xlu1 %3124  ;;  %9841 = vst [vmem:[#allocation45_spill] sm:$0xff] %v8163_v25 }
 0x445   : > { %9825 = vst [vmem:[#allocation23_spill] sm:$0xff] %v8123_v32  ;;  %v3180_v21 = vmul.f32 %v3118_v47, %v2924_v16  ;;  %v3181_v61 = vmul.f32 %v3125_v13, %v2925_v33  ;;  %3302 = vrot.lane.b32.xlu0 %v8120_v7, %s5967_s15  ;;  %3304 = vrot.lane.b32.xlu1 %v8123_v32, %s5967_s15  ;;  %v9848_v47 = vld [vmem:[#allocation32_spill] sm:$0xff] }
 0x446   : > { %v3386_v16 = vrot.slane %v8163_v25, %v9846_v57  ;;  %v3393_v33 = vrot.slane %v8163_v25, %v9847_v53  ;;  %v3400_v13 = vrot.slane %v8163_v25, %v9848_v47 }
 0x447   : > { %v8134_v27 = vadd.f32 %v3180_v21, %v9828_v14  ;;  %v8137_v43 = vadd.f32 %v3181_v61, %v9830_v34  ;;  %v9849_v21 = vld [vmem:[#allocation33_spill] sm:$0xff]  ;;  %v9850_v14 = vld [vmem:[#allocation34_spill] sm:$0xff] }
 0x448   : > { %v3132_v26 = vpop.permute.xlu0 %3131  ;;  %v3139_v58 = vpop.permute.xlu1 %3138  ;;  %v3407_v61 = vrot.slane %v8163_v25, %v9849_v21  ;;  %v3414_v34 = vrot.slane %v8163_v25, %v9850_v14 }
 0x449   : > { %9829 = vst [vmem:[#allocation26_spill] sm:$0xff] %v8134_v27  ;;  %9831 = vst [vmem:[#allocation27_spill] sm:$0xff] %v8137_v43  ;;  %v3182_v18 = vmul.f32 %v3132_v26, %v2926_v19  ;;  %v3183_v17 = vmul.f32 %v3139_v58, %v2927_v29  ;;  %3306 = vrot.lane.b32.xlu0 %v8134_v27, %s5967_s15  ;;  %3308 = vrot.lane.b32.xlu1 %v8137_v43, %s5967_s15  ;;  %v9853_v26 = vld [vmem:[#allocation37_spill] sm:$0xff] }
 0x44a   : > { %v3421_v19 = vrot.slane %v8163_v25, %v9851_v28  ;;  %v3428_v29 = vrot.slane %v8163_v25, %v9852_v46  ;;  %v3435_v58 = vrot.slane %v8163_v25, %v9853_v26 }
 0x44b   : > { %v8148_v63 = vadd.f32 %v3182_v18, %v9834_v40  ;;  %v8151_v22 = vadd.f32 %v3183_v17, %v9836_v6  ;;  %v9854_v18 = vld [vmem:[#allocation28_spill] sm:$0xff] }
 0x44c   : > { %v3146_v41 = vpop.permute.xlu0 %3145  ;;  %v3153_v12 = vpop.permute.xlu1 %3152  ;;  %v8193_v17 = vmul.f32 %v9854_v18, %v9854_v18 }
 0x44d   : > { %9835 = vst [vmem:[#allocation31_spill] sm:$0xff] %v8148_v63  ;;  %9837 = vst [vmem:[#allocation38_spill] sm:$0xff] %v8151_v22  ;;  %v3184_v59 = vmul.f32 %v3146_v41, %v2928_v2  ;;  %v3185_v51 = vmul.f32 %v3153_v12, %v2929_v55  ;;  %3310 = vrot.lane.b32.xlu0 %v8148_v63, %s5967_s15  ;;  %3312 = vrot.lane.b32.xlu1 %v8151_v22, %s5967_s15 }
 0x44e   : > { %9855 = vst [vmem:[#allocation48_spill] sm:$0xff] %v8193_v17  ;;  %v3442_v40 = vrot.slane %v8193_v17, %v9846_v57  ;;  %v3449_v6 = vrot.slane %v8193_v17, %v9847_v53  ;;  %v3456_v49 = vrot.slane %v8193_v17, %v9848_v47  ;;  %v3463_v2 = vrot.slane %v8193_v17, %v9849_v21 }
 0x44f   : > { %v8166_v38 = vadd.f32 %v3184_v59, %v9842_v8  ;;  %v8169_v9 = vadd.f32 %v3185_v51, %v9844_v23  ;;  %v3470_v52 = vrot.slane %v8193_v17, %v9850_v14  ;;  %v3477_v55 = vrot.slane %v8193_v17, %v9851_v28  ;;  %v9856_v59 = vld [vmem:[#allocation39_spill] sm:$0xff] }
 0x450   : > { %v3484_v41 = vrot.slane %v8193_v17, %v9852_v46  ;;  %v3491_v12 = vrot.slane %v8193_v17, %v9853_v26  ;;  %v8213_v51 = vmul.f32 %v9856_v59, %v9856_v59 }
 0x451   : > { %9843 = vst [vmem:[#allocation46_spill] sm:$0xff] %v8166_v38  ;;  %9845 = vst [vmem:[#allocation47_spill] sm:$0xff] %v8169_v9  ;;  %3314 = vrot.lane.b32.xlu0 %v8166_v38, %s5967_s15  ;;  %3316 = vrot.lane.b32.xlu1 %v8169_v9, %s5967_s15 }
 0x452   : > { %9857 = vst [vmem:[#allocation49_spill] sm:$0xff] %v8213_v51  ;;  %v3498_v31 = vrot.slane %v8213_v51, %v9846_v57  ;;  %v3505_v8 = vrot.slane %v8213_v51, %v9847_v53  ;;  %v3512_v23 = vrot.slane %v8213_v51, %v9848_v47 }
 0x455   : > { %3388 = vbcast.lane.b32.xlu0 %v3386_v16, 256  ;;  %3395 = vbcast.lane.b32.xlu1 %v3393_v33, 256  ;;  %v3519_v16 = vrot.slane %v8213_v51, %v9849_v21  ;;  %v3526_v33 = vrot.slane %v8213_v51, %v9850_v14 }
 0x459   : > { %3402 = vbcast.lane.b32.xlu0 %v3400_v13, 256  ;;  %3409 = vbcast.lane.b32.xlu1 %v3407_v61, 256  ;;  %v3533_v13 = vrot.slane %v8213_v51, %v9851_v28  ;;  %v3540_v61 = vrot.slane %v8213_v51, %v9852_v46 }
 0x45d   : > { %3416 = vbcast.lane.b32.xlu0 %v3414_v34, 256  ;;  %3423 = vbcast.lane.b32.xlu1 %v3421_v19, 256  ;;  %v3547_v34 = vrot.slane %v8213_v51, %v9853_v26  ;;  %v9858_v19 = vld [vmem:[#allocation40_spill] sm:$0xff] }
 0x461   : > { %3430 = vbcast.lane.b32.xlu0 %v3428_v29, 256  ;;  %3437 = vbcast.lane.b32.xlu1 %v3435_v58, 256  ;;  %v8233_v29 = vmul.f32 %v9858_v19, %v9858_v19 }
 0x463   : > { %9859 = vst [vmem:[#allocation50_spill] sm:$0xff] %v8233_v29  ;;  %v3554_v58 = vrot.slane %v8233_v29, %v9846_v57  ;;  %v3561_v18 = vrot.slane %v8233_v29, %v9847_v53  ;;  %v3596_v59 = vrot.slane %v8233_v29, %v9852_v46 }
 0x465   : > { %3444 = vbcast.lane.b32.xlu0 %v3442_v40, 256  ;;  %3451 = vbcast.lane.b32.xlu1 %v3449_v6, 256  ;;  %v3568_v40 = vrot.slane %v8233_v29, %v9848_v47  ;;  %v3575_v6 = vrot.slane %v8233_v29, %v9849_v21 }
 0x469   : > { %3458 = vbcast.lane.b32.xlu0 %v3456_v49, 256  ;;  %3465 = vbcast.lane.b32.xlu1 %v3463_v2, 256 }
 0x46d   : > { %3472 = vbcast.lane.b32.xlu0 %v3470_v52, 256  ;;  %3479 = vbcast.lane.b32.xlu1 %v3477_v55, 256  ;;  %v3582_v52 = vrot.slane %v8233_v29, %v9850_v14  ;;  %v3589_v55 = vrot.slane %v8233_v29, %v9851_v28 }
 0x471   : > { %3486 = vbcast.lane.b32.xlu0 %v3484_v41, 256  ;;  %3493 = vbcast.lane.b32.xlu1 %v3491_v12, 256 }
 0x475   : > { %3500 = vbcast.lane.b32.xlu0 %v3498_v31, 256  ;;  %3507 = vbcast.lane.b32.xlu1 %v3505_v8, 256  ;;  %v3603_v31 = vrot.slane %v8233_v29, %v9853_v26 }
 0x479   : > { %3514 = vbcast.lane.b32.xlu0 %v3512_v23, 256  ;;  %3521 = vbcast.lane.b32.xlu1 %v3519_v16, 256 }
 0x47d   : > { %3528 = vbcast.lane.b32.xlu0 %v3526_v33, 256  ;;  %3535 = vbcast.lane.b32.xlu1 %v3533_v13, 256 }
 0x481   : > { %3542 = vbcast.lane.b32.xlu0 %v3540_v61, 256  ;;  %3549 = vbcast.lane.b32.xlu1 %v3547_v34, 256 }
 0x485   : > { %3556 = vbcast.lane.b32.xlu0 %v3554_v58, 256  ;;  %3563 = vbcast.lane.b32.xlu1 %v3561_v18, 256 }
 0x487   : > { %v3255_v49 = vpop.permute.xlu0 %3254  ;;  %v3257_v2 = vpop.permute.xlu1 %3256 }
 0x488   : > { %v3351_v38 = vsel %vm3350_vm6, 0.0, %v3255_v49  ;;  %v3352_v25 = vsel %vm3350_vm6, 0.0, %v3257_v2 }
 0x489   : > { %3570 = vbcast.lane.b32.xlu0 %v3568_v40, 256  ;;  %3577 = vbcast.lane.b32.xlu1 %v3575_v6, 256 }
 0x48b   : > { %v3259_v41 = vpop.permute.xlu0 %3258  ;;  %v3261_v12 = vpop.permute.xlu1 %3260 }
 0x48d   : > { %3584 = vbcast.lane.b32.xlu0 %v3582_v52, 256  ;;  %3591 = vbcast.lane.b32.xlu1 %v3589_v55, 256 }
 0x48f   : > { %v3263_v8 = vpop.permute.xlu0 %3262  ;;  %v3265_v23 = vpop.permute.xlu1 %3264 }
 0x491   : > { %3598 = vbcast.lane.b32.xlu0 %v3596_v59, 256  ;;  %3605 = vbcast.lane.b32.xlu1 %v3603_v31, 256 }
 0x493   : > { %v3267_v16 = vpop.permute.xlu0 %3266  ;;  %v3269_v33 = vpop.permute.xlu1 %3268 }
 0x497   : > { %v8251_v13 = vpop.permute.xlu0 %3270  ;;  %v8253_v61 = vpop.permute.xlu1 %3272 }
 0x49b   : > { %v8255_v34 = vpop.permute.xlu0 %3274  ;;  %v8257_v19 = vpop.permute.xlu1 %3276 }
 0x49f   : > { %v8259_v58 = vpop.permute.xlu0 %3278  ;;  %v8261_v18 = vpop.permute.xlu1 %3280 }
 0x4a3   : > { %v8263_v40 = vpop.permute.xlu0 %3282  ;;  %v8265_v6 = vpop.permute.xlu1 %3284 }
 0x4a7   : > { %v8267_v52 = vpop.permute.xlu0 %3286  ;;  %v8269_v55 = vpop.permute.xlu1 %3288 }
 0x4ab   : > { %v8271_v59 = vpop.permute.xlu0 %3290  ;;  %v8273_v31 = vpop.permute.xlu1 %3292 }
 0x4af   : > { %v8275_v29 = vpop.permute.xlu0 %3294  ;;  %v8277_v51 = vpop.permute.xlu1 %3296 }
 0x4b3   : > { %v8279_v17 = vpop.permute.xlu0 %3298  ;;  %v8281_v26 = vpop.permute.xlu1 %3300 }
 0x4b7   : > { %v8283_v46 = vpop.permute.xlu0 %3302  ;;  %v8285_v28 = vpop.permute.xlu1 %3304 }
 0x4bb   : > { %v8287_v14 = vpop.permute.xlu0 %3306  ;;  %v8289_v21 = vpop.permute.xlu1 %3308 }
 0x4bc   : > { %9860 = vst [vmem:[#allocation24_spill] sm:$0xff] %v8287_v14  ;;  %9861 = vst [vmem:[#allocation25_spill] sm:$0xff] %v8289_v21 }
 0x4bf   : > { %v8291_v47 = vpop.permute.xlu0 %3310  ;;  %v8293_v53 = vpop.permute.xlu1 %3312 }
 0x4c0   : > { %9862 = vst [vmem:[#allocation29_spill] sm:$0xff] %v8291_v47  ;;  %9863 = vst [vmem:[#allocation28_spill] sm:$0xff] %v8293_v53  ;;  %v3353_v53 = vsel %vm3350_vm6, 0.0, %v3259_v41  ;;  %v3359_v41 = vsel %vm3350_vm6, 0.0, %v8251_v13  ;;  %v3361_v13 = vsel %vm3350_vm6, 0.0, %v8255_v34  ;;  %v3363_v34 = vsel %vm3350_vm6, 0.0, %v8259_v58 }
 0x4c1   : > { %v3365_v58 = vsel %vm3350_vm6, 0.0, %v8263_v40  ;;  %v3367_v40 = vsel %vm3350_vm6, 0.0, %v8267_v52  ;;  %v3369_v52 = vsel %vm3350_vm6, 0.0, %v8271_v59  ;;  %v3371_v59 = vsel %vm3350_vm6, 0.0, %v8275_v29 }
 0x4c2   : > { %v3373_v29 = vsel %vm3350_vm6, 0.0, %v8279_v17  ;;  %v3375_v17 = vsel %vm3350_vm6, 0.0, %v8283_v46 }
 0x4c3   : > { %v8295_v57 = vpop.permute.xlu0 %3314  ;;  %v8297_v9 = vpop.permute.xlu1 %3316  ;;  %v9882_v46 = vld [vmem:[#allocation24_spill] sm:$0xff] }
 0x4c4   : > { %9864 = vst [vmem:[#allocation39_spill] sm:$0xff] %v8295_v57  ;;  %9865 = vst [vmem:[#allocation40_spill] sm:$0xff] %v8297_v9  ;;  %v3354_v57 = vsel %vm3350_vm6, 0.0, %v3261_v12  ;;  %v3360_v12 = vsel %vm3350_vm6, 0.0, %v8253_v61  ;;  %v3362_v61 = vsel %vm3350_vm6, 0.0, %v8257_v19  ;;  %v3364_v19 = vsel %vm3350_vm6, 0.0, %v8261_v18 }
 0x4c5   : > { %v3366_v18 = vsel %vm3350_vm6, 0.0, %v8265_v6  ;;  %v3368_v6 = vsel %vm3350_vm6, 0.0, %v8269_v55  ;;  %v3370_v55 = vsel %vm3350_vm6, 0.0, %v8273_v31  ;;  %v3372_v31 = vsel %vm3350_vm6, 0.0, %v8277_v51 }
 0x4c6   : > { %v3374_v51 = vsel %vm3350_vm6, 0.0, %v8281_v26  ;;  %v3376_v26 = vsel %vm3350_vm6, 0.0, %v8285_v28  ;;  %v9883_v28 = vld [vmem:[#allocation25_spill] sm:$0xff] }
 0x4c7   : > { %v3389_v22 = vpop.permute.xlu0 %3388  ;;  %v3396_v63 = vpop.permute.xlu1 %3395 }
 0x4c8   : > { %v3607_v43 = vmul.f32 %v3389_v22, %v3351_v38  ;;  %v3608_v27 = vmul.f32 %v3396_v63, %v3352_v25 }
 0x4ca   : > { %v8302_v14 = vadd.f32 %v3607_v43, %v7958_v24  ;;  %v8305_v47 = vadd.f32 %v3608_v27, %v7961_v0  ;;  %v3355_v27 = vsel %vm3350_vm6, 0.0, %v3263_v8  ;;  %v3356_v43 = vsel %vm3350_vm6, 0.0, %v3265_v23 }
 0x4cb   : > { %v3403_v9 = vpop.permute.xlu0 %3402  ;;  %v3410_v21 = vpop.permute.xlu1 %3409 }
 0x4cc   : > { %v3609_v32 = vmul.f32 %v3403_v9, %v3353_v53  ;;  %v3610_v49 = vmul.f32 %v3410_v21, %v3354_v57  ;;  %3707 = vrot.lane.b32.xlu0 %v8302_v14, %s5968_s5  ;;  %3709 = vrot.lane.b32.xlu1 %v8305_v47, %s5968_s5  ;;  %v3358_v9 = vsel %vm3350_vm6, 0.0, %v3269_v33 }
 0x4ce   : > { %v8314_v24 = vadd.f32 %v3609_v32, %v7970_v20  ;;  %v8317_v0 = vadd.f32 %v3610_v49, %v7973_v10  ;;  %v3357_v32 = vsel %vm3350_vm6, 0.0, %v3267_v16 }
 0x4cf   : > { %v3417_v63 = vpop.permute.xlu0 %3416  ;;  %v3424_v22 = vpop.permute.xlu1 %3423 }
 0x4d0   : > { %v3611_v25 = vmul.f32 %v3417_v63, %v3355_v27  ;;  %v3612_v38 = vmul.f32 %v3424_v22, %v3356_v43  ;;  %3711 = vrot.lane.b32.xlu0 %v8314_v24, %s5968_s5  ;;  %3713 = vrot.lane.b32.xlu1 %v8317_v0, %s5968_s5 }
 0x4d2   : > { %v8326_v20 = vadd.f32 %v3611_v25, %v7982_v37  ;;  %v8329_v10 = vadd.f32 %v3612_v38, %v7985_v15 }
 0x4d3   : > { %v3431_v57 = vpop.permute.xlu0 %3430  ;;  %v3438_v53 = vpop.permute.xlu1 %3437 }
 0x4d4   : > { %v3613_v21 = vmul.f32 %v3431_v57, %v3357_v32  ;;  %v3614_v2 = vmul.f32 %v3438_v53, %v3358_v9  ;;  %3715 = vrot.lane.b32.xlu0 %v8326_v20, %s5968_s5  ;;  %3717 = vrot.lane.b32.xlu1 %v8329_v10, %s5968_s5 }
 0x4d6   : > { %v8338_v37 = vadd.f32 %v3613_v21, %v7994_v45  ;;  %v8341_v15 = vadd.f32 %v3614_v2, %v7997_v4 }
 0x4d7   : > { %v3445_v8 = vpop.permute.xlu0 %3444  ;;  %v3452_v23 = vpop.permute.xlu1 %3451 }
 0x4d8   : > { %v3615_v16 = vmul.f32 %v3445_v8, %v3359_v41  ;;  %v3616_v33 = vmul.f32 %v3452_v23, %v3360_v12  ;;  %3719 = vrot.lane.b32.xlu0 %v8338_v37, %s5968_s5  ;;  %3721 = vrot.lane.b32.xlu1 %v8341_v15, %s5968_s5 }
 0x4da   : > { %v8352_v45 = vadd.f32 %v3615_v16, %v8008_v11  ;;  %v8355_v4 = vadd.f32 %v3616_v33, %v8011_v5 }
 0x4db   : > { %v3459_v49 = vpop.permute.xlu0 %3458  ;;  %v3466_v27 = vpop.permute.xlu1 %3465 }
 0x4dc   : > { %v3617_v43 = vmul.f32 %v3459_v49, %v3361_v13  ;;  %v3618_v63 = vmul.f32 %v3466_v27, %v3362_v61  ;;  %3723 = vrot.lane.b32.xlu0 %v8352_v45, %s5968_s5  ;;  %3725 = vrot.lane.b32.xlu1 %v8355_v4, %s5968_s5 }
 0x4de   : > { %v8366_v11 = vadd.f32 %v3617_v43, %v8022_v30  ;;  %v8369_v5 = vadd.f32 %v3618_v63, %v8025_v35 }
 0x4df   : > { %v3473_v22 = vpop.permute.xlu0 %3472  ;;  %v3480_v25 = vpop.permute.xlu1 %3479 }
 0x4e0   : > { %9866 = vst [vmem:[#allocation51_spill] sm:$0xff] %v8366_v11  ;;  %v3619_v38 = vmul.f32 %v3473_v22, %v3363_v34  ;;  %v3620_v32 = vmul.f32 %v3480_v25, %v3364_v19  ;;  %3727 = vrot.lane.b32.xlu0 %v8366_v11, %s5968_s5  ;;  %3729 = vrot.lane.b32.xlu1 %v8369_v5, %s5968_s5 }
 0x4e2   : > { %v8380_v30 = vadd.f32 %v3619_v38, %v8036_v36  ;;  %v8383_v35 = vadd.f32 %v3620_v32, %v8039_v39 }
 0x4e3   : > { %v3487_v9 = vpop.permute.xlu0 %3486  ;;  %v3494_v57 = vpop.permute.xlu1 %3493 }
 0x4e4   : > { %9867 = vst [vmem:[#allocation52_spill] sm:$0xff] %v8380_v30  ;;  %9868 = vst [vmem:[#allocation53_spill] sm:$0xff] %v8383_v35  ;;  %v3621_v53 = vmul.f32 %v3487_v9, %v3365_v58  ;;  %v3622_v21 = vmul.f32 %v3494_v57, %v3366_v18  ;;  %3731 = vrot.lane.b32.xlu0 %v8380_v30, %s5968_s5  ;;  %3733 = vrot.lane.b32.xlu1 %v8383_v35, %s5968_s5  ;;  %v3377_v9 = vsel %vm3350_vm6, 0.0, %v9882_v46  ;;  %v9901_v46 = vld [vmem:[#allocation21_spill] sm:$0xff]  ;;  %v4127_v35 = vld [vmem:[%s6212_s7 + $0x18] sm:$0xff] }
 0x4e5   : > { %v3378_v57 = vsel %vm3350_vm6, 0.0, %v9883_v28  ;;  %v9902_v28 = vld [vmem:[#allocation30_spill] sm:$0xff] }
 0x4e6   : > { %v8394_v36 = vadd.f32 %v3621_v53, %v8050_v42  ;;  %v8397_v39 = vadd.f32 %v3622_v21, %v8053_v44 }
 0x4e7   : > { %v3501_v2 = vpop.permute.xlu0 %3500  ;;  %v3508_v41 = vpop.permute.xlu1 %3507 }
 0x4e8   : > { %9869 = vst [vmem:[#allocation54_spill] sm:$0xff] %v8394_v36  ;;  %9870 = vst [vmem:[#allocation55_spill] sm:$0xff] %v8397_v39  ;;  %v3623_v12 = vmul.f32 %v3501_v2, %v3367_v40  ;;  %v3624_v8 = vmul.f32 %v3508_v41, %v3368_v6  ;;  %3735 = vrot.lane.b32.xlu0 %v8394_v36, %s5968_s5  ;;  %3737 = vrot.lane.b32.xlu1 %v8397_v39, %s5968_s5  ;;  %v9886_v41 = vld [vmem:[#allocation27_spill] sm:$0xff] }
 0x4e9   : > { %v4126_v36 = vld [vmem:[%s6212_s7 + $0x10] sm:$0xff] }
 0x4ea   : > { %v8408_v42 = vadd.f32 %v3623_v12, %v8064_v48  ;;  %v8411_v44 = vadd.f32 %v3624_v8, %v8067_v50  ;;  %v9888_v8 = vld [vmem:[#allocation29_spill] sm:$0xff] }
 0x4eb   : > { %v3515_v23 = vpop.permute.xlu0 %3514  ;;  %v3522_v16 = vpop.permute.xlu1 %3521 }
 0x4ec   : > { %9871 = vst [vmem:[#allocation56_spill] sm:$0xff] %v8408_v42  ;;  %9872 = vst [vmem:[#allocation57_spill] sm:$0xff] %v8411_v44  ;;  %v3625_v33 = vmul.f32 %v3515_v23, %v3369_v52  ;;  %v3626_v13 = vmul.f32 %v3522_v16, %v3370_v55  ;;  %3739 = vrot.lane.b32.xlu0 %v8408_v42, %s5968_s5  ;;  %3741 = vrot.lane.b32.xlu1 %v8411_v44, %s5968_s5  ;;  %v3379_v52 = vsel %vm3350_vm6, 0.0, %v9888_v8  ;;  %v9889_v55 = vld [vmem:[#allocation28_spill] sm:$0xff]  ;;  %v9906_v8 = vld [vmem:[#allocation35_spill] sm:$0xff] }
 0x4ed   : > { %v3380_v23 = vsel %vm3350_vm6, 0.0, %v9889_v55  ;;  %v9907_v55 = vld [vmem:[#allocation36_spill] sm:$0xff] }
 0x4ee   : > { %v8422_v48 = vadd.f32 %v3625_v33, %v8078_v54  ;;  %v8425_v50 = vadd.f32 %v3626_v13, %v8081_v56 }
 0x4ef   : > { %v3529_v61 = vpop.permute.xlu0 %3528  ;;  %v3536_v49 = vpop.permute.xlu1 %3535 }
 0x4f0   : > { %9873 = vst [vmem:[#allocation58_spill] sm:$0xff] %v8422_v48  ;;  %9874 = vst [vmem:[#allocation59_spill] sm:$0xff] %v8425_v50  ;;  %v3627_v27 = vmul.f32 %v3529_v61, %v3371_v59  ;;  %v3628_v43 = vmul.f32 %v3536_v49, %v3372_v31  ;;  %3743 = vrot.lane.b32.xlu0 %v8422_v48, %s5968_s5  ;;  %3745 = vrot.lane.b32.xlu1 %v8425_v50, %s5968_s5  ;;  %v9890_v31 = vld [vmem:[#allocation31_spill] sm:$0xff]  ;;  %v9892_v49 = vld [vmem:[#allocation38_spill] sm:$0xff] }
 0x4f2   : > { %v8436_v54 = vadd.f32 %v3627_v27, %v8092_v60  ;;  %v8439_v56 = vadd.f32 %v3628_v43, %v8095_v62  ;;  %v9894_v43 = vld [vmem:[#allocation39_spill] sm:$0xff] }
 0x4f3   : > { %v3543_v63 = vpop.permute.xlu0 %3542  ;;  %v3550_v34 = vpop.permute.xlu1 %3549 }
 0x4f4   : > { %9875 = vst [vmem:[#allocation60_spill] sm:$0xff] %v8436_v54  ;;  %9876 = vst [vmem:[#allocation61_spill] sm:$0xff] %v8439_v56  ;;  %v3629_v19 = vmul.f32 %v3543_v63, %v3373_v29  ;;  %v3630_v22 = vmul.f32 %v3550_v34, %v3374_v51  ;;  %3747 = vrot.lane.b32.xlu0 %v8436_v54, %s5968_s5  ;;  %3749 = vrot.lane.b32.xlu1 %v8439_v56, %s5968_s5  ;;  %v3381_v29 = vsel %vm3350_vm6, 0.0, %v9894_v43  ;;  %v9895_v51 = vld [vmem:[#allocation40_spill] sm:$0xff] }
 0x4f5   : > { %v3382_v63 = vsel %vm3350_vm6, 0.0, %v9895_v51 }
 0x4f6   : > { %v8450_v60 = vadd.f32 %v3629_v19, %v8106_v1  ;;  %v8453_v62 = vadd.f32 %v3630_v22, %v8109_v3  ;;  %v9880_v3 = vld [vmem:[#allocation23_spill] sm:$0xff] }
 0x4f7   : > { %v3557_v25 = vpop.permute.xlu0 %3556  ;;  %v3564_v38 = vpop.permute.xlu1 %3563 }
 0x4f8   : > { %9877 = vst [vmem:[#allocation62_spill] sm:$0xff] %v8450_v60  ;;  %9878 = vst [vmem:[#allocation63_spill] sm:$0xff] %v8453_v62  ;;  %v3631_v32 = vmul.f32 %v3557_v25, %v3375_v17  ;;  %v3632_v58 = vmul.f32 %v3564_v38, %v3376_v26  ;;  %3751 = vrot.lane.b32.xlu0 %v8450_v60, %s5968_s5  ;;  %3753 = vrot.lane.b32.xlu1 %v8453_v62, %s5968_s5  ;;  %v9896_v26 = vld [vmem:[#allocation45_spill] sm:$0xff]  ;;  %v9897_v38 = vld [vmem:[#allocation46_spill] sm:$0xff] }
 0x4f9   : > { %v3671_v25 = vmul.f32 %v9896_v26, %v9896_v26 }
 0x4fa   : > { %v8464_v1 = vadd.f32 %v3631_v32, %v8120_v7  ;;  %v8467_v18 = vadd.f32 %v3632_v58, %v9880_v3  ;;  %v9884_v7 = vld [vmem:[#allocation26_spill] sm:$0xff]  ;;  %v9899_v58 = vld [vmem:[#allocation47_spill] sm:$0xff] }
 0x4fb   : > { %v3571_v53 = vpop.permute.xlu0 %3570  ;;  %v3578_v21 = vpop.permute.xlu1 %3577 }
 0x4fc   : > { %9879 = vst [vmem:[#allocation64_spill] sm:$0xff] %v8464_v1  ;;  %9881 = vst [vmem:[#allocation23_spill] sm:$0xff] %v8467_v18  ;;  %v3633_v40 = vmul.f32 %v3571_v53, %v3377_v9  ;;  %v3634_v6 = vmul.f32 %v3578_v21, %v3378_v57  ;;  %3755 = vrot.lane.b32.xlu0 %v8464_v1, %s5968_s5  ;;  %3757 = vrot.lane.b32.xlu1 %v8467_v18, %s5968_s5  ;;  %v9903_v53 = vld [vmem:[#allocation32_spill] sm:$0xff] }
 0x4fd   : > { %v3839_v9 = vrot.slane %v3671_v25, %v9901_v46  ;;  %v3846_v57 = vrot.slane %v3671_v25, %v9902_v28  ;;  %v3853_v21 = vrot.slane %v3671_v25, %v9903_v53 }
 0x4fe   : > { %v8478_v2 = vadd.f32 %v3633_v40, %v9884_v7  ;;  %v8481_v12 = vadd.f32 %v3634_v6, %v9886_v41  ;;  %v9904_v40 = vld [vmem:[#allocation33_spill] sm:$0xff]  ;;  %v9905_v7 = vld [vmem:[#allocation34_spill] sm:$0xff] }
 0x4ff   : > { %v3585_v16 = vpop.permute.xlu0 %3584  ;;  %v3592_v33 = vpop.permute.xlu1 %3591  ;;  %v3860_v6 = vrot.slane %v3671_v25, %v9904_v40  ;;  %v3867_v41 = vrot.slane %v3671_v25, %v9905_v7 }
 0x500   : > { %9885 = vst [vmem:[#allocation24_spill] sm:$0xff] %v8478_v2  ;;  %9887 = vst [vmem:[#allocation25_spill] sm:$0xff] %v8481_v12  ;;  %v3635_v13 = vmul.f32 %v3585_v16, %v3379_v52  ;;  %v3636_v59 = vmul.f32 %v3592_v33, %v3380_v23  ;;  %3759 = vrot.lane.b32.xlu0 %v8478_v2, %s5968_s5  ;;  %3761 = vrot.lane.b32.xlu1 %v8481_v12, %s5968_s5  ;;  %v9908_v16 = vld [vmem:[#allocation37_spill] sm:$0xff] }
 0x501   : > { %v3874_v52 = vrot.slane %v3671_v25, %v9906_v8  ;;  %v3881_v23 = vrot.slane %v3671_v25, %v9907_v55  ;;  %v3888_v33 = vrot.slane %v3671_v25, %v9908_v16 }
 0x502   : > { %v8492_v61 = vadd.f32 %v3635_v13, %v9890_v31  ;;  %v8495_v27 = vadd.f32 %v3636_v59, %v9892_v49  ;;  %v9909_v13 = vld [vmem:[#allocation48_spill] sm:$0xff] }
 0x503   : > { %v3599_v34 = vpop.permute.xlu0 %3598  ;;  %v3606_v19 = vpop.permute.xlu1 %3605  ;;  %v3672_v59 = vmul.f32 %v9909_v13, %v9909_v13 }
 0x504   : > { %9891 = vst [vmem:[#allocation26_spill] sm:$0xff] %v8492_v61  ;;  %9893 = vst [vmem:[#allocation27_spill] sm:$0xff] %v8495_v27  ;;  %v3637_v22 = vmul.f32 %v3599_v34, %v3381_v29  ;;  %v3638_v17 = vmul.f32 %v3606_v19, %v3382_v63  ;;  %3763 = vrot.lane.b32.xlu0 %v8492_v61, %s5968_s5  ;;  %3765 = vrot.lane.b32.xlu1 %v8495_v27, %s5968_s5 }
 0x505   : > { %v3895_v31 = vrot.slane %v3672_v59, %v9901_v46  ;;  %v3902_v49 = vrot.slane %v3672_v59, %v9902_v28  ;;  %v3909_v43 = vrot.slane %v3672_v59, %v9903_v53  ;;  %v3916_v29 = vrot.slane %v3672_v59, %v9904_v40 }
 0x506   : > { %v8508_v32 = vadd.f32 %v3637_v22, %v9897_v38  ;;  %v8511_v3 = vadd.f32 %v3638_v17, %v9899_v58  ;;  %v3923_v51 = vrot.slane %v3672_v59, %v9905_v7  ;;  %v3930_v63 = vrot.slane %v3672_v59, %v9906_v8  ;;  %v9910_v22 = vld [vmem:[#allocation49_spill] sm:$0xff] }
 0x507   : > { %v3937_v34 = vrot.slane %v3672_v59, %v9907_v55  ;;  %v3944_v19 = vrot.slane %v3672_v59, %v9908_v16  ;;  %v3673_v17 = vmul.f32 %v9910_v22, %v9910_v22  ;;  %v4124_v22 = vld [vmem:[%s6212_s7] sm:$0xff] }
 0x508   : > { %9898 = vst [vmem:[#allocation29_spill] sm:$0xff] %v8508_v32  ;;  %9900 = vst [vmem:[#allocation28_spill] sm:$0xff] %v8511_v3  ;;  %3767 = vrot.lane.b32.xlu0 %v8508_v32, %s5968_s5  ;;  %3769 = vrot.lane.b32.xlu1 %v8511_v3, %s5968_s5 }
 0x509   : > { %v3951_v26 = vrot.slane %v3673_v17, %v9901_v46  ;;  %v3958_v25 = vrot.slane %v3673_v17, %v9902_v28  ;;  %v3965_v38 = vrot.slane %v3673_v17, %v9903_v53  ;;  %v3972_v58 = vrot.slane %v3673_v17, %v9904_v40 }
 0x50c   : > { %3841 = vbcast.lane.b32.xlu0 %v3839_v9, 256  ;;  %3848 = vbcast.lane.b32.xlu1 %v3846_v57, 256  ;;  %v3979_v9 = vrot.slane %v3673_v17, %v9905_v7  ;;  %v3986_v57 = vrot.slane %v3673_v17, %v9906_v8 }
 0x510   : > { %3855 = vbcast.lane.b32.xlu0 %v3853_v21, 256  ;;  %3862 = vbcast.lane.b32.xlu1 %v3860_v6, 256  ;;  %v3993_v21 = vrot.slane %v3673_v17, %v9907_v55  ;;  %v4000_v6 = vrot.slane %v3673_v17, %v9908_v16 }
 0x514   : > { %3869 = vbcast.lane.b32.xlu0 %v3867_v41, 256  ;;  %3876 = vbcast.lane.b32.xlu1 %v3874_v52, 256  ;;  %v9911_v41 = vld [vmem:[#allocation50_spill] sm:$0xff] }
 0x515   : > { %v3674_v52 = vmul.f32 %v9911_v41, %v9911_v41 }
 0x517   : > { %v4021_v13 = vrot.slane %v3674_v52, %v9903_v53  ;;  %v4028_v59 = vrot.slane %v3674_v52, %v9904_v40 }
 0x518   : > { %3883 = vbcast.lane.b32.xlu0 %v3881_v23, 256  ;;  %3890 = vbcast.lane.b32.xlu1 %v3888_v33, 256  ;;  %v4007_v23 = vrot.slane %v3674_v52, %v9901_v46  ;;  %v4014_v33 = vrot.slane %v3674_v52, %v9902_v28 }
 0x51c   : > { %3897 = vbcast.lane.b32.xlu0 %v3895_v31, 256  ;;  %3904 = vbcast.lane.b32.xlu1 %v3902_v49, 256 }
 0x520   : > { %3911 = vbcast.lane.b32.xlu0 %v3909_v43, 256  ;;  %3918 = vbcast.lane.b32.xlu1 %v3916_v29, 256  ;;  %v4035_v43 = vrot.slane %v3674_v52, %v9905_v7  ;;  %v4042_v29 = vrot.slane %v3674_v52, %v9906_v8 }
 0x524   : > { %3925 = vbcast.lane.b32.xlu0 %v3923_v51, 256  ;;  %3932 = vbcast.lane.b32.xlu1 %v3930_v63, 256 }
 0x528   : > { %3939 = vbcast.lane.b32.xlu0 %v3937_v34, 256  ;;  %3946 = vbcast.lane.b32.xlu1 %v3944_v19, 256  ;;  %v4049_v34 = vrot.slane %v3674_v52, %v9907_v55  ;;  %v4056_v19 = vrot.slane %v3674_v52, %v9908_v16 }
 0x52c   : > { %3953 = vbcast.lane.b32.xlu0 %v3951_v26, 256  ;;  %3960 = vbcast.lane.b32.xlu1 %v3958_v25, 256  ;;  %v4131_v25 = vrot.slane %v4124_v22, %v9901_v46 }
 0x530   : > { %3967 = vbcast.lane.b32.xlu0 %v3965_v38, 256  ;;  %3974 = vbcast.lane.b32.xlu1 %v3972_v58, 256  ;;  %v4138_v38 = vrot.slane %v4124_v22, %v9902_v28 }
 0x534   : > { %3981 = vbcast.lane.b32.xlu0 %v3979_v9, 256  ;;  %3988 = vbcast.lane.b32.xlu1 %v3986_v57, 256  ;;  %v5969_v57 = vmov 127  }
 0x535   : > { %5783 = vset.pattern.permute.xlu1 %v5969_v57  ;;  %5782 = vset.pattern.permute.xlu0 %v5969_v57 }
 0x538   : > { %3995 = vbcast.lane.b32.xlu0 %v3993_v21, 256  ;;  %4002 = vbcast.lane.b32.xlu1 %v4000_v6, 256  ;;  %v4145_v21 = vrot.slane %v4124_v22, %v9903_v53  ;;  %v4152_v6 = vrot.slane %v4124_v22, %v9904_v40 }
 0x53c   : > { %4009 = vbcast.lane.b32.xlu0 %v4007_v23, 256  ;;  %4016 = vbcast.lane.b32.xlu1 %v4014_v33, 256  ;;  %v4159_v23 = vrot.slane %v4124_v22, %v9905_v7  ;;  %v4166_v33 = vrot.slane %v4124_v22, %v9906_v8 }
 0x53e   : > { %v8551_v31 = vpop.permute.xlu0 %3707  ;;  %v8553_v49 = vpop.permute.xlu1 %3709 }
 0x540   : > { %4023 = vbcast.lane.b32.xlu0 %v4021_v13, 256  ;;  %4030 = vbcast.lane.b32.xlu1 %v4028_v59, 256 }
 0x542   : > { %v8557_v51 = vpop.permute.xlu0 %3711  ;;  %v8559_v63 = vpop.permute.xlu1 %3713 }
 0x544   : > { %4037 = vbcast.lane.b32.xlu0 %v4035_v43, 256  ;;  %4044 = vbcast.lane.b32.xlu1 %v4042_v29, 256  ;;  %v4173_v43 = vrot.slane %v4124_v22, %v9907_v55  ;;  %v4180_v29 = vrot.slane %v4124_v22, %v9908_v16 }
 0x546   : > { %v8564_v17 = vpop.permute.xlu0 %3715  ;;  %v8566_v26 = vpop.permute.xlu1 %3717 }
 0x548   : > { %4051 = vbcast.lane.b32.xlu0 %v4049_v34, 256  ;;  %4058 = vbcast.lane.b32.xlu1 %v4056_v19, 256  ;;  %v4125_v34 = vld [vmem:[%s6212_s7 + $0x8] sm:$0xff]  ;;  %s9295_s7 = scalar_lea.sflag [#allocation6], %s10032_s26 }
 0x549   : > { %v4194_v57 = vrot.slane %v4125_v34, %v9902_v28  ;;  %v4201_v22 = vrot.slane %v4125_v34, %v9903_v53 }
 0x54a   : > { %v8570_v58 = vpop.permute.xlu0 %3719  ;;  %v8572_v9 = vpop.permute.xlu1 %3721 }
 0x54c   : > { %4133 = vbcast.lane.b32.xlu0 %v4131_v25, 256  ;;  %4140 = vbcast.lane.b32.xlu1 %v4138_v38, 256  ;;  %v4187_v38 = vrot.slane %v4125_v34, %v9901_v46 }
 0x54e   : > { %v8576_v41 = vpop.permute.xlu0 %3723  ;;  %v8578_v52 = vpop.permute.xlu1 %3725 }
 0x550   : > { %4147 = vbcast.lane.b32.xlu0 %v4145_v21, 256  ;;  %4154 = vbcast.lane.b32.xlu1 %v4152_v6, 256 }
 0x552   : > { %v8582_v13 = vpop.permute.xlu0 %3727  ;;  %v8584_v59 = vpop.permute.xlu1 %3729 }
 0x554   : > { %4161 = vbcast.lane.b32.xlu0 %v4159_v23, 256  ;;  %4168 = vbcast.lane.b32.xlu1 %v4166_v33, 256  ;;  %v4208_v23 = vrot.slane %v4125_v34, %v9904_v40 }
 0x556   : > { %v8589_v19 = vpop.permute.xlu0 %3731  ;;  %v8591_v25 = vpop.permute.xlu1 %3733 }
 0x557   : > { %9912 = vst [vmem:[#allocation31_spill] sm:$0xff] %v8591_v25 }
 0x558   : > { %4175 = vbcast.lane.b32.xlu0 %v4173_v43, 256  ;;  %4182 = vbcast.lane.b32.xlu1 %v4180_v29, 256  ;;  %v4215_v43 = vrot.slane %v4125_v34, %v9905_v7  ;;  %v4222_v29 = vrot.slane %v4125_v34, %v9906_v8 }
 0x55a   : > { %v8595_v21 = vpop.permute.xlu0 %3735  ;;  %v8597_v6 = vpop.permute.xlu1 %3737 }
 0x55b   : > { %9913 = vst [vmem:[#allocation38_spill] sm:$0xff] %v8595_v21  ;;  %9914 = vst [vmem:[#allocation39_spill] sm:$0xff] %v8597_v6 }
 0x55c   : > { %4189 = vbcast.lane.b32.xlu0 %v4187_v38, 256  ;;  %4196 = vbcast.lane.b32.xlu1 %v4194_v57, 256  ;;  %v4229_v38 = vrot.slane %v4125_v34, %v9907_v55  ;;  %v4236_v57 = vrot.slane %v4125_v34, %v9908_v16  ;;  %v4257_v34 = vrot.slane %v4126_v36, %v9903_v53 }
 0x55e   : > { %v8601_v33 = vpop.permute.xlu0 %3739  ;;  %v8603_v62 = vpop.permute.xlu1 %3741 }
 0x560   : > { %4203 = vbcast.lane.b32.xlu0 %v4201_v22, 256  ;;  %4210 = vbcast.lane.b32.xlu1 %v4208_v23, 256  ;;  %v4243_v22 = vrot.slane %v4126_v36, %v9901_v46  ;;  %v4250_v23 = vrot.slane %v4126_v36, %v9902_v28 }
 0x562   : > { %v8607_v39 = vpop.permute.xlu0 %3743  ;;  %v8609_v60 = vpop.permute.xlu1 %3745 }
 0x564   : > { %4217 = vbcast.lane.b32.xlu0 %v4215_v43, 256  ;;  %4224 = vbcast.lane.b32.xlu1 %v4222_v29, 256  ;;  %v4264_v43 = vrot.slane %v4126_v36, %v9904_v40 }
 0x566   : > { %v8614_v6 = vpop.permute.xlu0 %3747  ;;  %v8616_v56 = vpop.permute.xlu1 %3749 }
 0x567   : > { %9915 = vst [vmem:[#allocation40_spill] sm:$0xff] %v8614_v6  ;;  %9916 = vst [vmem:[#allocation45_spill] sm:$0xff] %v8616_v56 }
 0x568   : > { %4231 = vbcast.lane.b32.xlu0 %v4229_v38, 256  ;;  %4238 = vbcast.lane.b32.xlu1 %v4236_v57, 256  ;;  %v4271_v38 = vrot.slane %v4126_v36, %v9905_v7  ;;  %v4278_v57 = vrot.slane %v4126_v36, %v9906_v8 }
 0x56a   : > { %v8620_v3 = vpop.permute.xlu0 %3751  ;;  %v8622_v32 = vpop.permute.xlu1 %3753 }
 0x56b   : > { %9917 = vst [vmem:[#allocation46_spill] sm:$0xff] %v8620_v3  ;;  %9918 = vst [vmem:[#allocation47_spill] sm:$0xff] %v8622_v32 }
 0x56c   : > { %4245 = vbcast.lane.b32.xlu0 %v4243_v22, 256  ;;  %4252 = vbcast.lane.b32.xlu1 %v4250_v23, 256  ;;  %v4285_v22 = vrot.slane %v4126_v36, %v9907_v55  ;;  %v4292_v23 = vrot.slane %v4126_v36, %v9908_v16  ;;  %v4320_v36 = vrot.slane %v4127_v35, %v9904_v40 }
 0x56e   : > { %v8626_v29 = vpop.permute.xlu0 %3755  ;;  %v8628_v21 = vpop.permute.xlu1 %3757 }
 0x56f   : > { %9919 = vst [vmem:[#allocation21_spill] sm:$0xff] %v8626_v29  ;;  %9920 = vst [vmem:[#allocation30_spill] sm:$0xff] %v8628_v21  ;;  %v626_v21 = vld [vmem:[#allocation2 + $0x8] sm:$0xff] }
 0x570   : > { %4259 = vbcast.lane.b32.xlu0 %v4257_v34, 256  ;;  %4266 = vbcast.lane.b32.xlu1 %v4264_v43, 256  ;;  %v4299_v34 = vrot.slane %v4127_v35, %v9901_v46  ;;  %v4306_v43 = vrot.slane %v4127_v35, %v9902_v28 }
 0x572   : > { %v8632_v3 = vpop.permute.xlu0 %3759  ;;  %v8634_v32 = vpop.permute.xlu1 %3761 }
 0x573   : > { %9921 = vst [vmem:[#allocation32_spill] sm:$0xff] %v8632_v3  ;;  %9922 = vst [vmem:[#allocation33_spill] sm:$0xff] %v8634_v32 }
 0x574   : > { %4273 = vbcast.lane.b32.xlu0 %v4271_v38, 256  ;;  %4280 = vbcast.lane.b32.xlu1 %v4278_v57, 256  ;;  %v4313_v38 = vrot.slane %v4127_v35, %v9903_v53 }
 0x576   : > { %v8639_v27 = vpop.permute.xlu0 %3763  ;;  %v8641_v61 = vpop.permute.xlu1 %3765 }
 0x577   : > { %9923 = vst [vmem:[#allocation34_spill] sm:$0xff] %v8639_v27  ;;  %9924 = vst [vmem:[#allocation35_spill] sm:$0xff] %v8641_v61 }
 0x578   : > { %4287 = vbcast.lane.b32.xlu0 %v4285_v22, 256  ;;  %4294 = vbcast.lane.b32.xlu1 %v4292_v23, 256  ;;  %v4327_v22 = vrot.slane %v4127_v35, %v9905_v7  ;;  %v4334_v23 = vrot.slane %v4127_v35, %v9906_v8 }
 0x57a   : > { %v8645_v56 = vpop.permute.xlu0 %3767  ;;  %v8647_v12 = vpop.permute.xlu1 %3769 }
 0x57b   : > { %9925 = vst [vmem:[#allocation36_spill] sm:$0xff] %v8645_v56  ;;  %9926 = vst [vmem:[#allocation37_spill] sm:$0xff] %v8647_v12  ;;  %v625_v12 = vld [vmem:[#allocation2] sm:$0xff] }
 0x57c   : > { %4301 = vbcast.lane.b32.xlu0 %v4299_v34, 256  ;;  %4308 = vbcast.lane.b32.xlu1 %v4306_v43, 256  ;;  %v4341_v34 = vrot.slane %v4127_v35, %v9907_v55  ;;  %v4348_v43 = vrot.slane %v4127_v35, %v9908_v16  ;;  %v4440_v35 = vrot.slane %v625_v12, %v9904_v40 }
 0x57e   : > { %v8651_v57 = vpop.permute.xlu0 %3841  ;;  %v8653_v25 = vpop.permute.xlu1 %3848 }
 0x580   : > { %4315 = vbcast.lane.b32.xlu0 %v4313_v38, 256  ;;  %4322 = vbcast.lane.b32.xlu1 %v4320_v36, 256  ;;  %v4419_v38 = vrot.slane %v625_v12, %v9901_v46  ;;  %v4426_v36 = vrot.slane %v625_v12, %v9902_v28 }
 0x582   : > { %v8657_v61 = vpop.permute.xlu0 %3855  ;;  %v8659_v56 = vpop.permute.xlu1 %3862 }
 0x584   : > { %4329 = vbcast.lane.b32.xlu0 %v4327_v22, 256  ;;  %4336 = vbcast.lane.b32.xlu1 %v4334_v23, 256  ;;  %v4433_v22 = vrot.slane %v625_v12, %v9903_v53 }
 0x586   : > { %v8663_v27 = vpop.permute.xlu0 %3869  ;;  %v8665_v2 = vpop.permute.xlu1 %3876 }
 0x588   : > { %4343 = vbcast.lane.b32.xlu0 %v4341_v34, 256  ;;  %4350 = vbcast.lane.b32.xlu1 %v4348_v43, 256  ;;  %v4447_v34 = vrot.slane %v625_v12, %v9905_v7  ;;  %v4454_v43 = vrot.slane %v625_v12, %v9906_v8 }
 0x58a   : > { %v8669_v32 = vpop.permute.xlu0 %3883  ;;  %v8671_v18 = vpop.permute.xlu1 %3890 }
 0x58c   : > { %4421 = vbcast.lane.b32.xlu0 %v4419_v38, 256  ;;  %4428 = vbcast.lane.b32.xlu1 %v4426_v36, 256  ;;  %v4461_v38 = vrot.slane %v625_v12, %v9907_v55  ;;  %v4468_v36 = vrot.slane %v625_v12, %v9908_v16  ;;  %v4496_v12 = vrot.slane %v626_v21, %v9904_v40 }
 0x58e   : > { %v8675_v23 = vpop.permute.xlu0 %3897  ;;  %v8677_v3 = vpop.permute.xlu1 %3904 }
 0x590   : > { %4435 = vbcast.lane.b32.xlu0 %v4433_v22, 256  ;;  %4442 = vbcast.lane.b32.xlu1 %v4440_v35, 256  ;;  %v4475_v22 = vrot.slane %v626_v21, %v9901_v46  ;;  %v4482_v35 = vrot.slane %v626_v21, %v9902_v28 }
 0x592   : > { %v8681_v1 = vpop.permute.xlu0 %3911  ;;  %v8683_v54 = vpop.permute.xlu1 %3918 }
 0x594   : > { %4449 = vbcast.lane.b32.xlu0 %v4447_v34, 256  ;;  %4456 = vbcast.lane.b32.xlu1 %v4454_v43, 256  ;;  %v4489_v34 = vrot.slane %v626_v21, %v9903_v53 }
 0x596   : > { %v8687_v30 = vpop.permute.xlu0 %3925  ;;  %v8689_v50 = vpop.permute.xlu1 %3932 }
 0x597   : > { %9927 = vst [vmem:[#allocation48_spill] sm:$0xff] %v8687_v30  ;;  %9928 = vst [vmem:[#allocation49_spill] sm:$0xff] %v8689_v50 }
 0x598   : > { %4463 = vbcast.lane.b32.xlu0 %v4461_v38, 256  ;;  %4470 = vbcast.lane.b32.xlu1 %v4468_v36, 256  ;;  %v4503_v38 = vrot.slane %v626_v21, %v9905_v7  ;;  %v4510_v36 = vrot.slane %v626_v21, %v9906_v8 }
 0x59a   : > { %v8693_v48 = vpop.permute.xlu0 %3939  ;;  %v8695_v29 = vpop.permute.xlu1 %3946 }
 0x59b   : > { %9929 = vst [vmem:[#allocation50_spill] sm:$0xff] %v8693_v48  ;;  %9930 = vst [vmem:[#allocation65_spill] sm:$0xff] %v8695_v29  ;;  %v627_v29 = vld [vmem:[#allocation2 + $0x10] sm:$0xff] }
 0x59c   : > { %4477 = vbcast.lane.b32.xlu0 %v4475_v22, 256  ;;  %4484 = vbcast.lane.b32.xlu1 %v4482_v35, 256  ;;  %v4517_v22 = vrot.slane %v626_v21, %v9907_v55  ;;  %v4524_v35 = vrot.slane %v626_v21, %v9908_v16  ;;  %v4552_v21 = vrot.slane %v627_v29, %v9904_v40 }
 0x59e   : > { %v8699_v43 = vpop.permute.xlu0 %3953  ;;  %v8701_v6 = vpop.permute.xlu1 %3960 }
 0x5a0   : > { %4491 = vbcast.lane.b32.xlu0 %v4489_v34, 256  ;;  %4498 = vbcast.lane.b32.xlu1 %v4496_v12, 256  ;;  %v4531_v34 = vrot.slane %v627_v29, %v9901_v46  ;;  %v4538_v12 = vrot.slane %v627_v29, %v9902_v28 }
 0x5a2   : > { %v8705_v50 = vpop.permute.xlu0 %3967  ;;  %v8707_v48 = vpop.permute.xlu1 %3974 }
 0x5a4   : > { %4505 = vbcast.lane.b32.xlu0 %v4503_v38, 256  ;;  %4512 = vbcast.lane.b32.xlu1 %v4510_v36, 256  ;;  %v4545_v38 = vrot.slane %v627_v29, %v9903_v53 }
 0x5a6   : > { %v8711_v11 = vpop.permute.xlu0 %3981  ;;  %v8713_v30 = vpop.permute.xlu1 %3988 }
 0x5a7   : > { %9931 = vst [vmem:[#allocation66_spill] sm:$0xff] %v8711_v11  ;;  %9932 = vst [vmem:[#allocation67_spill] sm:$0xff] %v8713_v30 }
 0x5a8   : > { %4519 = vbcast.lane.b32.xlu0 %v4517_v22, 256  ;;  %4526 = vbcast.lane.b32.xlu1 %v4524_v35, 256  ;;  %v4559_v22 = vrot.slane %v627_v29, %v9905_v7  ;;  %v4566_v35 = vrot.slane %v627_v29, %v9906_v8 }
 0x5aa   : > { %v8717_v44 = vpop.permute.xlu0 %3995  ;;  %v8719_v42 = vpop.permute.xlu1 %4002 }
 0x5ab   : > { %9933 = vst [vmem:[#allocation68_spill] sm:$0xff] %v8717_v44  ;;  %9934 = vst [vmem:[#allocation69_spill] sm:$0xff] %v8719_v42  ;;  %v628_v42 = vld [vmem:[#allocation2 + $0x18] sm:$0xff] }
 0x5ac   : > { %4533 = vbcast.lane.b32.xlu0 %v4531_v34, 256  ;;  %4540 = vbcast.lane.b32.xlu1 %v4538_v12, 256  ;;  %v4573_v34 = vrot.slane %v627_v29, %v9907_v55  ;;  %v4580_v12 = vrot.slane %v627_v29, %v9908_v16  ;;  %v4608_v29 = vrot.slane %v628_v42, %v9904_v40 }
 0x5ad   : > { %v4636_v40 = vrot.slane %v628_v42, %v9908_v16  ;;  %v3807_v16 = vsel %vm3803_vm7, 0.0, %v8559_v63  ;;  %v3808_v63 = vsel %vm3803_vm7, 0.0, %v8564_v17 }
 0x5ae   : > { %v8723_v36 = vpop.permute.xlu0 %4009  ;;  %v8725_v11 = vpop.permute.xlu1 %4016 }
 0x5af   : > { %9935 = vst [vmem:[#allocation70_spill] sm:$0xff] %v8723_v36  ;;  %9936 = vst [vmem:[#allocation71_spill] sm:$0xff] %v8725_v11 }
 0x5b0   : > { %4547 = vbcast.lane.b32.xlu0 %v4545_v38, 256  ;;  %4554 = vbcast.lane.b32.xlu1 %v4552_v21, 256  ;;  %v4587_v38 = vrot.slane %v628_v42, %v9901_v46  ;;  %v4594_v21 = vrot.slane %v628_v42, %v9902_v28  ;;  %v4615_v46 = vrot.slane %v628_v42, %v9905_v7 }
 0x5b1   : > { %v4622_v28 = vrot.slane %v628_v42, %v9906_v8 }
 0x5b2   : > { %v8729_v30 = vpop.permute.xlu0 %4023  ;;  %v8731_v44 = vpop.permute.xlu1 %4030 }
 0x5b3   : > { %9937 = vst [vmem:[#allocation72_spill] sm:$0xff] %v8729_v30  ;;  %9938 = vst [vmem:[#allocation73_spill] sm:$0xff] %v8731_v44 }
 0x5b4   : > { %4561 = vbcast.lane.b32.xlu0 %v4559_v22, 256  ;;  %4568 = vbcast.lane.b32.xlu1 %v4566_v35, 256  ;;  %v4601_v22 = vrot.slane %v628_v42, %v9903_v53  ;;  %v4629_v53 = vrot.slane %v628_v42, %v9907_v55  ;;  %v3813_v42 = vsel %vm3803_vm7, 0.0, %v8578_v52  ;;  %v3806_v55 = vsel %vm3803_vm7, 0.0, %v8557_v51 }
 0x5b6   : > { %v8735_v36 = vpop.permute.xlu0 %4037  ;;  %v8737_v11 = vpop.permute.xlu1 %4044 }
 0x5b7   : > { %9939 = vst [vmem:[#allocation74_spill] sm:$0xff] %v8735_v36 }
 0x5b8   : > { %4575 = vbcast.lane.b32.xlu0 %v4573_v34, 256  ;;  %4582 = vbcast.lane.b32.xlu1 %v4580_v12, 256 }
 0x5ba   : > { %v8741_v30 = vpop.permute.xlu0 %4051  ;;  %v8743_v44 = vpop.permute.xlu1 %4058 }
 0x5bc   : > { %4589 = vbcast.lane.b32.xlu0 %v4587_v38, 256  ;;  %4596 = vbcast.lane.b32.xlu1 %v4594_v21, 256  ;;  %v3804_v38 = vsel %vm3803_vm7, 0.0, %v8551_v31  ;;  %v3805_v21 = vsel %vm3803_vm7, 0.0, %v8553_v49  ;;  %v4069_v49 = vmul.f32 %v8677_v3, %v3813_v42  ;;  %v3815_v3 = vsel %vm3803_vm7, 0.0, %v8584_v59 }
 0x5bd   : > { %v4060_v7 = vmul.f32 %v8651_v57, %v3804_v38  ;;  %v4061_v8 = vmul.f32 %v8653_v25, %v3805_v21  ;;  %v4062_v25 = vmul.f32 %v8657_v61, %v3806_v55  ;;  %v4063_v57 = vmul.f32 %v8659_v56, %v3807_v16 }
 0x5be   : > { %v8747_v35 = vpop.permute.xlu0 %4133  ;;  %v8749_v36 = vpop.permute.xlu1 %4140  ;;  %v4101_v61 = vadd.f32 %v4069_v49, %v8355_v4  ;;  %v9941_v49 = vld [vmem:[#allocation57_spill] sm:$0xff] }
 0x5bf   : > { %v8785_v52 = vadd.f32 %v4061_v8, %v8305_v47  ;;  %v4071_v47 = vmul.f32 %v8683_v54, %v3815_v3  ;;  %v8808_v59 = vadd.f32 %v4063_v57, %v8317_v0  ;;  %v9942_v57 = vld [vmem:[#allocation48_spill] sm:$0xff]  ;;  %v9943_v3 = vld [vmem:[#allocation51_spill] sm:$0xff] }
 0x5c0   : > { %4603 = vbcast.lane.b32.xlu0 %v4601_v22, 256  ;;  %4610 = vbcast.lane.b32.xlu1 %v4608_v29, 256 }
 0x5c1   : > { %v4103_v4 = vadd.f32 %v4071_v47, %v8369_v5 }
 0x5c2   : > { %v8753_v34 = vpop.permute.xlu0 %4147  ;;  %v8755_v12 = vpop.permute.xlu1 %4154 }
 0x5c4   : > { %4617 = vbcast.lane.b32.xlu0 %v4615_v46, 256  ;;  %4624 = vbcast.lane.b32.xlu1 %v4622_v28, 256  ;;  %v3812_v46 = vsel %vm3803_vm7, 0.0, %v8576_v41  ;;  %v8782_v41 = vadd.f32 %v4060_v7, %v8302_v14  ;;  %v3809_v14 = vsel %vm3803_vm7, 0.0, %v8566_v26 }
 0x5c5   : > { %v4068_v31 = vmul.f32 %v8675_v23, %v3812_v46  ;;  %v4064_v23 = vmul.f32 %v8663_v27, %v3808_v63  ;;  %v4065_v17 = vmul.f32 %v8665_v2, %v3809_v14 }
 0x5c6   : > { %v8765_v22 = vpop.permute.xlu0 %4161  ;;  %v8767_v29 = vpop.permute.xlu1 %4168 }
 0x5c7   : > { %v4100_v56 = vadd.f32 %v4068_v31, %v8352_v45  ;;  %v3810_v45 = vsel %vm3803_vm7, 0.0, %v8570_v58  ;;  %v8824_v2 = vadd.f32 %v4064_v23, %v8326_v20  ;;  %v8827_v27 = vadd.f32 %v4065_v17, %v8329_v10  ;;  %v9946_v23 = vld [vmem:[#allocation66_spill] sm:$0xff] }
 0x5c8   : > { %4631 = vbcast.lane.b32.xlu0 %v4629_v53, 256  ;;  %4638 = vbcast.lane.b32.xlu1 %v4636_v40, 256  ;;  %v8805_v53 = vadd.f32 %v4062_v25, %v8314_v24  ;;  %v3811_v24 = vsel %vm3803_vm7, 0.0, %v8572_v9  ;;  %v4066_v0 = vmul.f32 %v8669_v32, %v3810_v45  ;;  %v3820_v10 = vsel %vm3803_vm7, 0.0, %v8601_v33  ;;  %v9948_v45 = vld [vmem:[#allocation59_spill] sm:$0xff] }
 0x5c9   : > { %v4067_v54 = vmul.f32 %v8671_v18, %v3811_v24  ;;  %v3821_v58 = vsel %vm3803_vm7, 0.0, %v8603_v62  ;;  %v3816_v62 = vsel %vm3803_vm7, 0.0, %v8589_v19  ;;  %v3822_v33 = vsel %vm3803_vm7, 0.0, %v8607_v39 }
 0x5ca   : > { %v8787_v28 = vpop.permute.xlu0 %4175  ;;  %v8789_v51 = vpop.permute.xlu1 %4182  ;;  %v8836_v5 = vadd.f32 %v4066_v0, %v8338_v37  ;;  %v3814_v37 = vsel %vm3803_vm7, 0.0, %v8582_v13  ;;  %v4077_v9 = vmul.f32 %v8701_v6, %v3821_v58  ;;  %v3823_v31 = vsel %vm3803_vm7, 0.0, %v8609_v60  ;;  %v9949_v0 = vld [vmem:[#allocation70_spill] sm:$0xff] }
 0x5cb   : > { %v8839_v18 = vadd.f32 %v4067_v54, %v8341_v15  ;;  %v4076_v15 = vmul.f32 %v8699_v43, %v3820_v10  ;;  %v4070_v42 = vmul.f32 %v8681_v1, %v3814_v37  ;;  %v4078_v13 = vmul.f32 %v8705_v50, %v3822_v33  ;;  %v9940_v1 = vld [vmem:[#allocation56_spill] sm:$0xff] }
 0x5cc   : > { %5136 = vperm.xlu0 %5782, %v8782_v41   ;;  %5139 = vperm.xlu1 %5783, %v8785_v52   ;;  %v4079_v6 = vmul.f32 %v8707_v48, %v3823_v31  ;;  %v4109_v25 = vadd.f32 %v4077_v9, %v9941_v49  ;;  %v4072_v63 = vmul.f32 %v9942_v57, %v3816_v62  ;;  %v9945_v48 = vld [vmem:[#allocation21_spill] sm:$0xff]  ;;  %v9952_v62 = vld [vmem:[#allocation60_spill] sm:$0xff] }
 0x5cd   : > { %v4108_v43 = vadd.f32 %v4076_v15, %v9940_v1  ;;  %v8872_v19 = vadd.f32 %v4070_v42, %v9943_v3  ;;  %v9953_v31 = vld [vmem:[#allocation64_spill] sm:$0xff] }
 0x5ce   : > { %v4190_v40 = vpop.permute.xlu0 %4189  ;;  %v4197_v38 = vpop.permute.xlu1 %4196  ;;  %v4111_v24 = vadd.f32 %v4079_v6, %v9948_v45  ;;  %v9954_v6 = vld [vmem:[#allocation71_spill] sm:$0xff]  ;;  %v9959_v45 = vld [vmem:[#allocation33_spill] sm:$0xff] }
 0x5cf   : > { %v8810_v21 = vmul.f32 %v4190_v40, %v4100_v56  ;;  %v8812_v26 = vmul.f32 %v4197_v38, %v4101_v61  ;;  %v9947_v40 = vld [vmem:[#allocation58_spill] sm:$0xff] }
 0x5d0   : > { %5142 = vperm.xlu1 %5783, %v8805_v53   ;;  %5145 = vperm.xlu0 %5782, %v8808_v59   ;;  %v4110_v38 = vadd.f32 %v4078_v13, %v9947_v40 }
 0x5d2   : > { %v8829_v7 = vpop.permute.xlu0 %4203  ;;  %v4211_v8 = vpop.permute.xlu1 %4210 }
 0x5d3   : > { %v8831_v46 = vmul.f32 %v4211_v8, %v4103_v4  ;;  %v9950_v8 = vld [vmem:[#allocation52_spill] sm:$0xff] }
 0x5d4   : > { %5148 = vperm.xlu1 %5783, %v8824_v2   ;;  %5151 = vperm.xlu0 %5782, %v8827_v27   ;;  %v8888_v10 = vadd.f32 %v4072_v63, %v9950_v8  ;;  %v9961_v8 = vld [vmem:[#allocation24_spill] sm:$0xff] }
 0x5d6   : > { %v8841_v20 = vpop.permute.xlu0 %4217  ;;  %v8843_v32 = vpop.permute.xlu1 %4224 }
 0x5d8   : > { %5154 = vperm.xlu1 %5783, %v8836_v5   ;;  %5157 = vperm.xlu0 %5782, %v8839_v18  }
 0x5da   : > { %v8856_v55 = vpop.permute.xlu0 %4231  ;;  %v8858_v16 = vpop.permute.xlu1 %4238 }
 0x5dc   : > { %5160 = vperm.xlu1 %5783, %v4100_v56   ;;  %5163 = vperm.xlu0 %5782, %v4101_v61   ;;  %v9944_v56 = vld [vmem:[#allocation40_spill] sm:$0xff]  ;;  %v3828_v61 = vsel %vm3803_vm7, 0.0, %v9945_v48 }
 0x5dd   : > { %v3824_v50 = vsel %vm3803_vm7, 0.0, %v9944_v56  ;;  %v4084_v54 = vmul.f32 %v9949_v0, %v3828_v61  ;;  %v9957_v56 = vld [vmem:[#allocation72_spill] sm:$0xff]  ;;  %v3831_v0 = vsel %vm3803_vm7, 0.0, %v9959_v45  ;;  %v9967_v45 = vld [vmem:[#allocation25_spill] sm:$0xff] }
 0x5de   : > { %v4246_v14 = vpop.permute.xlu0 %4245  ;;  %v4253_v39 = vpop.permute.xlu1 %4252  ;;  %v4080_v17 = vmul.f32 %v9946_v23, %v3824_v50  ;;  %v5784_v23 = vld [vmem:[%s6178_s23] sm:$0xff] }
 0x5df   : > { %v8874_v47 = vmul.f32 %v4246_v14, %v4108_v43  ;;  %v8876_v60 = vmul.f32 %v4253_v39, %v4109_v25  ;;  %v4116_v13 = vadd.f32 %v4084_v54, %v9953_v31  ;;  %v9956_v14 = vld [vmem:[#allocation23_spill] sm:$0xff] }
 0x5e0   : > { %5166 = vperm.xlu1 %5783, %v8872_v19   ;;  %5169 = vperm.xlu0 %5782, %v4103_v4   ;;  %v9951_v4 = vld [vmem:[#allocation30_spill] sm:$0xff]  ;;  %v4112_v33 = vadd.f32 %v4080_v17, %v9952_v62  ;;  %v9962_v62 = vld [vmem:[#allocation41_spill] sm:$0xff] }
 0x5e1   : > { %v3829_v42 = vsel %vm3803_vm7, 0.0, %v9951_v4  ;;  %v9958_v17 = vld [vmem:[#allocation42_spill] sm:$0xff] }
 0x5e2   : > { %v4260_v58 = vpop.permute.xlu0 %4259  ;;  %v4267_v37 = vpop.permute.xlu1 %4266  ;;  %v4085_v1 = vmul.f32 %v9954_v6, %v3829_v42  ;;  %v8914_v40 = vmul.f32 %v5784_v23, %v9958_v17  ;;  %v5785_v42 = vld [vmem:[%s6178_s23 + $0x10] sm:$0xff]  ;;  %v9966_v17 = vld [vmem:[#allocation74_spill] sm:$0xff] }
 0x5e3   : > { %v8890_v15 = vmul.f32 %v4260_v58, %v4110_v38  ;;  %v8892_v9 = vmul.f32 %v4267_v37, %v4111_v24  ;;  %v8922_v31 = vmul.f32 %v5785_v42, %v9962_v62  ;;  %v5786_v42 = vld [vmem:[%s6178_s23 + $0x18] sm:$0xff] }
 0x5e4   : > { %5184 = vperm.xlu0 %5782, %v4108_v43   ;;  %5172 = vperm.xlu1 %5783, %v8888_v10   ;;  %v9955_v43 = vld [vmem:[#allocation32_spill] sm:$0xff]  ;;  %v4117_v39 = vadd.f32 %v4085_v1, %v9956_v14 }
 0x5e5   : > { %v3830_v3 = vsel %vm3803_vm7, 0.0, %v9955_v43 }
 0x5e6   : > { %v4274_v49 = vpop.permute.xlu0 %4273  ;;  %v8900_v57 = vpop.permute.xlu1 %4280  ;;  %v4086_v50 = vmul.f32 %v9957_v56, %v3830_v3  ;;  %v9964_v3 = vld [vmem:[#allocation35_spill] sm:$0xff]  ;;  %v9977_v56 = vld [vmem:[#allocation44_spill] sm:$0xff] }
 0x5e7   : > { %v8902_v63 = vmul.f32 %v4274_v49, %v4112_v33  ;;  %v9963_v49 = vld [vmem:[#allocation34_spill] sm:$0xff] }
 0x5e8   : > { %5208 = vperm.xlu0 %5782, %v4116_v13   ;;  %5187 = vperm.xlu1 %5783, %v4109_v25   ;;  %v9960_v25 = vld [vmem:[#allocation73_spill] sm:$0xff]  ;;  %v4118_v58 = vadd.f32 %v4086_v50, %v9961_v8  ;;  %v3832_v43 = vsel %vm3803_vm7, 0.0, %v9963_v49  ;;  %v9965_v50 = vld [vmem:[#allocation31_spill] sm:$0xff] }
 0x5e9   : > { %v4087_v54 = vmul.f32 %v9960_v25, %v3831_v0  ;;  %v3817_v23 = vsel %vm3803_vm7, 0.0, %v9965_v50  ;;  %v9968_v25 = vld [vmem:[#allocation49_spill] sm:$0xff]  ;;  %v9972_v50 = vld [vmem:[#allocation36_spill] sm:$0xff] }
 0x5ea   : > { %v8908_v48 = vpop.permute.xlu0 %4287  ;;  %v8910_v61 = vpop.permute.xlu1 %4294  ;;  %v4073_v8 = vmul.f32 %v9968_v25, %v3817_v23  ;;  %v3834_v23 = vsel %vm3803_vm7, 0.0, %v9972_v50  ;;  %v5787_v50 = vld [vmem:[%s6178_s23 + $0x8] sm:$0xff]  ;;  %s5651_s23 = sshll.u32 %s5934_s12, 3 }
 0x5eb   : > { %v4119_v0 = vadd.f32 %v4087_v54, %v9967_v45  ;;  %v4090_v25 = vmul.f32 %v8741_v30, %v3834_v23  ;;  %v9975_v54 = vld [vmem:[#allocation27_spill] sm:$0xff]  ;;  %v8966_v14 = vmul.f32 %v5787_v50, %v9977_v56  ;;  %s5418_s12 = sadd.s32 %s5930_s11, %s5651_s23 }
 0x5ec   : > { %5190 = vperm.xlu0 %5782, %v4110_v38   ;;  %5211 = vperm.xlu1 %5783, %v4117_v39   ;;  %v3833_v38 = vsel %vm3803_vm7, 0.0, %v9964_v3 }
 0x5ee   : > { %v4302_v37 = vpop.permute.xlu0 %4301  ;;  %v4309_v4 = vpop.permute.xlu1 %4308 }
 0x5ef   : > { %v8924_v6 = vmul.f32 %v4302_v37, %v4116_v13  ;;  %v8926_v1 = vmul.f32 %v4309_v4, %v4117_v39  ;;  %v4088_v13 = vmul.f32 %v9966_v17, %v3832_v43  ;;  %v4089_v39 = vmul.f32 %v8737_v11, %v3833_v38  ;;  %v9971_v43 = vld [vmem:[#allocation45_spill] sm:$0xff] }
 0x5f0   : > { %5193 = vperm.xlu0 %5782, %v4111_v24   ;;  %5214 = vperm.xlu1 %5783, %v4118_v58   ;;  %v3825_v38 = vsel %vm3803_vm7, 0.0, %v9971_v43  ;;  %v9973_v17 = vld [vmem:[#allocation37_spill] sm:$0xff]  ;;  %v9976_v43 = vld [vmem:[#allocation43_spill] sm:$0xff] }
 0x5f1   : > { %v3835_v45 = vsel %vm3803_vm7, 0.0, %v9973_v17  ;;  %v4121_v62 = vadd.f32 %v4089_v39, %v9975_v54  ;;  %v8962_v24 = vmul.f32 %v5786_v42, %v9976_v43  ;;  %v9979_v17 = vld [vmem:[#allocation53_spill] sm:$0xff]  ;;  %v9983_v43 = vld [vmem:[#allocation46_spill] sm:$0xff]  ;;  %v9987_v54 = vld [vmem:[#allocation68_spill] sm:$0xff] }
 0x5f2   : > { %v4316_v37 = vpop.permute.xlu0 %4315  ;;  %v4323_v4 = vpop.permute.xlu1 %4322  ;;  %v3826_v50 = vsel %vm3803_vm7, 0.0, %v9983_v43 }
 0x5f3   : > { %v8943_v49 = vmul.f32 %v4316_v37, %v4118_v58  ;;  %v8945_v3 = vmul.f32 %v4323_v4, %v4119_v0  ;;  %v4091_v37 = vmul.f32 %v8743_v44, %v3835_v45  ;;  %v9974_v4 = vld [vmem:[#allocation26_spill] sm:$0xff]  ;;  %v8970_v58 = vadd.f32 %v4073_v8, %v9979_v17  ;;  %v9988_v8 = vld [vmem:[#allocation61_spill] sm:$0xff] }
 0x5f4   : > { %5196 = vperm.xlu0 %5782, %v4112_v33   ;;  %5217 = vperm.xlu1 %5783, %v4119_v0   ;;  %v4120_v11 = vadd.f32 %v4088_v13, %v9974_v4  ;;  %v9978_v33 = vld [vmem:[#allocation67_spill] sm:$0xff]  ;;  %v9982_v45 = vld [vmem:[#allocation38_spill] sm:$0xff]  ;;  %v4082_v42 = vmul.f32 %v9987_v54, %v3826_v50 }
 0x5f5   : > { %9969 = vst [vmem:[#allocation56_spill] sm:$0xff] %v8943_v49  ;;  %9970 = vst [vmem:[#allocation57_spill] sm:$0xff] %v8945_v3  ;;  %v4081_v0 = vmul.f32 %v9978_v33, %v3825_v38  ;;  %v3818_v4 = vsel %vm3803_vm7, 0.0, %v9982_v45  ;;  %v9984_v33 = vld [vmem:[#allocation29_spill] sm:$0xff]  ;;  %v9992_v54 = vld [vmem:[#allocation47_spill] sm:$0xff] }
 0x5f6   : > { %v4330_v30 = vpop.permute.xlu0 %4329  ;;  %v4337_v23 = vpop.permute.xlu1 %4336  ;;  %v4122_v17 = vadd.f32 %v4090_v25, %v9984_v33  ;;  %v9991_v33 = vld [vmem:[#allocation39_spill] sm:$0xff]  ;;  %v4385_v50 = vld [vmem:[%s6180_s20 + $0x8] sm:$0xff] }
 0x5f7   : > { %v8972_v44 = vmul.f32 %v4330_v30, %v4120_v11  ;;  %v8974_v13 = vmul.f32 %v4337_v23, %v4121_v62  ;;  %v9985_v30 = vld [vmem:[#allocation28_spill] sm:$0xff]  ;;  %v8994_v39 = vadd.f32 %v4081_v0, %v9988_v8  ;;  %v3827_v0 = vsel %vm3803_vm7, 0.0, %v9992_v54  ;;  %v4384_v8 = vld [vmem:[%s6180_s20] sm:$0xff]  ;;  %v9995_v54 = vld [vmem:[#allocation54_spill] sm:$0xff] }
 0x5f8   : > { %5175 = vperm.xlu0 %5782, %v8970_v58   ;;  %5220 = vperm.xlu1 %5783, %v4120_v11   ;;  %v8989_v23 = vadd.f32 %v4091_v37, %v9985_v30  ;;  %v9986_v11 = vld [vmem:[#allocation50_spill] sm:$0xff]  ;;  %v9993_v30 = vld [vmem:[#allocation65_spill] sm:$0xff]  ;;  %v9997_v45 = vld [vmem:[#allocation55_spill] sm:$0xff] }
 0x5f9   : > { %9980 = vst [vmem:[#allocation48_spill] sm:$0xff] %v8972_v44  ;;  %9981 = vst [vmem:[#allocation51_spill] sm:$0xff] %v8974_v13  ;;  %v4074_v56 = vmul.f32 %v9986_v11, %v3818_v4  ;;  %v3819_v4 = vsel %vm3803_vm7, 0.0, %v9991_v33  ;;  %v9994_v37 = vld [vmem:[#allocation69_spill] sm:$0xff] }
 0x5fa   : > { %v4344_v38 = vpop.permute.xlu0 %4343  ;;  %v4351_v13 = vpop.permute.xlu1 %4350  ;;  %v4075_v11 = vmul.f32 %v9993_v30, %v3819_v4  ;;  %v4083_v43 = vmul.f32 %v9994_v37, %v3827_v0  ;;  %v4352_v4 = vmul.f32 %v8747_v35, %v8782_v41  ;;  %v4353_v37 = vmul.f32 %v8749_v36, %v8785_v52  ;;  %v9998_v41 = vld [vmem:[#allocation63_spill] sm:$0xff] }
 0x5fb   : > { %v8997_v44 = vmul.f32 %v4344_v38, %v4122_v17  ;;  %v9000_v25 = vmul.f32 %v4351_v13, %v8989_v23 }
 0x5fc   : > { %5199 = vperm.xlu1 %5783, %v8994_v39   ;;  %5223 = vperm.xlu0 %5782, %v4121_v62   ;;  %v4107_v35 = vadd.f32 %v4075_v11, %v9997_v45  ;;  %v4115_v33 = vadd.f32 %v4083_v43, %v9998_v41 }
 0x5fd   : > { %9989 = vst [vmem:[#allocation40_spill] sm:$0xff] %v8997_v44  ;;  %9990 = vst [vmem:[#allocation21_spill] sm:$0xff] %v9000_v25  ;;  %v4106_v25 = vadd.f32 %v4074_v56, %v9995_v54  ;;  %v9996_v44 = vld [vmem:[#allocation62_spill] sm:$0xff]  ;;  %v4386_v56 = vld [vmem:[%s6180_s20 + $0x10] sm:$0xff]  ;;  %v4924_v54 = vrot.slane %v8962_v24, 4 }
 0x5fe   : > { %v9019_v62 = vadd.f32 %v4082_v42, %v9996_v44  ;;  %v4422_v3 = vpop.permute.xlu0 %4421  ;;  %v4429_v49 = vpop.permute.xlu1 %4428  ;;  %v4387_v44 = vld [vmem:[%s6180_s20 + $0x18] sm:$0xff]  ;;  %v4923_v42 = vrot.slane %v8962_v24, 3  ;;  %v9081_v41 = vmul.f32 %v8910_v61, %v4115_v33 }
 0x5ff   : > { %v4640_v0 = vmul.f32 %v4422_v3, %v4384_v8  ;;  %v4641_v30 = vmul.f32 %v4429_v49, %v4385_v50  ;;  %v4354_v49 = vmul.f32 %v8753_v34, %v8805_v53  ;;  %v4355_v3 = vmul.f32 %v8755_v12, %v8808_v59 }
 0x600   : > { %5178 = vperm.xlu1 %5783, %v4106_v25   ;;  %5202 = vperm.xlu0 %5782, %v9019_v62   ;;  %v4356_v8 = vmul.f32 %v8765_v22, %v8824_v2  ;;  %v4357_v50 = vmul.f32 %v8767_v29, %v8827_v27  ;;  %v4358_v34 = vmul.f32 %v8787_v28, %v8836_v5  ;;  %v4927_v29 = vrot.slane %v8962_v24, 7 }
 0x601   : > { %v4672_v36 = vadd.f32 %v4640_v0, %v4352_v4  ;;  %v4673_v52 = vadd.f32 %v4641_v30, %v4353_v37  ;;  %v4359_v12 = vmul.f32 %v8789_v51, %v8839_v18  ;;  %v9050_v22 = vmul.f32 %v8829_v7, %v8872_v19 }
 0x602   : > { %v4436_v38 = vpop.permute.xlu0 %4435  ;;  %v4443_v13 = vpop.permute.xlu1 %4442  ;;  %v9057_v28 = vmul.f32 %v8841_v20, %v8888_v10  ;;  %v9061_v51 = vmul.f32 %v8843_v32, %v8970_v58  ;;  %v9064_v7 = vmul.f32 %v8856_v55, %v4106_v25  ;;  %v9067_v5 = vmul.f32 %v8858_v16, %v4107_v35 }
 0x603   : > { %v4704_v45 = vrot.slane %v4672_v36, 4  ;;  %v4710_v43 = vrot.slane %v4673_v52, 4  ;;  %v4642_v11 = vmul.f32 %v4436_v38, %v4386_v56  ;;  %v4643_v4 = vmul.f32 %v4443_v13, %v4387_v44  ;;  %v4388_v38 = vld [vmem:[%s6180_s20 + $0x20] sm:$0xff]  ;;  %v4389_v13 = vld [vmem:[%s6180_s20 + $0x28] sm:$0xff]  ;;  %v4390_v56 = vld [vmem:[%s6180_s20 + $0x30] sm:$0xff] }
 0x604   : > { %5226 = vperm.xlu1 %5783, %v4122_v17   ;;  %5181 = vperm.xlu0 %5782, %v4107_v35   ;;  %v9071_v20 = vmul.f32 %v8900_v57, %v8994_v39  ;;  %v4391_v44 = vld [vmem:[%s6180_s20 + $0x38] sm:$0xff]  ;;  %v9078_v35 = vmul.f32 %v8908_v48, %v9019_v62 }
 0x605   : > { %v4705_v53 = vadd.f32 %v4704_v45, %v4672_v36  ;;  %v4711_v59 = vadd.f32 %v4710_v43, %v4673_v52  ;;  %v4674_v2 = vadd.f32 %v4642_v11, %v4354_v49  ;;  %v4675_v27 = vadd.f32 %v4643_v4, %v4355_v3 }
 0x606   : > { %v4450_v18 = vpop.permute.xlu0 %4449  ;;  %v4457_v19 = vpop.permute.xlu1 %4456 }
 0x607   : > { %v4706_v17 = vrot.slane %v4705_v53, 2  ;;  %v4712_v37 = vrot.slane %v4711_v59, 2  ;;  %v4716_v0 = vrot.slane %v4674_v2, 4  ;;  %v4722_v30 = vrot.slane %v4675_v27, 4 }
 0x608   : > { %v4644_v32 = vmul.f32 %v4450_v18, %v4388_v38  ;;  %v4645_v10 = vmul.f32 %v4457_v19, %v4389_v13  ;;  %5205 = vperm.xlu1 %5783, %v4115_v33   ;;  %5229 = vperm.xlu0 %5782, %v8989_v23   ;;  %v9999_v19 = vrot.slane %v8914_v40, 1 }
 0x609   : > { %v4707_v55 = vadd.f32 %v4706_v17, %v4705_v53  ;;  %v4713_v16 = vadd.f32 %v4712_v37, %v4711_v59  ;;  %v4717_v58 = vadd.f32 %v4716_v0, %v4674_v2  ;;  %v4723_v25 = vadd.f32 %v4722_v30, %v4675_v27  ;;  %v4392_v27 = vld [vmem:[%s6180_s20 + $0x40] sm:$0xff] }
 0x60a   : > { %v4676_v57 = vadd.f32 %v4644_v32, %v4356_v8  ;;  %v4677_v39 = vadd.f32 %v4645_v10, %v4357_v50  ;;  %v4464_v36 = vpop.permute.xlu0 %4463  ;;  %v4471_v52 = vpop.permute.xlu1 %4470 }
 0x60b   : > { %v4708_v49 = vrot.slane %v4707_v55, 1  ;;  %v4714_v3 = vrot.slane %v4713_v16, 1  ;;  %v4718_v23 = vrot.slane %v4717_v58, 2  ;;  %v4724_v45 = vrot.slane %v4723_v25, 2 }
 0x60c   : > { %v4728_v43 = vrot.slane %v4676_v57, 4  ;;  %v4734_v11 = vrot.slane %v4677_v39, 4  ;;  %v4646_v4 = vmul.f32 %v4464_v36, %v4390_v56  ;;  %v4647_v53 = vmul.f32 %v4471_v52, %v4391_v44 }
 0x60d   : > { %v4709_v59 = vadd.f32 %v4708_v49, %v4707_v55  ;;  %v4715_v48 = vadd.f32 %v4714_v3, %v4713_v16  ;;  %v4719_v62 = vadd.f32 %v4718_v23, %v4717_v58  ;;  %v4725_v61 = vadd.f32 %v4724_v45, %v4723_v25 }
 0x60e   : > { %v4729_v33 = vadd.f32 %v4728_v43, %v4676_v57  ;;  %v4735_v8 = vadd.f32 %v4734_v11, %v4677_v39  ;;  %v4678_v50 = vadd.f32 %v4646_v4, %v4358_v34  ;;  %v4679_v2 = vadd.f32 %v4647_v53, %v4359_v12  ;;  %v4478_v38 = vpop.permute.xlu0 %4477  ;;  %v4485_v13 = vpop.permute.xlu1 %4484  ;;  %v4393_v39 = vld [vmem:[%s6180_s20 + $0x48] sm:$0xff] }
 0x60f   : > { %v4960_v18 = vadd.f32 %v4709_v59, %v8914_v40  ;;  %v4961_v17 = vadd.f32 %v9999_v19, %v4715_v48  ;;  %v4720_v37 = vrot.slane %v4719_v62, 1  ;;  %v4726_v0 = vrot.slane %v4725_v61, 1 }
 0x610   : > { %v4730_v30 = vrot.slane %v4729_v33, 2  ;;  %v4736_v32 = vrot.slane %v4735_v8, 2  ;;  %v4740_v10 = vrot.slane %v4678_v50, 4  ;;  %v4746_v55 = vrot.slane %v4679_v2, 4 }
 0x611   : > { %v5024_v16 = vrot.slane %v4961_v17, 7  ;;  %v4721_v58 = vadd.f32 %v4720_v37, %v4719_v62  ;;  %v4727_v25 = vadd.f32 %v4726_v0, %v4725_v61  ;;  %v4648_v34 = vmul.f32 %v4478_v38, %v4392_v27  ;;  %v4394_v62 = vld [vmem:[%s6180_s20 + $0x50] sm:$0xff] }
 0x612   : > { %v4731_v12 = vadd.f32 %v4730_v30, %v4729_v33  ;;  %v4737_v56 = vadd.f32 %v4736_v32, %v4735_v8  ;;  %v4741_v44 = vadd.f32 %v4740_v10, %v4678_v50  ;;  %v4747_v57 = vadd.f32 %v4746_v55, %v4679_v2  ;;  %v4492_v36 = vpop.permute.xlu0 %4491  ;;  %v4499_v52 = vpop.permute.xlu1 %4498  ;;  %v4395_v32 = vld [vmem:[%s6180_s20 + $0x58] sm:$0xff] }
 0x613   : > { %v5026_v49 = vsel %vm5025_vm8, %v5024_v16, %v4960_v18  ;;  %v10000_v3 = vrot.slane %v8914_v40, 2  ;;  %v10001_v45 = vrot.slane %v8914_v40, 3  ;;  %v4680_v11 = vadd.f32 %v4648_v34, %v8810_v21 }
 0x614   : > { %v4732_v4 = vrot.slane %v4731_v12, 1  ;;  %v4738_v53 = vrot.slane %v4737_v56, 1  ;;  %v4742_v59 = vrot.slane %v4741_v44, 2  ;;  %v4748_v48 = vrot.slane %v4747_v57, 2 }
 0x615   : > { %v4962_v23 = vadd.f32 %v10000_v3, %v4721_v58  ;;  %v4963_v43 = vadd.f32 %v10001_v45, %v4727_v25  ;;  %v4752_v8 = vrot.slane %v4680_v11, 4  ;;  %v4649_v50 = vmul.f32 %v4485_v13, %v4393_v39 }
 0x616   : > { %v4733_v2 = vadd.f32 %v4732_v4, %v4731_v12  ;;  %v4739_v27 = vadd.f32 %v4738_v53, %v4737_v56  ;;  %v4743_v38 = vadd.f32 %v4742_v59, %v4741_v44  ;;  %v4749_v18 = vadd.f32 %v4748_v48, %v4747_v57  ;;  %v4506_v19 = vpop.permute.xlu0 %4505  ;;  %v4513_v17 = vpop.permute.xlu1 %4512  ;;  %v4396_v57 = vld [vmem:[%s6180_s20 + $0x60] sm:$0xff] }
 0x617   : > { %v5027_v61 = vrot.slane %v4962_v23, 6  ;;  %v5030_v33 = vrot.slane %v4963_v43, 5  ;;  %v4753_v37 = vadd.f32 %v4752_v8, %v4680_v11  ;;  %v4681_v0 = vadd.f32 %v4649_v50, %v8812_v26 }
 0x618   : > { %v4650_v30 = vmul.f32 %v4492_v36, %v4394_v62  ;;  %v10002_v55 = vrot.slane %v8914_v40, 4  ;;  %v10003_v16 = vrot.slane %v8914_v40, 5  ;;  %v4744_v25 = vrot.slane %v4743_v38, 1 }
 0x619   : > { %v5029_v21 = vsel %vm5028_vm9, %v5027_v61, %v5026_v49  ;;  %v4750_v34 = vrot.slane %v4749_v18, 1  ;;  %v4754_v12 = vrot.slane %v4753_v37, 2  ;;  %v4758_v56 = vrot.slane %v4681_v0, 4  ;;  %v4397_v61 = vld [vmem:[%s6180_s20 + $0x68] sm:$0xff] }
 0x61a   : > { %v5032_v10 = vsel %vm5031_vm10, %v5030_v33, %v5029_v21  ;;  %v4964_v13 = vadd.f32 %v10002_v55, %v4733_v2  ;;  %v4965_v58 = vadd.f32 %v10003_v16, %v4739_v27  ;;  %v4682_v44 = vadd.f32 %v4650_v30, %v9050_v22  ;;  %v4520_v3 = vpop.permute.xlu0 %4519  ;;  %v4527_v23 = vpop.permute.xlu1 %4526 }
 0x61b   : > { %v4745_v36 = vadd.f32 %v4744_v25, %v4743_v38  ;;  %v4651_v49 = vmul.f32 %v4499_v52, %v4395_v32  ;;  %v4751_v45 = vadd.f32 %v4750_v34, %v4749_v18  ;;  %v4755_v43 = vadd.f32 %v4754_v12, %v4753_v37  ;;  %v4400_v25 = vld [vmem:[%s6180_s20 + $0x80] sm:$0xff] }
 0x61c   : > { %v5033_v39 = vrot.slane %v4964_v13, 4  ;;  %v5036_v26 = vrot.slane %v4965_v58, 3  ;;  %v4759_v11 = vadd.f32 %v4758_v56, %v4681_v0  ;;  %v4764_v4 = vrot.slane %v4682_v44, 4  ;;  %v4399_v58 = vld [vmem:[%s6180_s20 + $0x78] sm:$0xff] }
 0x61d   : > { %v10004_v59 = vrot.slane %v8914_v40, 6  ;;  %v4683_v62 = vadd.f32 %v4651_v49, %v8831_v46  ;;  %v4652_v22 = vmul.f32 %v4506_v19, %v4396_v57  ;;  %v10005_v52 = vrot.slane %v8914_v40, 7 }
 0x61e   : > { %v5035_v53 = vsel %vm5034_vm11, %v5033_v39, %v5032_v10  ;;  %v4756_v50 = vrot.slane %v4755_v43, 1  ;;  %v4760_v2 = vrot.slane %v4759_v11, 2  ;;  %v4765_v38 = vadd.f32 %v4764_v4, %v4682_v44  ;;  %v4534_v37 = vpop.permute.xlu0 %4533  ;;  %v4541_v0 = vpop.permute.xlu1 %4540  ;;  %v4398_v10 = vld [vmem:[%s6180_s20 + $0x70] sm:$0xff] }
 0x61f   : > { %v4966_v48 = vadd.f32 %v10004_v59, %v4745_v36  ;;  %v5038_v33 = vsel %vm5037_vm12, %v5036_v26, %v5035_v53  ;;  %v4967_v8 = vadd.f32 %v10005_v52, %v4751_v45  ;;  %v4770_v18 = vrot.slane %v4683_v62, 4 }
 0x620   : > { %v4684_v21 = vadd.f32 %v4652_v22, %v9057_v28  ;;  %v4757_v19 = vadd.f32 %v4756_v50, %v4755_v43  ;;  %v4761_v30 = vadd.f32 %v4760_v2, %v4759_v11  ;;  %v4653_v32 = vmul.f32 %v4513_v17, %v4397_v61 }
 0x621   : > { %v5039_v27 = vrot.slane %v4966_v48, 2  ;;  %v5042_v46 = vrot.slane %v4967_v8, 1  ;;  %v4766_v55 = vrot.slane %v4765_v38, 2  ;;  %v4771_v13 = vadd.f32 %v4770_v18, %v4683_v62 }
 0x622   : > { %v4776_v16 = vrot.slane %v4684_v21, 4  ;;  %v4968_v12 = vadd.f32 %v4757_v19, %v8966_v14  ;;  %v4762_v28 = vrot.slane %v4761_v30, 1  ;;  %v4685_v56 = vadd.f32 %v4653_v32, %v9061_v51  ;;  %v4548_v26 = vpop.permute.xlu0 %4547  ;;  %v9122_v36 = vpop.permute.xlu1 %4554 }
 0x623   : > { %v5041_v40 = vsel %vm5040_vm13, %v5039_v27, %v5038_v33  ;;  %v4767_v44 = vadd.f32 %v4766_v55, %v4765_v38  ;;  %v4772_v57 = vrot.slane %v4771_v13, 2  ;;  %v4654_v17 = vmul.f32 %v4520_v3, %v4398_v10 }
 0x624   : > { %v5044_v34 = vsel %vm5043_vm14, %v5042_v46, %v5041_v40  ;;  %v4777_v39 = vadd.f32 %v4776_v16, %v4684_v21  ;;  %v4763_v49 = vadd.f32 %v4762_v28, %v4761_v30  ;;  %v4782_v45 = vrot.slane %v4685_v56, 4  ;;  %v4401_v30 = vld [vmem:[%s6180_s20 + $0x88] sm:$0xff] }
 0x625   : > { %5091 = vst [vmem:[%s6217_s2] sm:$0xff] %v5044_v34  ;;  %v4655_v43 = vmul.f32 %v4527_v23, %v4399_v58  ;;  %v4656_v11 = vmul.f32 %v4534_v37, %v4400_v25  ;;  %v4768_v4 = vrot.slane %v4767_v44, 1  ;;  %v4773_v53 = vadd.f32 %v4772_v57, %v4771_v13  ;;  %v4402_v57 = vld [vmem:[%s6180_s20 + $0x90] sm:$0xff] }
 0x626   : > { %v4778_v59 = vrot.slane %v4777_v39, 2  ;;  %v4686_v48 = vadd.f32 %v4654_v17, %v9064_v7  ;;  %v10006_v62 = vrot.slane %v8966_v14, 1  ;;  %v4783_v22 = vadd.f32 %v4782_v45, %v4685_v56  ;;  %v4562_v23 = vpop.permute.xlu0 %4561  ;;  %v9129_v2 = vpop.permute.xlu1 %4568 }
 0x627   : > { %v4687_v61 = vadd.f32 %v4655_v43, %v9067_v5  ;;  %v4688_v3 = vadd.f32 %v4656_v11, %v8874_v47  ;;  %v4769_v33 = vadd.f32 %v4768_v4, %v4767_v44  ;;  %v4774_v52 = vrot.slane %v4773_v53, 1 }
 0x628   : > { %v4969_v51 = vadd.f32 %v10006_v62, %v4763_v49  ;;  %v4779_v8 = vadd.f32 %v4778_v59, %v4777_v39  ;;  %v4788_v50 = vrot.slane %v4686_v48, 4  ;;  %v4784_v38 = vrot.slane %v4783_v22, 2  ;;  %v4403_v62 = vld [vmem:[%s6180_s20 + $0x98] sm:$0xff] }
 0x629   : > { %v4794_v18 = vrot.slane %v4687_v61, 4  ;;  %v4800_v7 = vrot.slane %v4688_v3, 4  ;;  %v10007_v21 = vrot.slane %v8966_v14, 2  ;;  %v4775_v46 = vadd.f32 %v4774_v52, %v4773_v53 }
 0x62a   : > { %v5045_v27 = vrot.slane %v4969_v51, 7  ;;  %v4780_v5 = vrot.slane %v4779_v8, 1  ;;  %v4789_v19 = vadd.f32 %v4788_v50, %v4686_v48  ;;  %v4785_v32 = vadd.f32 %v4784_v38, %v4783_v22  ;;  %v4576_v39 = vpop.permute.xlu0 %4575  ;;  %v9138_v17 = vpop.permute.xlu1 %4582 }
 0x62b   : > { %v4970_v37 = vadd.f32 %v10007_v21, %v4769_v33  ;;  %v4795_v10 = vadd.f32 %v4794_v18, %v4687_v61  ;;  %v4801_v40 = vadd.f32 %v4800_v7, %v4688_v3  ;;  %v10008_v13 = vrot.slane %v8966_v14, 3 }
 0x62c   : > { %v5046_v47 = vsel %vm5025_vm8, %v5045_v27, %v4968_v12  ;;  %v4781_v58 = vadd.f32 %v4780_v5, %v4779_v8  ;;  %v4790_v25 = vrot.slane %v4789_v19, 2  ;;  %v4786_v34 = vrot.slane %v4785_v32, 1  ;;  %v4404_v27 = vld [vmem:[%s6180_s20 + $0xa0] sm:$0xff] }
 0x62d   : > { %v5047_v55 = vrot.slane %v4970_v37, 6  ;;  %v4971_v16 = vadd.f32 %v10008_v13, %v4775_v46  ;;  %v4796_v28 = vrot.slane %v4795_v10, 2  ;;  %v4802_v56 = vrot.slane %v4801_v40, 2  ;;  %v4406_v13 = vld [vmem:[%s6180_s20 + $0xb0] sm:$0xff] }
 0x62e   : > { %v4657_v44 = vmul.f32 %v4541_v0, %v4401_v30  ;;  %v10009_v45 = vrot.slane %v8966_v14, 4  ;;  %v4791_v11 = vadd.f32 %v4790_v25, %v4789_v19  ;;  %v4787_v4 = vadd.f32 %v4786_v34, %v4785_v32  ;;  %v4590_v5 = vpop.permute.xlu0 %4589  ;;  %v9152_v19 = vpop.permute.xlu1 %4596 }
 0x62f   : > { %v5048_v12 = vsel %vm5028_vm9, %v5047_v55, %v5046_v47  ;;  %v5049_v49 = vrot.slane %v4971_v16, 5  ;;  %v4797_v53 = vadd.f32 %v4796_v28, %v4795_v10  ;;  %v4803_v59 = vadd.f32 %v4802_v56, %v4801_v40  ;;  %v4405_v55 = vld [vmem:[%s6180_s20 + $0xa8] sm:$0xff] }
 0x630   : > { %v4972_v43 = vadd.f32 %v10009_v45, %v4781_v58  ;;  %v4689_v48 = vadd.f32 %v4657_v44, %v8876_v60  ;;  %v4792_v22 = vrot.slane %v4791_v11, 1  ;;  %v4658_v61 = vmul.f32 %v4548_v26, %v4402_v57 }
 0x631   : > { %v5050_v0 = vsel %vm5031_vm10, %v5049_v49, %v5048_v12  ;;  %v10010_v3 = vrot.slane %v8966_v14, 5  ;;  %v4798_v52 = vrot.slane %v4797_v53, 1  ;;  %v4804_v8 = vrot.slane %v4803_v59, 1  ;;  %v4407_v49 = vld [vmem:[%s6180_s20 + $0xb8] sm:$0xff] }
 0x632   : > { %v5051_v51 = vrot.slane %v4972_v43, 4  ;;  %v4806_v50 = vrot.slane %v4689_v48, 4  ;;  %v4793_v18 = vadd.f32 %v4792_v22, %v4791_v11  ;;  %v4690_v60 = vadd.f32 %v4658_v61, %v8890_v15 }
 0x633   : > { %v4973_v33 = vadd.f32 %v10010_v3, %v4787_v4  ;;  %v4659_v7 = vmul.f32 %v9122_v36, %v4403_v62  ;;  %v4799_v37 = vadd.f32 %v4798_v52, %v4797_v53  ;;  %v4805_v46 = vadd.f32 %v4804_v8, %v4803_v59  ;;  %v4408_v4 = vld [vmem:[%s6180_s20 + $0xc0] sm:$0xff]  ;;  %v4604_v62 = vpop.permute.xlu0 %4603 }
 0x634   : > { %v5052_v38 = vsel %vm5034_vm11, %v5051_v51, %v5050_v0  ;;  %v4807_v26 = vadd.f32 %v4806_v50, %v4689_v48  ;;  %v10011_v30 = vrot.slane %v8966_v14, 6  ;;  %v4812_v32 = vrot.slane %v4690_v60, 4  ;;  %v9171_v0 = vpop.permute.xlu1 %4610 }
 0x635   : > { %v5053_v21 = vrot.slane %v4973_v33, 3  ;;  %v4691_v10 = vadd.f32 %v4659_v7, %v8892_v9  ;;  %v4660_v40 = vmul.f32 %v4562_v23, %v4404_v27  ;;  %v10012_v36 = vrot.slane %v8966_v14, 7 }
 0x636   : > { %v4974_v47 = vadd.f32 %v10011_v30, %v4793_v18  ;;  %v4976_v58 = vadd.f32 %v4805_v46, %v8922_v31  ;;  %v4808_v25 = vrot.slane %v4807_v26, 2  ;;  %v4813_v28 = vadd.f32 %v4812_v32, %v4690_v60 }
 0x637   : > { %v5054_v15 = vsel %vm5037_vm12, %v5053_v21, %v5052_v38  ;;  %v4975_v16 = vadd.f32 %v10012_v36, %v4799_v37  ;;  %v4818_v56 = vrot.slane %v4691_v10, 4  ;;  %v4692_v44 = vadd.f32 %v4660_v40, %v8902_v63  ;;  %v4618_v32 = vpop.permute.xlu0 %4617  ;;  %v4409_v36 = vld [vmem:[%s6180_s20 + $0xc8] sm:$0xff] }
 0x638   : > { %v5055_v34 = vrot.slane %v4974_v47, 2  ;;  %v4809_v9 = vadd.f32 %v4808_v25, %v4807_v26  ;;  %v4661_v23 = vmul.f32 %v9129_v2, %v4405_v55  ;;  %v4662_v12 = vmul.f32 %v4576_v39, %v4406_v13 }
 0x639   : > { %v5057_v57 = vrot.slane %v4975_v16, 1  ;;  %v4814_v14 = vrot.slane %v4813_v28, 2  ;;  %v4819_v43 = vadd.f32 %v4818_v56, %v4691_v10  ;;  %v4824_v11 = vrot.slane %v4692_v44, 4  ;;  %v4625_v10 = vpop.permute.xlu1 %4624 }
 0x63a   : > { %v5056_v45 = vsel %vm5040_vm13, %v5055_v34, %v5054_v15  ;;  %v4810_v59 = vrot.slane %v4809_v9, 1  ;;  %v4693_v48 = vadd.f32 %v4661_v23, %v9071_v20  ;;  %v4694_v63 = vadd.f32 %v4662_v12, %v9078_v35 }
 0x63b   : > { %v5058_v53 = vsel %vm5043_vm14, %v5057_v57, %v5056_v45  ;;  %v4815_v2 = vadd.f32 %v4814_v14, %v4813_v28  ;;  %v4820_v39 = vrot.slane %v4819_v43, 2  ;;  %v4825_v51 = vadd.f32 %v4824_v11, %v4692_v44  ;;  %v4410_v14 = vld [vmem:[%s6180_s20 + $0xd0] sm:$0xff] }
 0x63c   : > { %5092 = vst [vmem:[%s6217_s2 + $0x8] sm:$0xff] %v5058_v53  ;;  %v4663_v22 = vmul.f32 %v9138_v17, %v4407_v49  ;;  %v4811_v61 = vadd.f32 %v4810_v59, %v4809_v9  ;;  %v4830_v3 = vrot.slane %v4693_v48, 4  ;;  %v4836_v33 = vrot.slane %v4694_v63, 4 }
 0x63d   : > { %v4664_v52 = vmul.f32 %v4590_v5, %v4408_v4  ;;  %v4816_v8 = vrot.slane %v4815_v2, 1  ;;  %v4821_v50 = vadd.f32 %v4820_v39, %v4819_v43  ;;  %v4826_v27 = vrot.slane %v4825_v51, 2  ;;  %v4411_v39 = vld [vmem:[%s6180_s20 + $0xd8] sm:$0xff] }
 0x63e   : > { %v4695_v20 = vadd.f32 %v4663_v22, %v9081_v41  ;;  %v10013_v35 = vrot.slane %v8922_v31, 1  ;;  %v4831_v18 = vadd.f32 %v4830_v3, %v4693_v48  ;;  %v4837_v60 = vadd.f32 %v4836_v33, %v4694_v63  ;;  %v4639_v22 = vpop.permute.xlu1 %4638 }
 0x63f   : > { %v4696_v7 = vadd.f32 %v4664_v52, %v8924_v6  ;;  %v4817_v21 = vadd.f32 %v4816_v8, %v4815_v2  ;;  %v4822_v37 = vrot.slane %v4821_v50, 1  ;;  %v4827_v17 = vadd.f32 %v4826_v27, %v4825_v51  ;;  %v4632_v51 = vpop.permute.xlu0 %4631 }
 0x640   : > { %v4977_v38 = vadd.f32 %v10013_v35, %v4811_v61  ;;  %v4842_v46 = vrot.slane %v4695_v20, 4  ;;  %v4832_v30 = vrot.slane %v4831_v18, 2  ;;  %v4838_v5 = vrot.slane %v4837_v60, 2 }
 0x641   : > { %v4848_v47 = vrot.slane %v4696_v7, 4  ;;  %v10014_v41 = vrot.slane %v8922_v31, 2  ;;  %v4823_v55 = vadd.f32 %v4822_v37, %v4821_v50  ;;  %v4828_v13 = vrot.slane %v4827_v17, 1  ;;  %v4413_v37 = vld [vmem:[%s6180_s20 + $0xe8] sm:$0xff] }
 0x642   : > { %v5059_v26 = vrot.slane %v4977_v38, 7  ;;  %v4843_v15 = vadd.f32 %v4842_v46, %v4695_v20  ;;  %v4833_v16 = vadd.f32 %v4832_v30, %v4831_v18  ;;  %v4839_v25 = vadd.f32 %v4838_v5, %v4837_v60  ;;  %v4412_v38 = vld [vmem:[%s6180_s20 + $0xe0] sm:$0xff]  ;;  %v10019_v60 = vld [vmem:[#allocation56_spill] sm:$0xff] }
 0x643   : > { %v4978_v40 = vadd.f32 %v10014_v41, %v4817_v21  ;;  %v4849_v34 = vadd.f32 %v4848_v47, %v4696_v7  ;;  %v10015_v56 = vrot.slane %v8922_v31, 3  ;;  %v4829_v57 = vadd.f32 %v4828_v13, %v4827_v17 }
 0x644   : > { %v5060_v6 = vsel %vm5025_vm8, %v5059_v26, %v4976_v58  ;;  %v4844_v9 = vrot.slane %v4843_v15, 2  ;;  %v4834_v23 = vrot.slane %v4833_v16, 1  ;;  %v4840_v12 = vrot.slane %v4839_v25, 1 }
 0x645   : > { %v5061_v28 = vrot.slane %v4978_v40, 6  ;;  %v4979_v44 = vadd.f32 %v10015_v56, %v4823_v55  ;;  %v4850_v49 = vrot.slane %v4849_v34, 2  ;;  %v4665_v45 = vmul.f32 %v9152_v19, %v4409_v36  ;;  %v10021_v55 = vld [vmem:[#allocation57_spill] sm:$0xff]  ;;  %v4414_v36 = vld [vmem:[%s6180_s20 + $0xf0] sm:$0xff] }
 0x646   : > { %v10016_v58 = vrot.slane %v8922_v31, 4  ;;  %v4845_v53 = vadd.f32 %v4844_v9, %v4843_v15  ;;  %v4835_v59 = vadd.f32 %v4834_v23, %v4833_v16  ;;  %v4841_v48 = vadd.f32 %v4840_v12, %v4839_v25  ;;  %v10022_v9 = vld [vmem:[#allocation48_spill] sm:$0xff]  ;;  %v10023_v12 = vld [vmem:[#allocation51_spill] sm:$0xff] }
 0x647   : > { %v5062_v43 = vsel %vm5028_vm9, %v5061_v28, %v5060_v6  ;;  %v5063_v11 = vrot.slane %v4979_v44, 5  ;;  %v4851_v63 = vadd.f32 %v4850_v49, %v4849_v34  ;;  %v4697_v2 = vadd.f32 %v4665_v45, %v8926_v1  ;;  %v5137_v30 = vpop.permute.xlu0 %5136  ;;  %v5140_v5 = vpop.permute.xlu1 %5139  ;;  %v4415_v34 = vld [vmem:[%s6180_s20 + $0xf8] sm:$0xff]  ;;  %s5645_s20 = sshll.u32 %s5938_s13, 4 }
 0x648   : > { %v4980_v4 = vadd.f32 %v10016_v58, %v4829_v57  ;;  %v4846_v3 = vrot.slane %v4845_v53, 1  ;;  %v4666_v33 = vmul.f32 %v4604_v62, %v4410_v14  ;;  %v10017_v52 = vrot.slane %v8922_v31, 5  ;;  %s9249_s11 = sadd.s32 %s5645_s20, %s5418_s12 }
 0x649   : > { %v5064_v19 = vsel %vm5031_vm10, %v5063_v11, %v5062_v43  ;;  %v10018_v50 = vrot.slane %v8922_v31, 6  ;;  %v4852_v20 = vrot.slane %v4851_v63, 1  ;;  %v4854_v35 = vrot.slane %v4697_v2, 4  ;;  %s5646_s13 = sshll.u32 %s9249_s11, 7 }
 0x64a   : > { %v5065_v61 = vrot.slane %v4980_v4, 4  ;;  %v4981_v8 = vadd.f32 %v10017_v52, %v4835_v59  ;;  %v4847_v18 = vadd.f32 %v4846_v3, %v4845_v53  ;;  %v4698_v7 = vadd.f32 %v4666_v33, %v10019_v60  ;;  %s9281_s18 = scalar_lea.hbm %s10031_s22, %s5646_s13 }
 0x64b   : > { %v4982_v27 = vadd.f32 %v10018_v50, %v4841_v48  ;;  %v4667_v21 = vmul.f32 %v9171_v0, %v4411_v39  ;;  %v4853_v46 = vadd.f32 %v4852_v20, %v4851_v63  ;;  %v4855_v26 = vadd.f32 %v4854_v35, %v4697_v2  ;;  %v9212_v45 = vpop.permute.xlu0 %5145  ;;  %v9214_v14 = vpop.permute.xlu1 %5142  ;;  %v10024_v48 = vld [vmem:[#allocation40_spill] sm:$0xff] }
 0x64c   : > { %v5066_v1 = vsel %vm5034_vm11, %v5065_v61, %v5064_v19  ;;  %v5067_v62 = vrot.slane %v4981_v8, 3  ;;  %v10020_v47 = vrot.slane %v8922_v31, 7  ;;  %v4860_v40 = vrot.slane %v4698_v7, 4  ;;  %v10025_v19 = vld [vmem:[#allocation21_spill] sm:$0xff] }
 0x64d   : > { %v5069_v17 = vrot.slane %v4982_v27, 2  ;;  %v4699_v13 = vadd.f32 %v4667_v21, %v10021_v55  ;;  %v4668_v15 = vmul.f32 %v4618_v32, %v4412_v38  ;;  %v4984_v0 = vadd.f32 %v4853_v46, %v8962_v24 }
 0x64e   : > { %v4983_v41 = vadd.f32 %v10020_v47, %v4847_v18  ;;  %v5068_v6 = vsel %vm5037_vm12, %v5067_v62, %v5066_v1  ;;  %v4856_v16 = vrot.slane %v4855_v26, 2  ;;  %v4669_v25 = vmul.f32 %v4625_v10, %v4413_v37 }
 0x64f   : > { %v5070_v28 = vsel %vm5040_vm13, %v5069_v17, %v5068_v6  ;;  %v4861_v44 = vadd.f32 %v4860_v40, %v4698_v7  ;;  %v4866_v57 = vrot.slane %v4699_v13, 4  ;;  %v4700_v23 = vadd.f32 %v4668_v15, %v10022_v9  ;;  %v9221_v27 = vpop.permute.xlu0 %5151 }
 0x650   : > { %v5071_v56 = vrot.slane %v4983_v41, 1  ;;  %v4857_v31 = vadd.f32 %v4856_v16, %v4855_v26  ;;  %v4701_v49 = vadd.f32 %v4669_v25, %v10023_v12  ;;  %v4670_v32 = vmul.f32 %v4632_v51, %v4414_v36  ;;  %v10026_v51 = vld [vmem:[#allocation22_spill] sm:$0xff] }
 0x651   : > { %v4862_v10 = vrot.slane %v4861_v44, 2  ;;  %v4867_v11 = vadd.f32 %v4866_v57, %v4699_v13  ;;  %v4671_v58 = vmul.f32 %v4639_v22, %v4415_v34  ;;  %v4872_v53 = vrot.slane %v4700_v23, 4  ;;  %v9223_v22 = vpop.permute.xlu1 %5148 }
 0x652   : > { %v5072_v43 = vsel %vm5043_vm14, %v5071_v56, %v5070_v28  ;;  %v4858_v4 = vrot.slane %v4857_v31, 1  ;;  %v4878_v59 = vrot.slane %v4701_v49, 4  ;;  %v4702_v63 = vadd.f32 %v4670_v32, %v10024_v48 }
 0x653   : > { %5093 = vst [vmem:[%s6217_s2 + $0x10] sm:$0xff] %v5072_v43  ;;  %v4863_v2 = vadd.f32 %v4862_v10, %v4861_v44  ;;  %v4868_v39 = vrot.slane %v4867_v11, 2  ;;  %v4703_v61 = vadd.f32 %v4671_v58, %v10025_v19  ;;  %v5236_v3 = vrot.slane %v5137_v30, %v10026_v51  ;;  %v5158_v55 = vpop.permute.xlu0 %5157 }
 0x654   : > { %v4859_v33 = vadd.f32 %v4858_v4, %v4857_v31  ;;  %v4873_v52 = vadd.f32 %v4872_v53, %v4700_v23  ;;  %v4879_v8 = vadd.f32 %v4878_v59, %v4701_v49  ;;  %v4884_v50 = vrot.slane %v4702_v63, 4 }
 0x655   : > { %v4864_v20 = vrot.slane %v4863_v2, 1  ;;  %v4869_v35 = vadd.f32 %v4868_v39, %v4867_v11  ;;  %v4890_v38 = vrot.slane %v4703_v61, 4  ;;  %v5240_v1 = vrot.slane %v5140_v5, %v10026_v51  ;;  %v5155_v5 = vpop.permute.xlu1 %5154 }
 0x656   : > { %v10027_v18 = vrot.slane %v8962_v24, 1  ;;  %v4874_v7 = vrot.slane %v4873_v52, 2  ;;  %v4880_v21 = vrot.slane %v4879_v8, 2  ;;  %v4885_v37 = vadd.f32 %v4884_v50, %v4702_v63 }
 0x657   : > { %v4865_v62 = vadd.f32 %v4864_v20, %v4863_v2  ;;  %v4870_v17 = vrot.slane %v4869_v35, 1  ;;  %v4891_v46 = vadd.f32 %v4890_v38, %v4703_v61  ;;  %v5361_v26 = vsel %vm5025_vm8, %v5240_v1, %v5236_v3  ;;  %v617_v38 = vld [vmem:[%s6197_s0] sm:$0xff] }
 0x658   : > { %v4985_v60 = vadd.f32 %v10027_v18, %v4859_v33  ;;  %v4875_v47 = vadd.f32 %v4874_v7, %v4873_v52  ;;  %v4881_v41 = vadd.f32 %v4880_v21, %v4879_v8  ;;  %v4886_v40 = vrot.slane %v4885_v37, 2  ;;  %v5095_v33 = vld [vmem:[%s6207_s4] sm:$0xff] }
 0x659   : > { %v10028_v13 = vrot.slane %v8962_v24, 2  ;;  %v4871_v36 = vadd.f32 %v4870_v17, %v4869_v35  ;;  %v4892_v6 = vrot.slane %v4891_v46, 2  ;;  %v5248_v16 = vrot.slane %v9212_v45, %v10026_v51  ;;  %v9245_v45 = vpop.permute.xlu1 %5160  ;;  %v5788_v7 = vld [vmem:[#allocation2] sm:$0xff] }
 0x65a   : > { %v5073_v30 = vrot.slane %v4985_v60, 7  ;;  %v4876_v34 = vrot.slane %v4875_v47, 1  ;;  %v4882_v28 = vrot.slane %v4881_v41, 1  ;;  %v4887_v56 = vadd.f32 %v4886_v40, %v4885_v37 }
 0x65b   : > { %v4986_v15 = vadd.f32 %v10028_v13, %v4865_v62  ;;  %v4987_v57 = vadd.f32 %v4923_v42, %v4871_v36  ;;  %v4893_v31 = vadd.f32 %v4892_v6, %v4891_v46  ;;  %v5244_v9 = vrot.slane %v9214_v14, %v10026_v51 }
 0x65c   : > { %v5074_v25 = vsel %vm5025_vm8, %v5073_v30, %v4984_v0  ;;  %v4877_v23 = vadd.f32 %v4876_v34, %v4875_v47  ;;  %v4883_v12 = vadd.f32 %v4882_v28, %v4881_v41  ;;  %v4888_v49 = vrot.slane %v4887_v56, 1  ;;  %v9243_v0 = vpop.permute.xlu0 %5163 }
 0x65d   : > { %v5075_v44 = vrot.slane %v4986_v15, 6  ;;  %v5256_v32 = vrot.slane %v9221_v27, %v10026_v51  ;;  %v5077_v10 = vrot.slane %v4987_v57, 5  ;;  %v4894_v11 = vrot.slane %v4893_v31, 1  ;;  %v9266_v50 = vpop.permute.xlu1 %5166 }
 0x65e   : > { %v5362_v42 = vsel %vm5028_vm9, %v5244_v9, %v5361_v26  ;;  %v4988_v14 = vadd.f32 %v4924_v54, %v4877_v23  ;;  %v10029_v58 = vrot.slane %v8962_v24, 5  ;;  %v4889_v53 = vadd.f32 %v4888_v49, %v4887_v56 }
 0x65f   : > { %v5076_v43 = vsel %vm5028_vm9, %v5075_v44, %v5074_v25  ;;  %v5363_v59 = vsel %vm5031_vm10, %v5248_v16, %v5362_v42  ;;  %v4895_v63 = vadd.f32 %v4894_v11, %v4893_v31  ;;  %v5252_v2 = vrot.slane %v9223_v22, %v10026_v51 }
 0x660   : > { %v4989_v4 = vadd.f32 %v10029_v58, %v4883_v12  ;;  %v5078_v48 = vsel %vm5031_vm10, %v5077_v10, %v5076_v43  ;;  %v5264_v39 = vrot.slane %v5158_v55, %v10026_v51  ;;  %v5079_v19 = vrot.slane %v4988_v14, 4  ;;  %v9264_v8 = vpop.permute.xlu0 %5169 }
 0x661   : > { %v10030_v54 = vrot.slane %v8962_v24, 6  ;;  %v5260_v52 = vrot.slane %v5155_v5, %v10026_v51  ;;  %v4991_v27 = vadd.f32 %v4927_v29, %v4895_v63  ;;  %v5364_v22 = vsel %vm5034_vm11, %v5252_v2, %v5363_v59  ;;  %v9289_v17 = vpop.permute.xlu1 %5172 }
 0x662   : > { %v5081_v61 = vrot.slane %v4989_v4, 3  ;;  %v5080_v20 = vsel %vm5034_vm11, %v5079_v19, %v5078_v48  ;;  %v5365_v1 = vsel %vm5037_vm12, %v5256_v32, %v5364_v22  ;;  %v5099_v21 = vmul.f32 %v5788_v7, %v5095_v33 }
 0x663   : > { %v4990_v3 = vadd.f32 %v10030_v54, %v4889_v53  ;;  %v5085_v60 = vrot.slane %v4991_v27, 1  ;;  %v5366_v37 = vsel %vm5040_vm13, %v5260_v52, %v5365_v1 }
 0x664   : > { %v5082_v18 = vsel %vm5037_vm12, %v5081_v61, %v5080_v20  ;;  %v5367_v29 = vsel %vm5043_vm14, %v5264_v39, %v5366_v37  ;;  %v9287_v62 = vpop.permute.xlu0 %5184 }
 0x665   : > { %v5083_v35 = vrot.slane %v4990_v3, 2  ;;  %v5393_v26 = vmul.f32 %v5367_v29, %v617_v38 }
 0x667   : > { %v5084_v24 = vsel %vm5040_vm13, %v5083_v35, %v5082_v18  ;;  %v5397_v30 = vadd.f32 %v5393_v26, %v5099_v21 }
 0x668   : > { %v5086_v46 = vsel %vm5043_vm14, %v5085_v60, %v5084_v24 }
 0x669   : > { %5094 = vst [vmem:[%s6217_s2 + $0x18] sm:$0xff] %v5086_v46 }
 0x66a   : > { %5831 = shalt.err (!%p5828_p3)
}
 0x66b   : > { %s5832_s2 = scalar_lea.hbm %s9281_s18, 512  ;;  %s5836_s14 = scalar_lea.hbm %s10031_s22, 4096 }
 0x66c   : > { %p5833_p7 = scmp.ne.s32.totalorder %s9281_s18, %s5832_s2  ;;  %p5837_p4 = scmp.lt.s32.totalorder %s9281_s18, %s10031_s22 }
 0x66d   : > { %p5838_p11 = scmp.lt.s32.totalorder %s5836_s14, %s5832_s2 }
 0x66e   : > { %p5834_p6 = pnand %p5833_p7, %p6138_p2 }
 0x66f   : > { %p5839_p8 = por %p5838_p11, %p5837_p4 }
 0x670   : > { %p5835_p1 = pneg %p5834_p6 }
 0x672   : > { %p5840_p9 = pnand %p5839_p8, %p5835_p1 }
 0x674   : > { %5843 = shalt.err (!%p5840_p9)
}
 0x675   : > { %s5971_s23 = smov 128   ;;  %s5972_s12 = smov 256   ;;  %v5209_v47 = vpop.permute.xlu0 %5208  ;;  %v5188_v41 = vpop.permute.xlu1 %5187  ;;  %5401 = vst.msk [vmem:[#allocation2] sm:$0xff] %vm2444_vm4, %v5397_v30  ;;  %v5272_v25 = vrot.slane %v9243_v0, %v10026_v51  ;;  %v5268_v34 = vrot.slane %v9245_v45, %v10026_v51  ;;  %v5276_v28 = vrot.slane %v9266_v50, %v10026_v51  ;;  %v5280_v31 = vrot.slane %v9264_v8, %v10026_v51  ;;  %v5096_v9 = vld [vmem:[%s6207_s4 + $0x8] sm:$0xff]  ;;  %v5098_v35 = vld [vmem:[%s6207_s4 + $0x18] sm:$0xff]  ;;  %v5097_v24 = vld [vmem:[%s6207_s4 + $0x10] sm:$0xff] }
 0x676   : > { %5654 = dma.vmem_to_hbm [thread:$0]  (%p6138_p2), %s9283_s16, 512, %s9281_s18, %s9295_s7, %s5971_s23, %s5972_s12, %s5965_s10   ;;  %v5284_v12 = vrot.slane %v9289_v17, %v10026_v51  ;;  %v5304_v49 = vrot.slane %v5188_v41, %v10026_v51  ;;  %v5300_v10 = vrot.slane %v9287_v62, %v10026_v51  ;;  %v5789_v42 = vld [vmem:[#allocation2 + $0x8] sm:$0xff]  ;;  %v5332_v4 = vrot.slane %v5209_v47, %v10026_v51  ;;  %v5790_v46 = vld [vmem:[#allocation2 + $0x18] sm:$0xff] }
 0x677   : > { %v5368_v57 = vsel %vm5025_vm8, %v5272_v25, %v5268_v34  ;;  %v5100_v14 = vmul.f32 %v5789_v42, %v5096_v9  ;;  %v618_v22 = vld [vmem:[%s6197_s0 + $0x8] sm:$0xff]  ;;  %v5102_v26 = vmul.f32 %v5790_v46, %v5098_v35  ;;  %v5791_v25 = vld [vmem:[#allocation2 + $0x10] sm:$0xff] }
 0x678   : > { %v5369_v23 = vsel %vm5028_vm9, %v5276_v28, %v5368_v57  ;;  %v5375_v63 = vsel %vm5025_vm8, %v5304_v49, %v5300_v10  ;;  %v5101_v34 = vmul.f32 %v5791_v25, %v5097_v24 }
 0x679   : > { %v5191_v40 = vpop.permute.xlu0 %5190  ;;  %v5212_v55 = vpop.permute.xlu1 %5211  ;;  %v5370_v58 = vsel %vm5031_vm10, %v5280_v31, %v5369_v23 }
 0x67a   : > { %v5308_v32 = vrot.slane %v5191_v40, %v10026_v51  ;;  %v5336_v0 = vrot.slane %v5212_v55, %v10026_v51  ;;  %v5371_v48 = vsel %vm5034_vm11, %v5284_v12, %v5370_v58  ;;  %v620_v55 = vld [vmem:[%s6197_s0 + $0x18] sm:$0xff] }
 0x67c   : > { %v5376_v19 = vsel %vm5028_vm9, %v5308_v32, %v5375_v63  ;;  %v5382_v61 = vsel %vm5025_vm8, %v5336_v0, %v5332_v4 }
 0x67d   : > { %v5194_v5 = vpop.permute.xlu0 %5193  ;;  %v5215_v13 = vpop.permute.xlu1 %5214 }
 0x67e   : > { %v5340_v53 = vrot.slane %v5215_v13, %v10026_v51  ;;  %v5312_v2 = vrot.slane %v5194_v5, %v10026_v51  ;;  %v619_v13 = vld [vmem:[%s6197_s0 + $0x10] sm:$0xff] }
 0x680   : > { %v5383_v38 = vsel %vm5028_vm9, %v5340_v53, %v5382_v61  ;;  %v5377_v7 = vsel %vm5031_vm10, %v5312_v2, %v5376_v19 }
 0x681   : > { %v5197_v15 = vpop.permute.xlu0 %5196  ;;  %v5218_v36 = vpop.permute.xlu1 %5217 }
 0x682   : > { %v5344_v39 = vrot.slane %v5218_v36, %v10026_v51  ;;  %v5316_v54 = vrot.slane %v5197_v15, %v10026_v51 }
 0x684   : > { %v5384_v21 = vsel %vm5031_vm10, %v5344_v39, %v5383_v38  ;;  %v5378_v29 = vsel %vm5034_vm11, %v5316_v54, %v5377_v7 }
 0x685   : > { %v5176_v6 = vpop.permute.xlu0 %5175  ;;  %v5221_v16 = vpop.permute.xlu1 %5220 }
 0x686   : > { %v5288_v11 = vrot.slane %v5176_v6, %v10026_v51  ;;  %v5348_v3 = vrot.slane %v5221_v16, %v10026_v51 }
 0x688   : > { %v5372_v8 = vsel %vm5037_vm12, %v5288_v11, %v5371_v48  ;;  %v5385_v62 = vsel %vm5034_vm11, %v5348_v3, %v5384_v21 }
 0x689   : > { %v5224_v56 = vpop.permute.xlu0 %5223  ;;  %v5200_v44 = vpop.permute.xlu1 %5199 }
 0x68a   : > { %v5352_v50 = vrot.slane %v5224_v56, %v10026_v51  ;;  %v5320_v27 = vrot.slane %v5200_v44, %v10026_v51 }
 0x68c   : > { %v5386_v41 = vsel %vm5037_vm12, %v5352_v50, %v5385_v62  ;;  %v5379_v40 = vsel %vm5037_vm12, %v5320_v27, %v5378_v29 }
 0x68d   : > { %v5203_v45 = vpop.permute.xlu0 %5202  ;;  %v5179_v43 = vpop.permute.xlu1 %5178 }
 0x68e   : > { %v5292_v59 = vrot.slane %v5179_v43, %v10026_v51  ;;  %v5324_v1 = vrot.slane %v5203_v45, %v10026_v51 }
 0x690   : > { %v5373_v18 = vsel %vm5040_vm13, %v5292_v59, %v5372_v8  ;;  %v5380_v36 = vsel %vm5040_vm13, %v5324_v1, %v5379_v40 }
 0x691   : > { %v5182_v33 = vpop.permute.xlu0 %5181  ;;  %v5227_v52 = vpop.permute.xlu1 %5226 }
 0x692   : > { %v5296_v20 = vrot.slane %v5182_v33, %v10026_v51  ;;  %v5356_v60 = vrot.slane %v5227_v52, %v10026_v51 }
 0x694   : > { %v5374_v37 = vsel %vm5043_vm14, %v5296_v20, %v5373_v18  ;;  %v5387_v16 = vsel %vm5040_vm13, %v5356_v60, %v5386_v41 }
 0x695   : > { %v5394_v17 = vmul.f32 %v5374_v37, %v618_v22  ;;  %v5230_v30 = vpop.permute.xlu0 %5229  ;;  %v5206_v47 = vpop.permute.xlu1 %5205 }
 0x696   : > { %v5360_v5 = vrot.slane %v5230_v30, %v10026_v51  ;;  %v5328_v15 = vrot.slane %v5206_v47, %v10026_v51 }
 0x697   : > { %v5398_v6 = vadd.f32 %v5394_v17, %v5100_v14 }
 0x698   : > { %v5388_v28 = vsel %vm5043_vm14, %v5360_v5, %v5387_v16  ;;  %v5381_v56 = vsel %vm5043_vm14, %v5328_v15, %v5380_v36 }
 0x699   : > { %5402 = vst.msk [vmem:[#allocation2 + $0x8] sm:$0xff] %vm2444_vm4, %v5398_v6  ;;  %v5396_v44 = vmul.f32 %v5388_v28, %v620_v55  ;;  %v5395_v57 = vmul.f32 %v5381_v56, %v619_v13 }
 0x69b   : > { %v5400_v31 = vadd.f32 %v5396_v44, %v5102_v26  ;;  %v5399_v9 = vadd.f32 %v5395_v57, %v5101_v34 }
 0x69d   : > { %5404 = vst.msk [vmem:[#allocation2 + $0x18] sm:$0xff] %vm2444_vm4, %v5400_v31  ;;  %5403 = vst.msk [vmem:[#allocation2 + $0x10] sm:$0xff] %vm2444_vm4, %v5399_v9 }
 0x69e PF: > { %p5660_p2 = scmp.ge.s32.totalorder %s5954_s17, 2  ;;  %s5438_s0 = sand.u32 1, %s5906_s27  }
 0x69f   : > { %s5439_s4 = scalar_lea.sflag [#allocation6], %s5438_s0 }
 0x6a0   : > { %p5657_p10 = pnand %p5660_p2, %p6149_p5 }
 0x6a2   : > { %p5658_p12 = pneg %p5657_p10 }
 0x6a4   : > { %5901 = dma.done.wait (%p5658_p12), %s5439_s4, 512  }
 0x6a5   : > { %5903 = vsyncadd (%p5658_p12), %s5439_s4, 4294966784  ;;  %s24_s17 = sadd.s32 1, %s5954_s17   ;;  %s10035_s20 = sld [smem:[#allocation10_spill]] }
 0x6a6   : > { %p9385_p13 = scmp.ge.s32.totalorder %s24_s17, 10   ;;  %s10036_s30 = sld [smem:[#allocation18_spill]] }
 0x6a7   : > { %s10037_s11 = sld [smem:[#allocation11_spill]]  ;;  %s10046_s27 = smov %s5922_s9 }
 0x6a8   : > { %s10038_s13 = sld [smem:[#allocation19_spill]]  ;;  %s10047_s28 = smov %s5914_s29 }
 0x6a9   : > { %s10039_s16 = sld [smem:[#allocation12_spill]] }
 0x6aa   : > { %s10040_s12 = sld [smem:[#allocation13_spill]] }
 0x6ab   : > { %s10041_s21 = sld [smem:[#allocation14_spill]]  ;;  %s10048_s29 = smov %s10035_s20 }
 0x6ac   : > { %s10042_s14 = sld [smem:[#allocation15_spill]] }
 0x6ad   : > { %s10043_s15 = sld [smem:[#allocation16_spill]]  ;;  %s10049_s9 = smov %s10037_s11 }
 0x6ae   : > { %s10044_s25 = sld [smem:[#allocation17_spill]]  ;;  %s10050_s10 = smov %s10038_s13 }
 0x6af   : > { %s10051_s11 = smov %s10039_s16 }
 0x6b0   :  { %23 = sbr.rel (!%p9385_p13) target bundleno = 19 (0x13), region = 165 }
 0x6b1   : > { %s10052_s13 = smov %s10041_s21 }
 0x6b4   : > { %s10053_s16 = smov %s10044_s25 }
 0x6b5   :  { %5444 = vsyncpa [#allocation5], 1 }
 0x6b6   :  { %5446 = vsyncpa [#allocation5 + $0x1], 1 }
 0x6b7   :  { %5447 = vsyncpa [#allocation6], 1 }
 0x6b8   :  { %5449 = vsyncpa [#allocation6 + $0x1], 1 }

</bundles_post_ra>
